<compile_context>
chip_gen: v7x
topology: tpu7x:2x2x1
jax: 0.10.0
libtpu: 0.0.40
codegen_flags: <defaults>
</compile_context>

<pallas_src>
import functools

import jax
import jax.numpy as jnp
import numpy as np
from jax import lax
from jax.experimental import pallas as pl
from jax.experimental.pallas import tpu as pltpu

# ---------------- static geometry (LeNet on 3x32x32, implied by 16*5*5 flatten) ----
CIN, H, W = 3, 32, 32
KH = KW = 5
CIN_PAD = 8              # conv input channels padded to one sublane tile
C1_PAD = 8               # conv1 output channels 6 -> 8
C2 = 16                  # conv2 output channels (exactly 16)
SPAT1 = H * W            # 1024 conv1 output positions (full-width rows, pitch 32)
SPAT_IN = 1280           # per-image input lanes (>= 1023 + 4*32 + 4 + 1), zero padded
P1_PITCH = 16            # pooled-1 row pitch (14 real cols + 2 zero cols)
SPAT2 = 14 * P1_PITCH    # 224 conv2 output positions (pitch 16)
P2_LANES = 32            # pooled-2 lanes per channel (25 real: 5*py2+px2, +7 zero)
HPAD = 128               # padded FC hidden width / class lanes
NCLS = 10


def _round_up(x, m):
    return (x + m - 1) // m * m


def _pad_to(a, axis, size):
    pad = [(0, 0)] * a.ndim
    pad[axis] = (0, size - a.shape[axis])
    return jnp.pad(a, pad)


# --------------------------------- Pallas kernels --------------------------------- #

def _conv_stack_kernel(nb, x_ref, w1_ref, b1_ref, w2_ref, b2_ref,
                       s1_ref, s2_ref, o_ref):
    """conv1+ReLU+pool1+conv2+ReLU+pool2 for `nb` images, fully VMEM resident.

    Per image: channels live in sublanes, flattened spatial in lanes, so every conv
    tap is a lane shift and each tap dot is (Cout, 8) @ (8, spatial) in bf16.
    """
    b1 = b1_ref[...]                                   # (8, 1)  f32
    b2 = b2_ref[...]                                   # (16, 1) f32

    for i in range(nb):                                # static unroll over the block
        xi = x_ref[i].astype(jnp.bfloat16)             # (8, SPAT_IN)

        # ---- conv1 (5x5 valid): acc[c, oy*32+ox]; full-width rows (garbage cols
        #      for ox>=28 / oy>=28 are never selected by the pool matrix) ----
        acc = jnp.zeros((C1_PAD, SPAT1), jnp.float32)
        for kh in range(KH):
            for kw in range(KW):
                off = kh * W + kw
                acc = acc + jnp.dot(w1_ref[kh * KW + kw], xi[:, off:off + SPAT1],
                                    preferred_element_type=jnp.float32)
        r1 = jnp.maximum(acc + b1, 0.0)

        # ---- fused 2x2/2 max pool: VPU max over 4 lane-shifted copies, then one
        #      precomputed 0/1 selection matmul that also re-pitches 32 -> 16 ----
        r1p = jnp.concatenate([r1, jnp.zeros((C1_PAD, 64), jnp.float32)], axis=1)
        mx1 = jnp.maximum(
            jnp.maximum(r1p[:, 0:SPAT1], r1p[:, 1:SPAT1 + 1]),
            jnp.maximum(r1p[:, W:SPAT1 + W], r1p[:, W + 1:SPAT1 + W + 1]))
        p1 = jnp.dot(mx1.astype(jnp.bfloat16), s1_ref[...],
                     preferred_element_type=jnp.float32)        # (8, 224)

        # ---- conv2 (5x5 valid) on the pitch-16 pooled image; K = 8 (6 real ch) ----
        p1b = jnp.concatenate([p1, jnp.zeros((CIN_PAD, 96), jnp.float32)],
                              axis=1).astype(jnp.bfloat16)       # (8, 320)
        acc2 = jnp.zeros((C2, SPAT2), jnp.float32)
        for kh in range(KH):
            for kw in range(KW):
                off = kh * P1_PITCH + kw
                acc2 = acc2 + jnp.dot(w2_ref[kh * KW + kw], p1b[:, off:off + SPAT2],
                                      preferred_element_type=jnp.float32)
        r2 = jnp.maximum(acc2 + b2, 0.0)

        # ---- fused 2x2/2 max pool -> (16, 32): lane q2 = 5*py2+px2 (25 real) ----
        r2p = jnp.concatenate([r2, jnp.zeros((C2, 32), jnp.float32)], axis=1)
        mx2 = jnp.maximum(
            jnp.maximum(r2p[:, 0:SPAT2], r2p[:, 1:SPAT2 + 1]),
            jnp.maximum(r2p[:, P1_PITCH:SPAT2 + P1_PITCH],
                        r2p[:, P1_PITCH + 1:SPAT2 + P1_PITCH + 1]))
        p2 = jnp.dot(mx2.astype(jnp.bfloat16), s2_ref[...],
                     preferred_element_type=jnp.float32)        # (16, 32)
        o_ref[i] = p2.astype(o_ref.dtype)


def _fc_stack_kernel(n_classes, x_ref, w1_ref, b1_ref, w2_ref, b2_ref,
                     w3_ref, b3_ref, o_ref):
    """fc1+ReLU+fc2+ReLU+fc3+log_softmax over a (TM, 512) tile of batch rows.

    MXU operands are bf16 (weights pre-cast on host, activations cast per dot);
    accumulation and all element-wise math stay in f32 (v5e-friendly).
    """
    x = x_ref[...]                                               # (TM, 512) bf16
    h = jnp.dot(x, w1_ref[...], preferred_element_type=jnp.float32) + b1_ref[...]
    h = jnp.maximum(h, 0.0)
    h = jnp.dot(h.astype(jnp.bfloat16), w2_ref[...],
                preferred_element_type=jnp.float32) + b2_ref[...]
    h = jnp.maximum(h, 0.0)
    y = jnp.dot(h.astype(jnp.bfloat16), w3_ref[...],
                preferred_element_type=jnp.float32) + b3_ref[...]
    # mask padded logit lanes, then numerically stable log_softmax (dim=1)
    col = lax.broadcasted_iota(jnp.int32, y.shape, 1)
    y = jnp.where(col < n_classes, y, -1e30)
    m = jnp.max(y, axis=1, keepdims=True)
    s = y - m
    lse = jnp.log(jnp.sum(jnp.exp(s), axis=1, keepdims=True))
    o_ref[...] = (s - lse).astype(o_ref.dtype)


# ----------------------------- host-side constant prep ---------------------------- #

def _pool_select_matrices():
    """0/1 stride-2 lane-selection matrices (exact in bf16), built on the host."""
    s1 = np.zeros((SPAT1, SPAT2), np.float32)
    for py in range(14):
        for px in range(14):
            s1[64 * py + 2 * px, P1_PITCH * py + px] = 1.0
    s2 = np.zeros((SPAT2, P2_LANES), np.float32)
    for py in range(5):
        for px in range(5):
            s2[32 * py + 2 * px, 5 * py + px] = 1.0
    return jnp.asarray(s1, jnp.bfloat16), jnp.asarray(s2, jnp.bfloat16)


def _conv_taps(w, cout_pad, cin_pad):
    """(Cout, Cin, 5, 5) -> (25, cout_pad, cin_pad) bf16; taps[kh*5+kw][co, ci]."""
    cout, cin, kh, kw = w.shape
    t = jnp.transpose(w.astype(jnp.float32), (2, 3, 0, 1)).reshape(kh * kw, cout, cin)
    t = _pad_to(_pad_to(t, 1, cout_pad), 2, cin_pad)
    return t.astype(jnp.bfloat16)


# ------------------------------- wrapper / forward --------------------------------- #

@jax.jit
def lenet_forward(params, x):
    B = x.shape[0]
    assert x.shape[1:] == (CIN, H, W), "LeNet flatten (16*5*5) implies 3x32x32 input"

    # ---------------- kernel A: fused conv stack ----------------
    NB = 8 if B >= 16 else 1                       # images per grid step
    BA = _round_up(B, NB)
    xr = x.astype(jnp.float32).reshape(B, CIN, SPAT1)
    xr = jnp.pad(xr, ((0, BA - B), (0, CIN_PAD - CIN), (0, SPAT_IN - SPAT1)))

    w1t = _conv_taps(params["conv1_w"], C1_PAD, CIN_PAD)          # (25, 8, 8)
    b1 = _pad_to(params["conv1_b"].astype(jnp.float32), 0, C1_PAD).reshape(C1_PAD, 1)
    w2t = _conv_taps(params["conv2_w"], C2, CIN_PAD)              # (25, 16, 8)
    b2 = params["conv2_b"].astype(jnp.float32).reshape(C2, 1)
    s1, s2 = _pool_select_matrices()                              # (1024,224),(224,32)

    feat = pl.pallas_call(
        functools.partial(_conv_stack_kernel, NB),
        out_shape=jax.ShapeDtypeStruct((BA, C2, P2_LANES), jnp.bfloat16),
        grid=(BA // NB,),
        in_specs=[
            pl.BlockSpec((NB, CIN_PAD, SPAT_IN), lambda b: (b, 0, 0)),
            pl.BlockSpec((KH * KW, C1_PAD, CIN_PAD), lambda b: (0, 0, 0)),
            pl.BlockSpec((C1_PAD, 1), lambda b: (0, 0)),
            pl.BlockSpec((KH * KW, C2, CIN_PAD), lambda b: (0, 0, 0)),
            pl.BlockSpec((C2, 1), lambda b: (0, 0)),
            pl.BlockSpec((SPAT1, SPAT2), lambda b: (0, 0)),
            pl.BlockSpec((SPAT2, P2_LANES), lambda b: (0, 0)),
        ],
        out_specs=pl.BlockSpec((NB, C2, P2_LANES), lambda b: (b, 0, 0)),
        compiler_params=pltpu.CompilerParams(
            dimension_semantics=("parallel",),
            vmem_limit_bytes=32 * 1024 * 1024),   # few-MiB footprint; safe on v7x 64MiB
    )(xr, w1t, b1, w2t, b2, s1, s2)

    # ---------------- kernel B: fused FC stack + log_softmax ----------------
    # torch flatten order f = c*25 + (5*py2+px2) and the q2-padding (25 -> 32) are
    # folded into the fc1 weight, so fc1's contraction is the compact K = 512.
    w1 = params["fc1_w"].astype(jnp.float32).reshape(120, C2, 25)   # [j, c, q2]
    w1 = jnp.transpose(w1, (1, 2, 0))                               # [c, q2, j]
    w1 = _pad_to(_pad_to(w1, 1, P2_LANES), 2, HPAD)                 # [16, 32, 128]
    w1f = w1.reshape(C2 * P2_LANES, HPAD).astype(jnp.bfloat16)      # (512, 128)
    b1f = _pad_to(params["fc1_b"].astype(jnp.float32), 0, HPAD).reshape(1, HPAD)
    w2f = _pad_to(_pad_to(params["fc2_w"].astype(jnp.float32).T, 0, HPAD),
                  1, HPAD).astype(jnp.bfloat16)
    b2f = _pad_to(params["fc2_b"].astype(jnp.float32), 0, HPAD).reshape(1, HPAD)
    w3f = _pad_to(_pad_to(params["fc3_w"].astype(jnp.float32).T, 0, HPAD),
                  1, HPAD).astype(jnp.bfloat16)
    b3f = _pad_to(params["fc3_b"].astype(jnp.float32), 0, HPAD).reshape(1, HPAD)

    # row tile: 256 for big batches; >= 2 grid steps (v7x megacore) when B allows
    if B >= 512:
        TM = 256
    elif B >= 32:
        TM = _round_up((B + 1) // 2, 16)
    else:
        TM = _round_up(B, 16)
    BP = _round_up(B, TM)

    feat2 = _pad_to(feat.reshape(BA, C2 * P2_LANES), 0, BP)          # (BP, 512) bf16

    out = pl.pallas_call(
        functools.partial(_fc_stack_kernel, NCLS),
        out_shape=jax.ShapeDtypeStruct((BP, HPAD), jnp.float32),
        grid=(BP // TM,),
        in_specs=[
            pl.BlockSpec((TM, C2 * P2_LANES), lambda i: (i, 0)),
            pl.BlockSpec((C2 * P2_LANES, HPAD), lambda i: (0, 0)),
            pl.BlockSpec((1, HPAD), lambda i: (0, 0)),
            pl.BlockSpec((HPAD, HPAD), lambda i: (0, 0)),
            pl.BlockSpec((1, HPAD), lambda i: (0, 0)),
            pl.BlockSpec((HPAD, HPAD), lambda i: (0, 0)),
            pl.BlockSpec((1, HPAD), lambda i: (0, 0)),
        ],
        out_specs=pl.BlockSpec((TM, HPAD), lambda i: (i, 0)),
        compiler_params=pltpu.CompilerParams(
            dimension_semantics=("parallel",),
            vmem_limit_bytes=32 * 1024 * 1024),
    )(feat2, w1f, b1f, w2f, b2f, w3f, b3f)

    return out[:B, :NCLS]


# ------------------------------ params / reference --------------------------------- #

def init_params(key):
    """Deterministic synthetic params, PyTorch-default-style U(-1/sqrt(fan_in), ...)."""
    def uni(k, shape, fan_in):
        bound = 1.0 / jnp.sqrt(fan_in)
        return jax.random.uniform(k, shape, jnp.float32, -bound, bound)

    ks = jax.random.split(key, 10)
    return {
        "conv1_w": uni(ks[0], (6, 3, 5, 5), 3 * 5 * 5),
        "conv1_b": uni(ks[1], (6,), 3 * 5 * 5),
        "conv2_w": uni(ks[2], (16, 6, 5, 5), 6 * 5 * 5),
        "conv2_b": uni(ks[3], (16,), 6 * 5 * 5),
        "fc1_w": uni(ks[4], (120, 400), 400),
        "fc1_b": uni(ks[5], (120,), 400),
        "fc2_w": uni(ks[6], (84, 120), 120),
        "fc2_b": uni(ks[7], (84,), 120),
        "fc3_w": uni(ks[8], (10, 84), 84),
        "fc3_b": uni(ks[9], (10,), 84),
    }


def _maxpool_ref(y):
    b, c, h, w = y.shape
    return y.reshape(b, c, h // 2, 2, w // 2, 2).max(axis=(3, 5))


def lenet_reference(params, x):
    hp = lax.Precision.HIGHEST
    y = lax.conv(x, params["conv1_w"], (1, 1), "VALID", precision=hp)
    y = jnp.maximum(y + params["conv1_b"][None, :, None, None], 0.0)
    y = _maxpool_ref(y)
    y = lax.conv(y, params["conv2_w"], (1, 1), "VALID", precision=hp)
    y = jnp.maximum(y + params["conv2_b"][None, :, None, None], 0.0)
    y = _maxpool_ref(y)
    y = y.reshape(y.shape[0], -1)
    y = jnp.maximum(jnp.dot(y, params["fc1_w"].T, precision=hp) + params["fc1_b"], 0.0)
    y = jnp.maximum(jnp.dot(y, params["fc2_w"].T, precision=hp) + params["fc2_b"], 0.0)
    y = jnp.dot(y, params["fc3_w"].T, precision=hp) + params["fc3_b"]
    return jax.nn.log_softmax(y, axis=1)


if __name__ == "__main__":
    key = jax.random.PRNGKey(0)
    k_param, k_x = jax.random.split(key)
    params = init_params(k_param)
    # LeNet's flatten to 16*5*5 implies a 3x32x32 (CIFAR-style) input.
    x = jax.random.normal(k_x, (2, 3, 32, 32), dtype=jnp.float32)

    out = lenet_forward(params, x)
    jax.block_until_ready(out)

    assert out.shape == (2, 10)
    # log_softmax rows must exp-sum to 1 (computed in f32 in-kernel)
    assert bool(jnp.allclose(jnp.sum(jnp.exp(out), axis=1), 1.0, atol=1e-4))
    # end-to-end check against a pure-JAX/XLA f32 reference of the PyTorch module
    # (tolerance sized for bf16 MXU operands with f32 accumulation)
    ref = lenet_reference(params, x)
    assert bool(jnp.allclose(out, ref, atol=5e-2, rtol=5e-2)), \
        float(jnp.max(jnp.abs(out - ref)))
    print("KERNEL_OK")
</pallas_src>

<mosaic_0001>
module attributes {stable_mosaic.version = 11 : i64} {
  func.func @_conv_stack_kernel(%arg0: i32, %arg1: memref<1x8x1280xf32, #tpu.memory_space<vmem>>, %arg2: memref<25x8x8xbf16, #tpu.memory_space<vmem>>, %arg3: memref<8x1xf32, #tpu.memory_space<vmem>>, %arg4: memref<25x16x8xbf16, #tpu.memory_space<vmem>>, %arg5: memref<16x1xf32, #tpu.memory_space<vmem>>, %arg6: memref<1024x224xbf16, #tpu.memory_space<vmem>>, %arg7: memref<224x32xbf16, #tpu.memory_space<vmem>>, %arg8: memref<1x16x32xbf16, #tpu.memory_space<vmem>>) attributes {dimension_semantics = [#tpu.dimension_semantics<parallel>], iteration_bounds = array<i64: 2>, scalar_prefetch = 0 : i64, scratch_operands = 0 : i64, tpu.core_type = #tpu.core_type<tc>, window_params = [{transform_indices = @transform_0, window_bounds = array<i64: 1, 8, 1280>}, {pipeline_mode = #tpu.pipeline_mode<synchronous>, transform_indices = @transform_1, window_bounds = array<i64: 25, 8, 8>}, {pipeline_mode = #tpu.pipeline_mode<synchronous>, transform_indices = @transform_2, window_bounds = array<i64: 8, 1>}, {pipeline_mode = #tpu.pipeline_mode<synchronous>, transform_indices = @transform_3, window_bounds = array<i64: 25, 16, 8>}, {pipeline_mode = #tpu.pipeline_mode<synchronous>, transform_indices = @transform_4, window_bounds = array<i64: 16, 1>}, {pipeline_mode = #tpu.pipeline_mode<synchronous>, transform_indices = @transform_5, window_bounds = array<i64: 1024, 224>}, {pipeline_mode = #tpu.pipeline_mode<synchronous>, transform_indices = @transform_6, window_bounds = array<i64: 224, 32>}, {transform_indices = @transform_7, window_bounds = array<i64: 1, 16, 32>}]} {
    %c0 = arith.constant 0 : index
    %c0_0 = arith.constant 0 : index
    %0 = vector.load %arg3[%c0, %c0_0] : memref<8x1xf32, #tpu.memory_space<vmem>>, vector<8x1xf32>
    %c0_1 = arith.constant 0 : index
    %c0_2 = arith.constant 0 : index
    %1 = vector.load %arg5[%c0_1, %c0_2] : memref<16x1xf32, #tpu.memory_space<vmem>>, vector<16x1xf32>
    %c0_3 = arith.constant 0 : index
    %c0_4 = arith.constant 0 : index
    %c0_5 = arith.constant 0 : index
    %2 = vector.load %arg1[%c0_3, %c0_4, %c0_5] : memref<1x8x1280xf32, #tpu.memory_space<vmem>>, vector<1x8x1280xf32>
    %3 = vector.shape_cast %2 : vector<1x8x1280xf32> to vector<8x1280xf32>
    %4 = arith.truncf %3 : vector<8x1280xf32> to vector<8x1280xbf16>
    %cst = arith.constant 0.000000e+00 : f32
    %5 = vector.broadcast %cst : f32 to vector<8x1024xf32>
    %c0_6 = arith.constant 0 : index
    %c0_7 = arith.constant 0 : index
    %c0_8 = arith.constant 0 : index
    %6 = vector.load %arg2[%c0_6, %c0_7, %c0_8] : memref<25x8x8xbf16, #tpu.memory_space<vmem>>, vector<1x8x8xbf16>
    %7 = vector.shape_cast %6 : vector<1x8x8xbf16> to vector<8x8xbf16>
    %8 = vector.extract_strided_slice %4 {offsets = [0, 0], sizes = [8, 1024], strides = [1, 1]} : vector<8x1280xbf16> to vector<8x1024xbf16>
    %cst_9 = arith.constant dense<0.000000e+00> : vector<8x1024xf32>
    %9 = tpu.matmul %7, %8, %cst_9 {dimension_numbers = #tpu.dot_dimension_numbers<[1], [0], [0], [1], [0, 0, 1, 1], [], []>} : vector<8x8xbf16>, vector<8x1024xbf16>, vector<8x1024xf32> -> vector<8x1024xf32>
    %10 = arith.addf %5, %9 : vector<8x1024xf32>
    %c1 = arith.constant 1 : index
    %c0_10 = arith.constant 0 : index
    %c0_11 = arith.constant 0 : index
    %11 = vector.load %arg2[%c1, %c0_10, %c0_11] : memref<25x8x8xbf16, #tpu.memory_space<vmem>>, vector<1x8x8xbf16>
    %12 = vector.shape_cast %11 : vector<1x8x8xbf16> to vector<8x8xbf16>
    %13 = vector.extract_strided_slice %4 {offsets = [0, 1], sizes = [8, 1024], strides = [1, 1]} : vector<8x1280xbf16> to vector<8x1024xbf16>
    %cst_12 = arith.constant dense<0.000000e+00> : vector<8x1024xf32>
    %14 = tpu.matmul %12, %13, %cst_12 {dimension_numbers = #tpu.dot_dimension_numbers<[1], [0], [0], [1], [0, 0, 1, 1], [], []>} : vector<8x8xbf16>, vector<8x1024xbf16>, vector<8x1024xf32> -> vector<8x1024xf32>
    %15 = arith.addf %10, %14 : vector<8x1024xf32>
    %c2 = arith.constant 2 : index
    %c0_13 = arith.constant 0 : index
    %c0_14 = arith.constant 0 : index
    %16 = vector.load %arg2[%c2, %c0_13, %c0_14] : memref<25x8x8xbf16, #tpu.memory_space<vmem>>, vector<1x8x8xbf16>
    %17 = vector.shape_cast %16 : vector<1x8x8xbf16> to vector<8x8xbf16>
    %18 = vector.extract_strided_slice %4 {offsets = [0, 2], sizes = [8, 1024], strides = [1, 1]} : vector<8x1280xbf16> to vector<8x1024xbf16>
    %cst_15 = arith.constant dense<0.000000e+00> : vector<8x1024xf32>
    %19 = tpu.matmul %17, %18, %cst_15 {dimension_numbers = #tpu.dot_dimension_numbers<[1], [0], [0], [1], [0, 0, 1, 1], [], []>} : vector<8x8xbf16>, vector<8x1024xbf16>, vector<8x1024xf32> -> vector<8x1024xf32>
    %20 = arith.addf %15, %19 : vector<8x1024xf32>
    %c3 = arith.constant 3 : index
    %c0_16 = arith.constant 0 : index
    %c0_17 = arith.constant 0 : index
    %21 = vector.load %arg2[%c3, %c0_16, %c0_17] : memref<25x8x8xbf16, #tpu.memory_space<vmem>>, vector<1x8x8xbf16>
    %22 = vector.shape_cast %21 : vector<1x8x8xbf16> to vector<8x8xbf16>
    %23 = vector.extract_strided_slice %4 {offsets = [0, 3], sizes = [8, 1024], strides = [1, 1]} : vector<8x1280xbf16> to vector<8x1024xbf16>
    %cst_18 = arith.constant dense<0.000000e+00> : vector<8x1024xf32>
    %24 = tpu.matmul %22, %23, %cst_18 {dimension_numbers = #tpu.dot_dimension_numbers<[1], [0], [0], [1], [0, 0, 1, 1], [], []>} : vector<8x8xbf16>, vector<8x1024xbf16>, vector<8x1024xf32> -> vector<8x1024xf32>
    %25 = arith.addf %20, %24 : vector<8x1024xf32>
    %c4 = arith.constant 4 : index
    %c0_19 = arith.constant 0 : index
    %c0_20 = arith.constant 0 : index
    %26 = vector.load %arg2[%c4, %c0_19, %c0_20] : memref<25x8x8xbf16, #tpu.memory_space<vmem>>, vector<1x8x8xbf16>
    %27 = vector.shape_cast %26 : vector<1x8x8xbf16> to vector<8x8xbf16>
    %28 = vector.extract_strided_slice %4 {offsets = [0, 4], sizes = [8, 1024], strides = [1, 1]} : vector<8x1280xbf16> to vector<8x1024xbf16>
    %cst_21 = arith.constant dense<0.000000e+00> : vector<8x1024xf32>
    %29 = tpu.matmul %27, %28, %cst_21 {dimension_numbers = #tpu.dot_dimension_numbers<[1], [0], [0], [1], [0, 0, 1, 1], [], []>} : vector<8x8xbf16>, vector<8x1024xbf16>, vector<8x1024xf32> -> vector<8x1024xf32>
    %30 = arith.addf %25, %29 : vector<8x1024xf32>
    %c5 = arith.constant 5 : index
    %c0_22 = arith.constant 0 : index
    %c0_23 = arith.constant 0 : index
    %31 = vector.load %arg2[%c5, %c0_22, %c0_23] : memref<25x8x8xbf16, #tpu.memory_space<vmem>>, vector<1x8x8xbf16>
    %32 = vector.shape_cast %31 : vector<1x8x8xbf16> to vector<8x8xbf16>
    %33 = vector.extract_strided_slice %4 {offsets = [0, 32], sizes = [8, 1024], strides = [1, 1]} : vector<8x1280xbf16> to vector<8x1024xbf16>
    %cst_24 = arith.constant dense<0.000000e+00> : vector<8x1024xf32>
    %34 = tpu.matmul %32, %33, %cst_24 {dimension_numbers = #tpu.dot_dimension_numbers<[1], [0], [0], [1], [0, 0, 1, 1], [], []>} : vector<8x8xbf16>, vector<8x1024xbf16>, vector<8x1024xf32> -> vector<8x1024xf32>
    %35 = arith.addf %30, %34 : vector<8x1024xf32>
    %c6 = arith.constant 6 : index
    %c0_25 = arith.constant 0 : index
    %c0_26 = arith.constant 0 : index
    %36 = vector.load %arg2[%c6, %c0_25, %c0_26] : memref<25x8x8xbf16, #tpu.memory_space<vmem>>, vector<1x8x8xbf16>
    %37 = vector.shape_cast %36 : vector<1x8x8xbf16> to vector<8x8xbf16>
    %38 = vector.extract_strided_slice %4 {offsets = [0, 33], sizes = [8, 1024], strides = [1, 1]} : vector<8x1280xbf16> to vector<8x1024xbf16>
    %cst_27 = arith.constant dense<0.000000e+00> : vector<8x1024xf32>
    %39 = tpu.matmul %37, %38, %cst_27 {dimension_numbers = #tpu.dot_dimension_numbers<[1], [0], [0], [1], [0, 0, 1, 1], [], []>} : vector<8x8xbf16>, vector<8x1024xbf16>, vector<8x1024xf32> -> vector<8x1024xf32>
    %40 = arith.addf %35, %39 : vector<8x1024xf32>
    %c7 = arith.constant 7 : index
    %c0_28 = arith.constant 0 : index
    %c0_29 = arith.constant 0 : index
    %41 = vector.load %arg2[%c7, %c0_28, %c0_29] : memref<25x8x8xbf16, #tpu.memory_space<vmem>>, vector<1x8x8xbf16>
    %42 = vector.shape_cast %41 : vector<1x8x8xbf16> to vector<8x8xbf16>
    %43 = vector.extract_strided_slice %4 {offsets = [0, 34], sizes = [8, 1024], strides = [1, 1]} : vector<8x1280xbf16> to vector<8x1024xbf16>
    %cst_30 = arith.constant dense<0.000000e+00> : vector<8x1024xf32>
    %44 = tpu.matmul %42, %43, %cst_30 {dimension_numbers = #tpu.dot_dimension_numbers<[1], [0], [0], [1], [0, 0, 1, 1], [], []>} : vector<8x8xbf16>, vector<8x1024xbf16>, vector<8x1024xf32> -> vector<8x1024xf32>
    %45 = arith.addf %40, %44 : vector<8x1024xf32>
    %c8 = arith.constant 8 : index
    %c0_31 = arith.constant 0 : index
    %c0_32 = arith.constant 0 : index
    %46 = vector.load %arg2[%c8, %c0_31, %c0_32] : memref<25x8x8xbf16, #tpu.memory_space<vmem>>, vector<1x8x8xbf16>
    %47 = vector.shape_cast %46 : vector<1x8x8xbf16> to vector<8x8xbf16>
    %48 = vector.extract_strided_slice %4 {offsets = [0, 35], sizes = [8, 1024], strides = [1, 1]} : vector<8x1280xbf16> to vector<8x1024xbf16>
    %cst_33 = arith.constant dense<0.000000e+00> : vector<8x1024xf32>
    %49 = tpu.matmul %47, %48, %cst_33 {dimension_numbers = #tpu.dot_dimension_numbers<[1], [0], [0], [1], [0, 0, 1, 1], [], []>} : vector<8x8xbf16>, vector<8x1024xbf16>, vector<8x1024xf32> -> vector<8x1024xf32>
    %50 = arith.addf %45, %49 : vector<8x1024xf32>
    %c9 = arith.constant 9 : index
    %c0_34 = arith.constant 0 : index
    %c0_35 = arith.constant 0 : index
    %51 = vector.load %arg2[%c9, %c0_34, %c0_35] : memref<25x8x8xbf16, #tpu.memory_space<vmem>>, vector<1x8x8xbf16>
    %52 = vector.shape_cast %51 : vector<1x8x8xbf16> to vector<8x8xbf16>
    %53 = vector.extract_strided_slice %4 {offsets = [0, 36], sizes = [8, 1024], strides = [1, 1]} : vector<8x1280xbf16> to vector<8x1024xbf16>
    %cst_36 = arith.constant dense<0.000000e+00> : vector<8x1024xf32>
    %54 = tpu.matmul %52, %53, %cst_36 {dimension_numbers = #tpu.dot_dimension_numbers<[1], [0], [0], [1], [0, 0, 1, 1], [], []>} : vector<8x8xbf16>, vector<8x1024xbf16>, vector<8x1024xf32> -> vector<8x1024xf32>
    %55 = arith.addf %50, %54 : vector<8x1024xf32>
    %c10 = arith.constant 10 : index
    %c0_37 = arith.constant 0 : index
    %c0_38 = arith.constant 0 : index
    %56 = vector.load %arg2[%c10, %c0_37, %c0_38] : memref<25x8x8xbf16, #tpu.memory_space<vmem>>, vector<1x8x8xbf16>
    %57 = vector.shape_cast %56 : vector<1x8x8xbf16> to vector<8x8xbf16>
    %58 = vector.extract_strided_slice %4 {offsets = [0, 64], sizes = [8, 1024], strides = [1, 1]} : vector<8x1280xbf16> to vector<8x1024xbf16>
    %cst_39 = arith.constant dense<0.000000e+00> : vector<8x1024xf32>
    %59 = tpu.matmul %57, %58, %cst_39 {dimension_numbers = #tpu.dot_dimension_numbers<[1], [0], [0], [1], [0, 0, 1, 1], [], []>} : vector<8x8xbf16>, vector<8x1024xbf16>, vector<8x1024xf32> -> vector<8x1024xf32>
    %60 = arith.addf %55, %59 : vector<8x1024xf32>
    %c11 = arith.constant 11 : index
    %c0_40 = arith.constant 0 : index
    %c0_41 = arith.constant 0 : index
    %61 = vector.load %arg2[%c11, %c0_40, %c0_41] : memref<25x8x8xbf16, #tpu.memory_space<vmem>>, vector<1x8x8xbf16>
    %62 = vector.shape_cast %61 : vector<1x8x8xbf16> to vector<8x8xbf16>
    %63 = vector.extract_strided_slice %4 {offsets = [0, 65], sizes = [8, 1024], strides = [1, 1]} : vector<8x1280xbf16> to vector<8x1024xbf16>
    %cst_42 = arith.constant dense<0.000000e+00> : vector<8x1024xf32>
    %64 = tpu.matmul %62, %63, %cst_42 {dimension_numbers = #tpu.dot_dimension_numbers<[1], [0], [0], [1], [0, 0, 1, 1], [], []>} : vector<8x8xbf16>, vector<8x1024xbf16>, vector<8x1024xf32> -> vector<8x1024xf32>
    %65 = arith.addf %60, %64 : vector<8x1024xf32>
    %c12 = arith.constant 12 : index
    %c0_43 = arith.constant 0 : index
    %c0_44 = arith.constant 0 : index
    %66 = vector.load %arg2[%c12, %c0_43, %c0_44] : memref<25x8x8xbf16, #tpu.memory_space<vmem>>, vector<1x8x8xbf16>
    %67 = vector.shape_cast %66 : vector<1x8x8xbf16> to vector<8x8xbf16>
    %68 = vector.extract_strided_slice %4 {offsets = [0, 66], sizes = [8, 1024], strides = [1, 1]} : vector<8x1280xbf16> to vector<8x1024xbf16>
    %cst_45 = arith.constant dense<0.000000e+00> : vector<8x1024xf32>
    %69 = tpu.matmul %67, %68, %cst_45 {dimension_numbers = #tpu.dot_dimension_numbers<[1], [0], [0], [1], [0, 0, 1, 1], [], []>} : vector<8x8xbf16>, vector<8x1024xbf16>, vector<8x1024xf32> -> vector<8x1024xf32>
    %70 = arith.addf %65, %69 : vector<8x1024xf32>
    %c13 = arith.constant 13 : index
    %c0_46 = arith.constant 0 : index
    %c0_47 = arith.constant 0 : index
    %71 = vector.load %arg2[%c13, %c0_46, %c0_47] : memref<25x8x8xbf16, #tpu.memory_space<vmem>>, vector<1x8x8xbf16>
    %72 = vector.shape_cast %71 : vector<1x8x8xbf16> to vector<8x8xbf16>
    %73 = vector.extract_strided_slice %4 {offsets = [0, 67], sizes = [8, 1024], strides = [1, 1]} : vector<8x1280xbf16> to vector<8x1024xbf16>
    %cst_48 = arith.constant dense<0.000000e+00> : vector<8x1024xf32>
    %74 = tpu.matmul %72, %73, %cst_48 {dimension_numbers = #tpu.dot_dimension_numbers<[1], [0], [0], [1], [0, 0, 1, 1], [], []>} : vector<8x8xbf16>, vector<8x1024xbf16>, vector<8x1024xf32> -> vector<8x1024xf32>
    %75 = arith.addf %70, %74 : vector<8x1024xf32>
    %c14 = arith.constant 14 : index
    %c0_49 = arith.constant 0 : index
    %c0_50 = arith.constant 0 : index
    %76 = vector.load %arg2[%c14, %c0_49, %c0_50] : memref<25x8x8xbf16, #tpu.memory_space<vmem>>, vector<1x8x8xbf16>
    %77 = vector.shape_cast %76 : vector<1x8x8xbf16> to vector<8x8xbf16>
    %78 = vector.extract_strided_slice %4 {offsets = [0, 68], sizes = [8, 1024], strides = [1, 1]} : vector<8x1280xbf16> to vector<8x1024xbf16>
    %cst_51 = arith.constant dense<0.000000e+00> : vector<8x1024xf32>
    %79 = tpu.matmul %77, %78, %cst_51 {dimension_numbers = #tpu.dot_dimension_numbers<[1], [0], [0], [1], [0, 0, 1, 1], [], []>} : vector<8x8xbf16>, vector<8x1024xbf16>, vector<8x1024xf32> -> vector<8x1024xf32>
    %80 = arith.addf %75, %79 : vector<8x1024xf32>
    %c15 = arith.constant 15 : index
    %c0_52 = arith.constant 0 : index
    %c0_53 = arith.constant 0 : index
    %81 = vector.load %arg2[%c15, %c0_52, %c0_53] : memref<25x8x8xbf16, #tpu.memory_space<vmem>>, vector<1x8x8xbf16>
    %82 = vector.shape_cast %81 : vector<1x8x8xbf16> to vector<8x8xbf16>
    %83 = vector.extract_strided_slice %4 {offsets = [0, 96], sizes = [8, 1024], strides = [1, 1]} : vector<8x1280xbf16> to vector<8x1024xbf16>
    %cst_54 = arith.constant dense<0.000000e+00> : vector<8x1024xf32>
    %84 = tpu.matmul %82, %83, %cst_54 {dimension_numbers = #tpu.dot_dimension_numbers<[1], [0], [0], [1], [0, 0, 1, 1], [], []>} : vector<8x8xbf16>, vector<8x1024xbf16>, vector<8x1024xf32> -> vector<8x1024xf32>
    %85 = arith.addf %80, %84 : vector<8x1024xf32>
    %c16 = arith.constant 16 : index
    %c0_55 = arith.constant 0 : index
    %c0_56 = arith.constant 0 : index
    %86 = vector.load %arg2[%c16, %c0_55, %c0_56] : memref<25x8x8xbf16, #tpu.memory_space<vmem>>, vector<1x8x8xbf16>
    %87 = vector.shape_cast %86 : vector<1x8x8xbf16> to vector<8x8xbf16>
    %88 = vector.extract_strided_slice %4 {offsets = [0, 97], sizes = [8, 1024], strides = [1, 1]} : vector<8x1280xbf16> to vector<8x1024xbf16>
    %cst_57 = arith.constant dense<0.000000e+00> : vector<8x1024xf32>
    %89 = tpu.matmul %87, %88, %cst_57 {dimension_numbers = #tpu.dot_dimension_numbers<[1], [0], [0], [1], [0, 0, 1, 1], [], []>} : vector<8x8xbf16>, vector<8x1024xbf16>, vector<8x1024xf32> -> vector<8x1024xf32>
    %90 = arith.addf %85, %89 : vector<8x1024xf32>
    %c17 = arith.constant 17 : index
    %c0_58 = arith.constant 0 : index
    %c0_59 = arith.constant 0 : index
    %91 = vector.load %arg2[%c17, %c0_58, %c0_59] : memref<25x8x8xbf16, #tpu.memory_space<vmem>>, vector<1x8x8xbf16>
    %92 = vector.shape_cast %91 : vector<1x8x8xbf16> to vector<8x8xbf16>
    %93 = vector.extract_strided_slice %4 {offsets = [0, 98], sizes = [8, 1024], strides = [1, 1]} : vector<8x1280xbf16> to vector<8x1024xbf16>
    %cst_60 = arith.constant dense<0.000000e+00> : vector<8x1024xf32>
    %94 = tpu.matmul %92, %93, %cst_60 {dimension_numbers = #tpu.dot_dimension_numbers<[1], [0], [0], [1], [0, 0, 1, 1], [], []>} : vector<8x8xbf16>, vector<8x1024xbf16>, vector<8x1024xf32> -> vector<8x1024xf32>
    %95 = arith.addf %90, %94 : vector<8x1024xf32>
    %c18 = arith.constant 18 : index
    %c0_61 = arith.constant 0 : index
    %c0_62 = arith.constant 0 : index
    %96 = vector.load %arg2[%c18, %c0_61, %c0_62] : memref<25x8x8xbf16, #tpu.memory_space<vmem>>, vector<1x8x8xbf16>
    %97 = vector.shape_cast %96 : vector<1x8x8xbf16> to vector<8x8xbf16>
    %98 = vector.extract_strided_slice %4 {offsets = [0, 99], sizes = [8, 1024], strides = [1, 1]} : vector<8x1280xbf16> to vector<8x1024xbf16>
    %cst_63 = arith.constant dense<0.000000e+00> : vector<8x1024xf32>
    %99 = tpu.matmul %97, %98, %cst_63 {dimension_numbers = #tpu.dot_dimension_numbers<[1], [0], [0], [1], [0, 0, 1, 1], [], []>} : vector<8x8xbf16>, vector<8x1024xbf16>, vector<8x1024xf32> -> vector<8x1024xf32>
    %100 = arith.addf %95, %99 : vector<8x1024xf32>
    %c19 = arith.constant 19 : index
    %c0_64 = arith.constant 0 : index
    %c0_65 = arith.constant 0 : index
    %101 = vector.load %arg2[%c19, %c0_64, %c0_65] : memref<25x8x8xbf16, #tpu.memory_space<vmem>>, vector<1x8x8xbf16>
    %102 = vector.shape_cast %101 : vector<1x8x8xbf16> to vector<8x8xbf16>
    %103 = vector.extract_strided_slice %4 {offsets = [0, 100], sizes = [8, 1024], strides = [1, 1]} : vector<8x1280xbf16> to vector<8x1024xbf16>
    %cst_66 = arith.constant dense<0.000000e+00> : vector<8x1024xf32>
    %104 = tpu.matmul %102, %103, %cst_66 {dimension_numbers = #tpu.dot_dimension_numbers<[1], [0], [0], [1], [0, 0, 1, 1], [], []>} : vector<8x8xbf16>, vector<8x1024xbf16>, vector<8x1024xf32> -> vector<8x1024xf32>
    %105 = arith.addf %100, %104 : vector<8x1024xf32>
    %c20 = arith.constant 20 : index
    %c0_67 = arith.constant 0 : index
    %c0_68 = arith.constant 0 : index
    %106 = vector.load %arg2[%c20, %c0_67, %c0_68] : memref<25x8x8xbf16, #tpu.memory_space<vmem>>, vector<1x8x8xbf16>
    %107 = vector.shape_cast %106 : vector<1x8x8xbf16> to vector<8x8xbf16>
    %108 = vector.extract_strided_slice %4 {offsets = [0, 128], sizes = [8, 1024], strides = [1, 1]} : vector<8x1280xbf16> to vector<8x1024xbf16>
    %cst_69 = arith.constant dense<0.000000e+00> : vector<8x1024xf32>
    %109 = tpu.matmul %107, %108, %cst_69 {dimension_numbers = #tpu.dot_dimension_numbers<[1], [0], [0], [1], [0, 0, 1, 1], [], []>} : vector<8x8xbf16>, vector<8x1024xbf16>, vector<8x1024xf32> -> vector<8x1024xf32>
    %110 = arith.addf %105, %109 : vector<8x1024xf32>
    %c21 = arith.constant 21 : index
    %c0_70 = arith.constant 0 : index
    %c0_71 = arith.constant 0 : index
    %111 = vector.load %arg2[%c21, %c0_70, %c0_71] : memref<25x8x8xbf16, #tpu.memory_space<vmem>>, vector<1x8x8xbf16>
    %112 = vector.shape_cast %111 : vector<1x8x8xbf16> to vector<8x8xbf16>
    %113 = vector.extract_strided_slice %4 {offsets = [0, 129], sizes = [8, 1024], strides = [1, 1]} : vector<8x1280xbf16> to vector<8x1024xbf16>
    %cst_72 = arith.constant dense<0.000000e+00> : vector<8x1024xf32>
    %114 = tpu.matmul %112, %113, %cst_72 {dimension_numbers = #tpu.dot_dimension_numbers<[1], [0], [0], [1], [0, 0, 1, 1], [], []>} : vector<8x8xbf16>, vector<8x1024xbf16>, vector<8x1024xf32> -> vector<8x1024xf32>
    %115 = arith.addf %110, %114 : vector<8x1024xf32>
    %c22 = arith.constant 22 : index
    %c0_73 = arith.constant 0 : index
    %c0_74 = arith.constant 0 : index
    %116 = vector.load %arg2[%c22, %c0_73, %c0_74] : memref<25x8x8xbf16, #tpu.memory_space<vmem>>, vector<1x8x8xbf16>
    %117 = vector.shape_cast %116 : vector<1x8x8xbf16> to vector<8x8xbf16>
    %118 = vector.extract_strided_slice %4 {offsets = [0, 130], sizes = [8, 1024], strides = [1, 1]} : vector<8x1280xbf16> to vector<8x1024xbf16>
    %cst_75 = arith.constant dense<0.000000e+00> : vector<8x1024xf32>
    %119 = tpu.matmul %117, %118, %cst_75 {dimension_numbers = #tpu.dot_dimension_numbers<[1], [0], [0], [1], [0, 0, 1, 1], [], []>} : vector<8x8xbf16>, vector<8x1024xbf16>, vector<8x1024xf32> -> vector<8x1024xf32>
    %120 = arith.addf %115, %119 : vector<8x1024xf32>
    %c23 = arith.constant 23 : index
    %c0_76 = arith.constant 0 : index
    %c0_77 = arith.constant 0 : index
    %121 = vector.load %arg2[%c23, %c0_76, %c0_77] : memref<25x8x8xbf16, #tpu.memory_space<vmem>>, vector<1x8x8xbf16>
    %122 = vector.shape_cast %121 : vector<1x8x8xbf16> to vector<8x8xbf16>
    %123 = vector.extract_strided_slice %4 {offsets = [0, 131], sizes = [8, 1024], strides = [1, 1]} : vector<8x1280xbf16> to vector<8x1024xbf16>
    %cst_78 = arith.constant dense<0.000000e+00> : vector<8x1024xf32>
    %124 = tpu.matmul %122, %123, %cst_78 {dimension_numbers = #tpu.dot_dimension_numbers<[1], [0], [0], [1], [0, 0, 1, 1], [], []>} : vector<8x8xbf16>, vector<8x1024xbf16>, vector<8x1024xf32> -> vector<8x1024xf32>
    %125 = arith.addf %120, %124 : vector<8x1024xf32>
    %c24 = arith.constant 24 : index
    %c0_79 = arith.constant 0 : index
    %c0_80 = arith.constant 0 : index
    %126 = vector.load %arg2[%c24, %c0_79, %c0_80] : memref<25x8x8xbf16, #tpu.memory_space<vmem>>, vector<1x8x8xbf16>
    %127 = vector.shape_cast %126 : vector<1x8x8xbf16> to vector<8x8xbf16>
    %128 = vector.extract_strided_slice %4 {offsets = [0, 132], sizes = [8, 1024], strides = [1, 1]} : vector<8x1280xbf16> to vector<8x1024xbf16>
    %cst_81 = arith.constant dense<0.000000e+00> : vector<8x1024xf32>
    %129 = tpu.matmul %127, %128, %cst_81 {dimension_numbers = #tpu.dot_dimension_numbers<[1], [0], [0], [1], [0, 0, 1, 1], [], []>} : vector<8x8xbf16>, vector<8x1024xbf16>, vector<8x1024xf32> -> vector<8x1024xf32>
    %130 = arith.addf %125, %129 : vector<8x1024xf32>
    %131 = vector.broadcast %0 : vector<8x1xf32> to vector<8x1024xf32>
    %132 = arith.addf %130, %131 : vector<8x1024xf32>
    %cst_82 = arith.constant 0.000000e+00 : f32
    %133 = vector.broadcast %cst_82 : f32 to vector<8x1024xf32>
    %134 = arith.maximumf %132, %133 : vector<8x1024xf32>
    %cst_83 = arith.constant 0.000000e+00 : f32
    %135 = vector.broadcast %cst_83 : f32 to vector<8x64xf32>
    %136 = tpu.concatenate %134, %135 in 1 : vector<8x1024xf32>, vector<8x64xf32> -> vector<8x1088xf32>
    %137 = vector.extract_strided_slice %136 {offsets = [0, 0], sizes = [8, 1024], strides = [1, 1]} : vector<8x1088xf32> to vector<8x1024xf32>
    %138 = vector.extract_strided_slice %136 {offsets = [0, 1], sizes = [8, 1024], strides = [1, 1]} : vector<8x1088xf32> to vector<8x1024xf32>
    %139 = arith.maximumf %137, %138 : vector<8x1024xf32>
    %140 = vector.extract_strided_slice %136 {offsets = [0, 32], sizes = [8, 1024], strides = [1, 1]} : vector<8x1088xf32> to vector<8x1024xf32>
    %141 = vector.extract_strided_slice %136 {offsets = [0, 33], sizes = [8, 1024], strides = [1, 1]} : vector<8x1088xf32> to vector<8x1024xf32>
    %142 = arith.maximumf %140, %141 : vector<8x1024xf32>
    %143 = arith.maximumf %139, %142 : vector<8x1024xf32>
    %144 = arith.truncf %143 : vector<8x1024xf32> to vector<8x1024xbf16>
    %c0_84 = arith.constant 0 : index
    %c0_85 = arith.constant 0 : index
    %145 = vector.load %arg6[%c0_84, %c0_85] : memref<1024x224xbf16, #tpu.memory_space<vmem>>, vector<1024x224xbf16>
    %cst_86 = arith.constant dense<0.000000e+00> : vector<8x224xf32>
    %146 = tpu.matmul %144, %145, %cst_86 {dimension_numbers = #tpu.dot_dimension_numbers<[1], [0], [0], [1], [0, 0, 1, 1], [], []>} : vector<8x1024xbf16>, vector<1024x224xbf16>, vector<8x224xf32> -> vector<8x224xf32>
    %cst_87 = arith.constant 0.000000e+00 : f32
    %147 = vector.broadcast %cst_87 : f32 to vector<8x96xf32>
    %148 = tpu.concatenate %146, %147 in 1 : vector<8x224xf32>, vector<8x96xf32> -> vector<8x320xf32>
    %149 = arith.truncf %148 : vector<8x320xf32> to vector<8x320xbf16>
    %cst_88 = arith.constant 0.000000e+00 : f32
    %150 = vector.broadcast %cst_88 : f32 to vector<16x224xf32>
    %c0_89 = arith.constant 0 : index
    %c0_90 = arith.constant 0 : index
    %c0_91 = arith.constant 0 : index
    %151 = vector.load %arg4[%c0_89, %c0_90, %c0_91] : memref<25x16x8xbf16, #tpu.memory_space<vmem>>, vector<1x16x8xbf16>
    %152 = vector.shape_cast %151 : vector<1x16x8xbf16> to vector<16x8xbf16>
    %153 = vector.extract_strided_slice %149 {offsets = [0, 0], sizes = [8, 224], strides = [1, 1]} : vector<8x320xbf16> to vector<8x224xbf16>
    %cst_92 = arith.constant dense<0.000000e+00> : vector<16x224xf32>
    %154 = tpu.matmul %152, %153, %cst_92 {dimension_numbers = #tpu.dot_dimension_numbers<[1], [0], [0], [1], [0, 0, 1, 1], [], []>} : vector<16x8xbf16>, vector<8x224xbf16>, vector<16x224xf32> -> vector<16x224xf32>
    %155 = arith.addf %150, %154 : vector<16x224xf32>
    %c1_93 = arith.constant 1 : index
    %c0_94 = arith.constant 0 : index
    %c0_95 = arith.constant 0 : index
    %156 = vector.load %arg4[%c1_93, %c0_94, %c0_95] : memref<25x16x8xbf16, #tpu.memory_space<vmem>>, vector<1x16x8xbf16>
    %157 = vector.shape_cast %156 : vector<1x16x8xbf16> to vector<16x8xbf16>
    %158 = vector.extract_strided_slice %149 {offsets = [0, 1], sizes = [8, 224], strides = [1, 1]} : vector<8x320xbf16> to vector<8x224xbf16>
    %cst_96 = arith.constant dense<0.000000e+00> : vector<16x224xf32>
    %159 = tpu.matmul %157, %158, %cst_96 {dimension_numbers = #tpu.dot_dimension_numbers<[1], [0], [0], [1], [0, 0, 1, 1], [], []>} : vector<16x8xbf16>, vector<8x224xbf16>, vector<16x224xf32> -> vector<16x224xf32>
    %160 = arith.addf %155, %159 : vector<16x224xf32>
    %c2_97 = arith.constant 2 : index
    %c0_98 = arith.constant 0 : index
    %c0_99 = arith.constant 0 : index
    %161 = vector.load %arg4[%c2_97, %c0_98, %c0_99] : memref<25x16x8xbf16, #tpu.memory_space<vmem>>, vector<1x16x8xbf16>
    %162 = vector.shape_cast %161 : vector<1x16x8xbf16> to vector<16x8xbf16>
    %163 = vector.extract_strided_slice %149 {offsets = [0, 2], sizes = [8, 224], strides = [1, 1]} : vector<8x320xbf16> to vector<8x224xbf16>
    %cst_100 = arith.constant dense<0.000000e+00> : vector<16x224xf32>
    %164 = tpu.matmul %162, %163, %cst_100 {dimension_numbers = #tpu.dot_dimension_numbers<[1], [0], [0], [1], [0, 0, 1, 1], [], []>} : vector<16x8xbf16>, vector<8x224xbf16>, vector<16x224xf32> -> vector<16x224xf32>
    %165 = arith.addf %160, %164 : vector<16x224xf32>
    %c3_101 = arith.constant 3 : index
    %c0_102 = arith.constant 0 : index
    %c0_103 = arith.constant 0 : index
    %166 = vector.load %arg4[%c3_101, %c0_102, %c0_103] : memref<25x16x8xbf16, #tpu.memory_space<vmem>>, vector<1x16x8xbf16>
    %167 = vector.shape_cast %166 : vector<1x16x8xbf16> to vector<16x8xbf16>
    %168 = vector.extract_strided_slice %149 {offsets = [0, 3], sizes = [8, 224], strides = [1, 1]} : vector<8x320xbf16> to vector<8x224xbf16>
    %cst_104 = arith.constant dense<0.000000e+00> : vector<16x224xf32>
    %169 = tpu.matmul %167, %168, %cst_104 {dimension_numbers = #tpu.dot_dimension_numbers<[1], [0], [0], [1], [0, 0, 1, 1], [], []>} : vector<16x8xbf16>, vector<8x224xbf16>, vector<16x224xf32> -> vector<16x224xf32>
    %170 = arith.addf %165, %169 : vector<16x224xf32>
    %c4_105 = arith.constant 4 : index
    %c0_106 = arith.constant 0 : index
    %c0_107 = arith.constant 0 : index
    %171 = vector.load %arg4[%c4_105, %c0_106, %c0_107] : memref<25x16x8xbf16, #tpu.memory_space<vmem>>, vector<1x16x8xbf16>
    %172 = vector.shape_cast %171 : vector<1x16x8xbf16> to vector<16x8xbf16>
    %173 = vector.extract_strided_slice %149 {offsets = [0, 4], sizes = [8, 224], strides = [1, 1]} : vector<8x320xbf16> to vector<8x224xbf16>
    %cst_108 = arith.constant dense<0.000000e+00> : vector<16x224xf32>
    %174 = tpu.matmul %172, %173, %cst_108 {dimension_numbers = #tpu.dot_dimension_numbers<[1], [0], [0], [1], [0, 0, 1, 1], [], []>} : vector<16x8xbf16>, vector<8x224xbf16>, vector<16x224xf32> -> vector<16x224xf32>
    %175 = arith.addf %170, %174 : vector<16x224xf32>
    %c5_109 = arith.constant 5 : index
    %c0_110 = arith.constant 0 : index
    %c0_111 = arith.constant 0 : index
    %176 = vector.load %arg4[%c5_109, %c0_110, %c0_111] : memref<25x16x8xbf16, #tpu.memory_space<vmem>>, vector<1x16x8xbf16>
    %177 = vector.shape_cast %176 : vector<1x16x8xbf16> to vector<16x8xbf16>
    %178 = vector.extract_strided_slice %149 {offsets = [0, 16], sizes = [8, 224], strides = [1, 1]} : vector<8x320xbf16> to vector<8x224xbf16>
    %cst_112 = arith.constant dense<0.000000e+00> : vector<16x224xf32>
    %179 = tpu.matmul %177, %178, %cst_112 {dimension_numbers = #tpu.dot_dimension_numbers<[1], [0], [0], [1], [0, 0, 1, 1], [], []>} : vector<16x8xbf16>, vector<8x224xbf16>, vector<16x224xf32> -> vector<16x224xf32>
    %180 = arith.addf %175, %179 : vector<16x224xf32>
    %c6_113 = arith.constant 6 : index
    %c0_114 = arith.constant 0 : index
    %c0_115 = arith.constant 0 : index
    %181 = vector.load %arg4[%c6_113, %c0_114, %c0_115] : memref<25x16x8xbf16, #tpu.memory_space<vmem>>, vector<1x16x8xbf16>
    %182 = vector.shape_cast %181 : vector<1x16x8xbf16> to vector<16x8xbf16>
    %183 = vector.extract_strided_slice %149 {offsets = [0, 17], sizes = [8, 224], strides = [1, 1]} : vector<8x320xbf16> to vector<8x224xbf16>
    %cst_116 = arith.constant dense<0.000000e+00> : vector<16x224xf32>
    %184 = tpu.matmul %182, %183, %cst_116 {dimension_numbers = #tpu.dot_dimension_numbers<[1], [0], [0], [1], [0, 0, 1, 1], [], []>} : vector<16x8xbf16>, vector<8x224xbf16>, vector<16x224xf32> -> vector<16x224xf32>
    %185 = arith.addf %180, %184 : vector<16x224xf32>
    %c7_117 = arith.constant 7 : index
    %c0_118 = arith.constant 0 : index
    %c0_119 = arith.constant 0 : index
    %186 = vector.load %arg4[%c7_117, %c0_118, %c0_119] : memref<25x16x8xbf16, #tpu.memory_space<vmem>>, vector<1x16x8xbf16>
    %187 = vector.shape_cast %186 : vector<1x16x8xbf16> to vector<16x8xbf16>
    %188 = vector.extract_strided_slice %149 {offsets = [0, 18], sizes = [8, 224], strides = [1, 1]} : vector<8x320xbf16> to vector<8x224xbf16>
    %cst_120 = arith.constant dense<0.000000e+00> : vector<16x224xf32>
    %189 = tpu.matmul %187, %188, %cst_120 {dimension_numbers = #tpu.dot_dimension_numbers<[1], [0], [0], [1], [0, 0, 1, 1], [], []>} : vector<16x8xbf16>, vector<8x224xbf16>, vector<16x224xf32> -> vector<16x224xf32>
    %190 = arith.addf %185, %189 : vector<16x224xf32>
    %c8_121 = arith.constant 8 : index
    %c0_122 = arith.constant 0 : index
    %c0_123 = arith.constant 0 : index
    %191 = vector.load %arg4[%c8_121, %c0_122, %c0_123] : memref<25x16x8xbf16, #tpu.memory_space<vmem>>, vector<1x16x8xbf16>
    %192 = vector.shape_cast %191 : vector<1x16x8xbf16> to vector<16x8xbf16>
    %193 = vector.extract_strided_slice %149 {offsets = [0, 19], sizes = [8, 224], strides = [1, 1]} : vector<8x320xbf16> to vector<8x224xbf16>
    %cst_124 = arith.constant dense<0.000000e+00> : vector<16x224xf32>
    %194 = tpu.matmul %192, %193, %cst_124 {dimension_numbers = #tpu.dot_dimension_numbers<[1], [0], [0], [1], [0, 0, 1, 1], [], []>} : vector<16x8xbf16>, vector<8x224xbf16>, vector<16x224xf32> -> vector<16x224xf32>
    %195 = arith.addf %190, %194 : vector<16x224xf32>
    %c9_125 = arith.constant 9 : index
    %c0_126 = arith.constant 0 : index
    %c0_127 = arith.constant 0 : index
    %196 = vector.load %arg4[%c9_125, %c0_126, %c0_127] : memref<25x16x8xbf16, #tpu.memory_space<vmem>>, vector<1x16x8xbf16>
    %197 = vector.shape_cast %196 : vector<1x16x8xbf16> to vector<16x8xbf16>
    %198 = vector.extract_strided_slice %149 {offsets = [0, 20], sizes = [8, 224], strides = [1, 1]} : vector<8x320xbf16> to vector<8x224xbf16>
    %cst_128 = arith.constant dense<0.000000e+00> : vector<16x224xf32>
    %199 = tpu.matmul %197, %198, %cst_128 {dimension_numbers = #tpu.dot_dimension_numbers<[1], [0], [0], [1], [0, 0, 1, 1], [], []>} : vector<16x8xbf16>, vector<8x224xbf16>, vector<16x224xf32> -> vector<16x224xf32>
    %200 = arith.addf %195, %199 : vector<16x224xf32>
    %c10_129 = arith.constant 10 : index
    %c0_130 = arith.constant 0 : index
    %c0_131 = arith.constant 0 : index
    %201 = vector.load %arg4[%c10_129, %c0_130, %c0_131] : memref<25x16x8xbf16, #tpu.memory_space<vmem>>, vector<1x16x8xbf16>
    %202 = vector.shape_cast %201 : vector<1x16x8xbf16> to vector<16x8xbf16>
    %203 = vector.extract_strided_slice %149 {offsets = [0, 32], sizes = [8, 224], strides = [1, 1]} : vector<8x320xbf16> to vector<8x224xbf16>
    %cst_132 = arith.constant dense<0.000000e+00> : vector<16x224xf32>
    %204 = tpu.matmul %202, %203, %cst_132 {dimension_numbers = #tpu.dot_dimension_numbers<[1], [0], [0], [1], [0, 0, 1, 1], [], []>} : vector<16x8xbf16>, vector<8x224xbf16>, vector<16x224xf32> -> vector<16x224xf32>
    %205 = arith.addf %200, %204 : vector<16x224xf32>
    %c11_133 = arith.constant 11 : index
    %c0_134 = arith.constant 0 : index
    %c0_135 = arith.constant 0 : index
    %206 = vector.load %arg4[%c11_133, %c0_134, %c0_135] : memref<25x16x8xbf16, #tpu.memory_space<vmem>>, vector<1x16x8xbf16>
    %207 = vector.shape_cast %206 : vector<1x16x8xbf16> to vector<16x8xbf16>
    %208 = vector.extract_strided_slice %149 {offsets = [0, 33], sizes = [8, 224], strides = [1, 1]} : vector<8x320xbf16> to vector<8x224xbf16>
    %cst_136 = arith.constant dense<0.000000e+00> : vector<16x224xf32>
    %209 = tpu.matmul %207, %208, %cst_136 {dimension_numbers = #tpu.dot_dimension_numbers<[1], [0], [0], [1], [0, 0, 1, 1], [], []>} : vector<16x8xbf16>, vector<8x224xbf16>, vector<16x224xf32> -> vector<16x224xf32>
    %210 = arith.addf %205, %209 : vector<16x224xf32>
    %c12_137 = arith.constant 12 : index
    %c0_138 = arith.constant 0 : index
    %c0_139 = arith.constant 0 : index
    %211 = vector.load %arg4[%c12_137, %c0_138, %c0_139] : memref<25x16x8xbf16, #tpu.memory_space<vmem>>, vector<1x16x8xbf16>
    %212 = vector.shape_cast %211 : vector<1x16x8xbf16> to vector<16x8xbf16>
    %213 = vector.extract_strided_slice %149 {offsets = [0, 34], sizes = [8, 224], strides = [1, 1]} : vector<8x320xbf16> to vector<8x224xbf16>
    %cst_140 = arith.constant dense<0.000000e+00> : vector<16x224xf32>
    %214 = tpu.matmul %212, %213, %cst_140 {dimension_numbers = #tpu.dot_dimension_numbers<[1], [0], [0], [1], [0, 0, 1, 1], [], []>} : vector<16x8xbf16>, vector<8x224xbf16>, vector<16x224xf32> -> vector<16x224xf32>
    %215 = arith.addf %210, %214 : vector<16x224xf32>
    %c13_141 = arith.constant 13 : index
    %c0_142 = arith.constant 0 : index
    %c0_143 = arith.constant 0 : index
    %216 = vector.load %arg4[%c13_141, %c0_142, %c0_143] : memref<25x16x8xbf16, #tpu.memory_space<vmem>>, vector<1x16x8xbf16>
    %217 = vector.shape_cast %216 : vector<1x16x8xbf16> to vector<16x8xbf16>
    %218 = vector.extract_strided_slice %149 {offsets = [0, 35], sizes = [8, 224], strides = [1, 1]} : vector<8x320xbf16> to vector<8x224xbf16>
    %cst_144 = arith.constant dense<0.000000e+00> : vector<16x224xf32>
    %219 = tpu.matmul %217, %218, %cst_144 {dimension_numbers = #tpu.dot_dimension_numbers<[1], [0], [0], [1], [0, 0, 1, 1], [], []>} : vector<16x8xbf16>, vector<8x224xbf16>, vector<16x224xf32> -> vector<16x224xf32>
    %220 = arith.addf %215, %219 : vector<16x224xf32>
    %c14_145 = arith.constant 14 : index
    %c0_146 = arith.constant 0 : index
    %c0_147 = arith.constant 0 : index
    %221 = vector.load %arg4[%c14_145, %c0_146, %c0_147] : memref<25x16x8xbf16, #tpu.memory_space<vmem>>, vector<1x16x8xbf16>
    %222 = vector.shape_cast %221 : vector<1x16x8xbf16> to vector<16x8xbf16>
    %223 = vector.extract_strided_slice %149 {offsets = [0, 36], sizes = [8, 224], strides = [1, 1]} : vector<8x320xbf16> to vector<8x224xbf16>
    %cst_148 = arith.constant dense<0.000000e+00> : vector<16x224xf32>
    %224 = tpu.matmul %222, %223, %cst_148 {dimension_numbers = #tpu.dot_dimension_numbers<[1], [0], [0], [1], [0, 0, 1, 1], [], []>} : vector<16x8xbf16>, vector<8x224xbf16>, vector<16x224xf32> -> vector<16x224xf32>
    %225 = arith.addf %220, %224 : vector<16x224xf32>
    %c15_149 = arith.constant 15 : index
    %c0_150 = arith.constant 0 : index
    %c0_151 = arith.constant 0 : index
    %226 = vector.load %arg4[%c15_149, %c0_150, %c0_151] : memref<25x16x8xbf16, #tpu.memory_space<vmem>>, vector<1x16x8xbf16>
    %227 = vector.shape_cast %226 : vector<1x16x8xbf16> to vector<16x8xbf16>
    %228 = vector.extract_strided_slice %149 {offsets = [0, 48], sizes = [8, 224], strides = [1, 1]} : vector<8x320xbf16> to vector<8x224xbf16>
    %cst_152 = arith.constant dense<0.000000e+00> : vector<16x224xf32>
    %229 = tpu.matmul %227, %228, %cst_152 {dimension_numbers = #tpu.dot_dimension_numbers<[1], [0], [0], [1], [0, 0, 1, 1], [], []>} : vector<16x8xbf16>, vector<8x224xbf16>, vector<16x224xf32> -> vector<16x224xf32>
    %230 = arith.addf %225, %229 : vector<16x224xf32>
    %c16_153 = arith.constant 16 : index
    %c0_154 = arith.constant 0 : index
    %c0_155 = arith.constant 0 : index
    %231 = vector.load %arg4[%c16_153, %c0_154, %c0_155] : memref<25x16x8xbf16, #tpu.memory_space<vmem>>, vector<1x16x8xbf16>
    %232 = vector.shape_cast %231 : vector<1x16x8xbf16> to vector<16x8xbf16>
    %233 = vector.extract_strided_slice %149 {offsets = [0, 49], sizes = [8, 224], strides = [1, 1]} : vector<8x320xbf16> to vector<8x224xbf16>
    %cst_156 = arith.constant dense<0.000000e+00> : vector<16x224xf32>
    %234 = tpu.matmul %232, %233, %cst_156 {dimension_numbers = #tpu.dot_dimension_numbers<[1], [0], [0], [1], [0, 0, 1, 1], [], []>} : vector<16x8xbf16>, vector<8x224xbf16>, vector<16x224xf32> -> vector<16x224xf32>
    %235 = arith.addf %230, %234 : vector<16x224xf32>
    %c17_157 = arith.constant 17 : index
    %c0_158 = arith.constant 0 : index
    %c0_159 = arith.constant 0 : index
    %236 = vector.load %arg4[%c17_157, %c0_158, %c0_159] : memref<25x16x8xbf16, #tpu.memory_space<vmem>>, vector<1x16x8xbf16>
    %237 = vector.shape_cast %236 : vector<1x16x8xbf16> to vector<16x8xbf16>
    %238 = vector.extract_strided_slice %149 {offsets = [0, 50], sizes = [8, 224], strides = [1, 1]} : vector<8x320xbf16> to vector<8x224xbf16>
    %cst_160 = arith.constant dense<0.000000e+00> : vector<16x224xf32>
    %239 = tpu.matmul %237, %238, %cst_160 {dimension_numbers = #tpu.dot_dimension_numbers<[1], [0], [0], [1], [0, 0, 1, 1], [], []>} : vector<16x8xbf16>, vector<8x224xbf16>, vector<16x224xf32> -> vector<16x224xf32>
    %240 = arith.addf %235, %239 : vector<16x224xf32>
    %c18_161 = arith.constant 18 : index
    %c0_162 = arith.constant 0 : index
    %c0_163 = arith.constant 0 : index
    %241 = vector.load %arg4[%c18_161, %c0_162, %c0_163] : memref<25x16x8xbf16, #tpu.memory_space<vmem>>, vector<1x16x8xbf16>
    %242 = vector.shape_cast %241 : vector<1x16x8xbf16> to vector<16x8xbf16>
    %243 = vector.extract_strided_slice %149 {offsets = [0, 51], sizes = [8, 224], strides = [1, 1]} : vector<8x320xbf16> to vector<8x224xbf16>
    %cst_164 = arith.constant dense<0.000000e+00> : vector<16x224xf32>
    %244 = tpu.matmul %242, %243, %cst_164 {dimension_numbers = #tpu.dot_dimension_numbers<[1], [0], [0], [1], [0, 0, 1, 1], [], []>} : vector<16x8xbf16>, vector<8x224xbf16>, vector<16x224xf32> -> vector<16x224xf32>
    %245 = arith.addf %240, %244 : vector<16x224xf32>
    %c19_165 = arith.constant 19 : index
    %c0_166 = arith.constant 0 : index
    %c0_167 = arith.constant 0 : index
    %246 = vector.load %arg4[%c19_165, %c0_166, %c0_167] : memref<25x16x8xbf16, #tpu.memory_space<vmem>>, vector<1x16x8xbf16>
    %247 = vector.shape_cast %246 : vector<1x16x8xbf16> to vector<16x8xbf16>
    %248 = vector.extract_strided_slice %149 {offsets = [0, 52], sizes = [8, 224], strides = [1, 1]} : vector<8x320xbf16> to vector<8x224xbf16>
    %cst_168 = arith.constant dense<0.000000e+00> : vector<16x224xf32>
    %249 = tpu.matmul %247, %248, %cst_168 {dimension_numbers = #tpu.dot_dimension_numbers<[1], [0], [0], [1], [0, 0, 1, 1], [], []>} : vector<16x8xbf16>, vector<8x224xbf16>, vector<16x224xf32> -> vector<16x224xf32>
    %250 = arith.addf %245, %249 : vector<16x224xf32>
    %c20_169 = arith.constant 20 : index
    %c0_170 = arith.constant 0 : index
    %c0_171 = arith.constant 0 : index
    %251 = vector.load %arg4[%c20_169, %c0_170, %c0_171] : memref<25x16x8xbf16, #tpu.memory_space<vmem>>, vector<1x16x8xbf16>
    %252 = vector.shape_cast %251 : vector<1x16x8xbf16> to vector<16x8xbf16>
    %253 = vector.extract_strided_slice %149 {offsets = [0, 64], sizes = [8, 224], strides = [1, 1]} : vector<8x320xbf16> to vector<8x224xbf16>
    %cst_172 = arith.constant dense<0.000000e+00> : vector<16x224xf32>
    %254 = tpu.matmul %252, %253, %cst_172 {dimension_numbers = #tpu.dot_dimension_numbers<[1], [0], [0], [1], [0, 0, 1, 1], [], []>} : vector<16x8xbf16>, vector<8x224xbf16>, vector<16x224xf32> -> vector<16x224xf32>
    %255 = arith.addf %250, %254 : vector<16x224xf32>
    %c21_173 = arith.constant 21 : index
    %c0_174 = arith.constant 0 : index
    %c0_175 = arith.constant 0 : index
    %256 = vector.load %arg4[%c21_173, %c0_174, %c0_175] : memref<25x16x8xbf16, #tpu.memory_space<vmem>>, vector<1x16x8xbf16>
    %257 = vector.shape_cast %256 : vector<1x16x8xbf16> to vector<16x8xbf16>
    %258 = vector.extract_strided_slice %149 {offsets = [0, 65], sizes = [8, 224], strides = [1, 1]} : vector<8x320xbf16> to vector<8x224xbf16>
    %cst_176 = arith.constant dense<0.000000e+00> : vector<16x224xf32>
    %259 = tpu.matmul %257, %258, %cst_176 {dimension_numbers = #tpu.dot_dimension_numbers<[1], [0], [0], [1], [0, 0, 1, 1], [], []>} : vector<16x8xbf16>, vector<8x224xbf16>, vector<16x224xf32> -> vector<16x224xf32>
    %260 = arith.addf %255, %259 : vector<16x224xf32>
    %c22_177 = arith.constant 22 : index
    %c0_178 = arith.constant 0 : index
    %c0_179 = arith.constant 0 : index
    %261 = vector.load %arg4[%c22_177, %c0_178, %c0_179] : memref<25x16x8xbf16, #tpu.memory_space<vmem>>, vector<1x16x8xbf16>
    %262 = vector.shape_cast %261 : vector<1x16x8xbf16> to vector<16x8xbf16>
    %263 = vector.extract_strided_slice %149 {offsets = [0, 66], sizes = [8, 224], strides = [1, 1]} : vector<8x320xbf16> to vector<8x224xbf16>
    %cst_180 = arith.constant dense<0.000000e+00> : vector<16x224xf32>
    %264 = tpu.matmul %262, %263, %cst_180 {dimension_numbers = #tpu.dot_dimension_numbers<[1], [0], [0], [1], [0, 0, 1, 1], [], []>} : vector<16x8xbf16>, vector<8x224xbf16>, vector<16x224xf32> -> vector<16x224xf32>
    %265 = arith.addf %260, %264 : vector<16x224xf32>
    %c23_181 = arith.constant 23 : index
    %c0_182 = arith.constant 0 : index
    %c0_183 = arith.constant 0 : index
    %266 = vector.load %arg4[%c23_181, %c0_182, %c0_183] : memref<25x16x8xbf16, #tpu.memory_space<vmem>>, vector<1x16x8xbf16>
    %267 = vector.shape_cast %266 : vector<1x16x8xbf16> to vector<16x8xbf16>
    %268 = vector.extract_strided_slice %149 {offsets = [0, 67], sizes = [8, 224], strides = [1, 1]} : vector<8x320xbf16> to vector<8x224xbf16>
    %cst_184 = arith.constant dense<0.000000e+00> : vector<16x224xf32>
    %269 = tpu.matmul %267, %268, %cst_184 {dimension_numbers = #tpu.dot_dimension_numbers<[1], [0], [0], [1], [0, 0, 1, 1], [], []>} : vector<16x8xbf16>, vector<8x224xbf16>, vector<16x224xf32> -> vector<16x224xf32>
    %270 = arith.addf %265, %269 : vector<16x224xf32>
    %c24_185 = arith.constant 24 : index
    %c0_186 = arith.constant 0 : index
    %c0_187 = arith.constant 0 : index
    %271 = vector.load %arg4[%c24_185, %c0_186, %c0_187] : memref<25x16x8xbf16, #tpu.memory_space<vmem>>, vector<1x16x8xbf16>
    %272 = vector.shape_cast %271 : vector<1x16x8xbf16> to vector<16x8xbf16>
    %273 = vector.extract_strided_slice %149 {offsets = [0, 68], sizes = [8, 224], strides = [1, 1]} : vector<8x320xbf16> to vector<8x224xbf16>
    %cst_188 = arith.constant dense<0.000000e+00> : vector<16x224xf32>
    %274 = tpu.matmul %272, %273, %cst_188 {dimension_numbers = #tpu.dot_dimension_numbers<[1], [0], [0], [1], [0, 0, 1, 1], [], []>} : vector<16x8xbf16>, vector<8x224xbf16>, vector<16x224xf32> -> vector<16x224xf32>
    %275 = arith.addf %270, %274 : vector<16x224xf32>
    %276 = vector.broadcast %1 : vector<16x1xf32> to vector<16x224xf32>
    %277 = arith.addf %275, %276 : vector<16x224xf32>
    %cst_189 = arith.constant 0.000000e+00 : f32
    %278 = vector.broadcast %cst_189 : f32 to vector<16x224xf32>
    %279 = arith.maximumf %277, %278 : vector<16x224xf32>
    %cst_190 = arith.constant 0.000000e+00 : f32
    %280 = vector.broadcast %cst_190 : f32 to vector<16x32xf32>
    %281 = tpu.concatenate %279, %280 in 1 : vector<16x224xf32>, vector<16x32xf32> -> vector<16x256xf32>
    %282 = vector.extract_strided_slice %281 {offsets = [0, 0], sizes = [16, 224], strides = [1, 1]} : vector<16x256xf32> to vector<16x224xf32>
    %283 = vector.extract_strided_slice %281 {offsets = [0, 1], sizes = [16, 224], strides = [1, 1]} : vector<16x256xf32> to vector<16x224xf32>
    %284 = arith.maximumf %282, %283 : vector<16x224xf32>
    %285 = vector.extract_strided_slice %281 {offsets = [0, 16], sizes = [16, 224], strides = [1, 1]} : vector<16x256xf32> to vector<16x224xf32>
    %286 = vector.extract_strided_slice %281 {offsets = [0, 17], sizes = [16, 224], strides = [1, 1]} : vector<16x256xf32> to vector<16x224xf32>
    %287 = arith.maximumf %285, %286 : vector<16x224xf32>
    %288 = arith.maximumf %284, %287 : vector<16x224xf32>
    %289 = arith.truncf %288 : vector<16x224xf32> to vector<16x224xbf16>
    %c0_191 = arith.constant 0 : index
    %c0_192 = arith.constant 0 : index
    %290 = vector.load %arg7[%c0_191, %c0_192] : memref<224x32xbf16, #tpu.memory_space<vmem>>, vector<224x32xbf16>
    %cst_193 = arith.constant dense<0.000000e+00> : vector<16x32xf32>
    %291 = tpu.matmul %289, %290, %cst_193 {dimension_numbers = #tpu.dot_dimension_numbers<[1], [0], [0], [1], [0, 0, 1, 1], [], []>} : vector<16x224xbf16>, vector<224x32xbf16>, vector<16x32xf32> -> vector<16x32xf32>
    %292 = arith.truncf %291 : vector<16x32xf32> to vector<16x32xbf16>
    %c0_194 = arith.constant 0 : index
    %c0_195 = arith.constant 0 : index
    %c0_196 = arith.constant 0 : index
    %293 = vector.load %arg8[%c0_194, %c0_195, %c0_196] : memref<1x16x32xbf16, #tpu.memory_space<vmem>>, vector<1x16x32xbf16>
    %294 = vector.shape_cast %293 : vector<1x16x32xbf16> to vector<16x32xbf16>
    %295 = vector.shape_cast %292 : vector<16x32xbf16> to vector<1x16x32xbf16>
    tpu.vector_store %arg8[%c0_194, %c0_195, %c0_196], %295 {strides = array<i32>} : memref<1x16x32xbf16, #tpu.memory_space<vmem>>, vector<1x16x32xbf16>,
    return
  }
  func.func @transform_0(%arg0: i32) -> (i32, i32, i32) {
    %c0_i32 = arith.constant 0 : i32
    %c0_i32_0 = arith.constant 0 : i32
    %c0_i32_1 = arith.constant 0 : i32
    return %arg0, %c0_i32, %c0_i32_0 : i32, i32, i32
  }
  func.func @transform_1(%arg0: i32) -> (i32, i32, i32) {
    %c0_i32 = arith.constant 0 : i32
    %c0_i32_0 = arith.constant 0 : i32
    %c0_i32_1 = arith.constant 0 : i32
    %c0_i32_2 = arith.constant 0 : i32
    return %c0_i32, %c0_i32_0, %c0_i32_1 : i32, i32, i32
  }
  func.func @transform_2(%arg0: i32) -> (i32, i32) {
    %c0_i32 = arith.constant 0 : i32
    %c0_i32_0 = arith.constant 0 : i32
    %c0_i32_1 = arith.constant 0 : i32
    return %c0_i32, %c0_i32_0 : i32, i32
  }
  func.func @transform_3(%arg0: i32) -> (i32, i32, i32) {
    %c0_i32 = arith.constant 0 : i32
    %c0_i32_0 = arith.constant 0 : i32
    %c0_i32_1 = arith.constant 0 : i32
    %c0_i32_2 = arith.constant 0 : i32
    return %c0_i32, %c0_i32_0, %c0_i32_1 : i32, i32, i32
  }
  func.func @transform_4(%arg0: i32) -> (i32, i32) {
    %c0_i32 = arith.constant 0 : i32
    %c0_i32_0 = arith.constant 0 : i32
    %c0_i32_1 = arith.constant 0 : i32
    return %c0_i32, %c0_i32_0 : i32, i32
  }
  func.func @transform_5(%arg0: i32) -> (i32, i32) {
    %c0_i32 = arith.constant 0 : i32
    %c0_i32_0 = arith.constant 0 : i32
    %c0_i32_1 = arith.constant 0 : i32
    return %c0_i32, %c0_i32_0 : i32, i32
  }
  func.func @transform_6(%arg0: i32) -> (i32, i32) {
    %c0_i32 = arith.constant 0 : i32
    %c0_i32_0 = arith.constant 0 : i32
    %c0_i32_1 = arith.constant 0 : i32
    return %c0_i32, %c0_i32_0 : i32, i32
  }
  func.func @transform_7(%arg0: i32) -> (i32, i32, i32) {
    %c0_i32 = arith.constant 0 : i32
    %c0_i32_0 = arith.constant 0 : i32
    %c0_i32_1 = arith.constant 0 : i32
    return %arg0, %c0_i32, %c0_i32_0 : i32, i32, i32
  }
}

module attributes {stable_mosaic.version = 11 : i64} {
  func.func @_fc_stack_kernel(%arg0: i32, %arg1: memref<16x512xbf16, #tpu.memory_space<vmem>>, %arg2: memref<512x128xbf16, #tpu.memory_space<vmem>>, %arg3: memref<1x128xf32, #tpu.memory_space<vmem>>, %arg4: memref<128x128xbf16, #tpu.memory_space<vmem>>, %arg5: memref<1x128xf32, #tpu.memory_space<vmem>>, %arg6: memref<128x128xbf16, #tpu.memory_space<vmem>>, %arg7: memref<1x128xf32, #tpu.memory_space<vmem>>, %arg8: memref<16x128xf32, #tpu.memory_space<vmem>>) attributes {dimension_semantics = [#tpu.dimension_semantics<parallel>], iteration_bounds = array<i64: 1>, scalar_prefetch = 0 : i64, scratch_operands = 0 : i64, tpu.core_type = #tpu.core_type<tc>, window_params = [{transform_indices = @transform_0, window_bounds = array<i64: 16, 512>}, {pipeline_mode = #tpu.pipeline_mode<synchronous>, transform_indices = @transform_1, window_bounds = array<i64: 512, 128>}, {pipeline_mode = #tpu.pipeline_mode<synchronous>, transform_indices = @transform_2, window_bounds = array<i64: 1, 128>}, {pipeline_mode = #tpu.pipeline_mode<synchronous>, transform_indices = @transform_3, window_bounds = array<i64: 128, 128>}, {pipeline_mode = #tpu.pipeline_mode<synchronous>, transform_indices = @transform_4, window_bounds = array<i64: 1, 128>}, {pipeline_mode = #tpu.pipeline_mode<synchronous>, transform_indices = @transform_5, window_bounds = array<i64: 128, 128>}, {pipeline_mode = #tpu.pipeline_mode<synchronous>, transform_indices = @transform_6, window_bounds = array<i64: 1, 128>}, {transform_indices = @transform_7, window_bounds = array<i64: 16, 128>}]} {
    %c0 = arith.constant 0 : index
    %c0_0 = arith.constant 0 : index
    %0 = vector.load %arg1[%c0, %c0_0] : memref<16x512xbf16, #tpu.memory_space<vmem>>, vector<16x512xbf16>
    %c0_1 = arith.constant 0 : index
    %c0_2 = arith.constant 0 : index
    %1 = vector.load %arg2[%c0_1, %c0_2] : memref<512x128xbf16, #tpu.memory_space<vmem>>, vector<512x128xbf16>
    %cst = arith.constant dense<0.000000e+00> : vector<16x128xf32>
    %2 = tpu.matmul %0, %1, %cst {dimension_numbers = #tpu.dot_dimension_numbers<[1], [0], [0], [1], [0, 0, 1, 1], [], []>} : vector<16x512xbf16>, vector<512x128xbf16>, vector<16x128xf32> -> vector<16x128xf32>
    %c0_3 = arith.constant 0 : index
    %c0_4 = arith.constant 0 : index
    %3 = vector.load %arg3[%c0_3, %c0_4] : memref<1x128xf32, #tpu.memory_space<vmem>>, vector<1x128xf32>
    %4 = vector.broadcast %3 : vector<1x128xf32> to vector<16x128xf32>
    %5 = arith.addf %2, %4 : vector<16x128xf32>
    %cst_5 = arith.constant 0.000000e+00 : f32
    %6 = vector.broadcast %cst_5 : f32 to vector<16x128xf32>
    %7 = arith.maximumf %5, %6 : vector<16x128xf32>
    %8 = arith.truncf %7 : vector<16x128xf32> to vector<16x128xbf16>
    %c0_6 = arith.constant 0 : index
    %c0_7 = arith.constant 0 : index
    %9 = vector.load %arg4[%c0_6, %c0_7] : memref<128x128xbf16, #tpu.memory_space<vmem>>, vector<128x128xbf16>
    %cst_8 = arith.constant dense<0.000000e+00> : vector<16x128xf32>
    %10 = tpu.matmul %8, %9, %cst_8 {dimension_numbers = #tpu.dot_dimension_numbers<[1], [0], [0], [1], [0, 0, 1, 1], [], []>} : vector<16x128xbf16>, vector<128x128xbf16>, vector<16x128xf32> -> vector<16x128xf32>
    %c0_9 = arith.constant 0 : index
    %c0_10 = arith.constant 0 : index
    %11 = vector.load %arg5[%c0_9, %c0_10] : memref<1x128xf32, #tpu.memory_space<vmem>>, vector<1x128xf32>
    %12 = vector.broadcast %11 : vector<1x128xf32> to vector<16x128xf32>
    %13 = arith.addf %10, %12 : vector<16x128xf32>
    %cst_11 = arith.constant 0.000000e+00 : f32
    %14 = vector.broadcast %cst_11 : f32 to vector<16x128xf32>
    %15 = arith.maximumf %13, %14 : vector<16x128xf32>
    %16 = arith.truncf %15 : vector<16x128xf32> to vector<16x128xbf16>
    %c0_12 = arith.constant 0 : index
    %c0_13 = arith.constant 0 : index
    %17 = vector.load %arg6[%c0_12, %c0_13] : memref<128x128xbf16, #tpu.memory_space<vmem>>, vector<128x128xbf16>
    %cst_14 = arith.constant dense<0.000000e+00> : vector<16x128xf32>
    %18 = tpu.matmul %16, %17, %cst_14 {dimension_numbers = #tpu.dot_dimension_numbers<[1], [0], [0], [1], [0, 0, 1, 1], [], []>} : vector<16x128xbf16>, vector<128x128xbf16>, vector<16x128xf32> -> vector<16x128xf32>
    %c0_15 = arith.constant 0 : index
    %c0_16 = arith.constant 0 : index
    %19 = vector.load %arg7[%c0_15, %c0_16] : memref<1x128xf32, #tpu.memory_space<vmem>>, vector<1x128xf32>
    %20 = vector.broadcast %19 : vector<1x128xf32> to vector<16x128xf32>
    %21 = arith.addf %18, %20 : vector<16x128xf32>
    %22 = tpu.iota {dimensions = array<i32: 1>} : vector<16x128xi32>
    %c10_i32 = arith.constant 10 : i32
    %23 = vector.broadcast %c10_i32 : i32 to vector<16x128xi32>
    %24 = arith.cmpi slt, %22, %23 : vector<16x128xi32>
    %cst_17 = arith.constant -1.000000e+30 : f32
    %25 = vector.broadcast %cst_17 : f32 to vector<16x128xf32>
    %26 = arith.select %24, %21, %25 : vector<16x128xi1>, vector<16x128xf32>
    %cst_18 = arith.constant dense<0xFF800000> : vector<16xf32>
    %27 = vector.multi_reduction <maximumf>, %26, %cst_18 [1] : vector<16x128xf32> to vector<16xf32>
    %28 = vector.shape_cast %27 : vector<16xf32> to vector<16x1xf32>
    %29 = vector.broadcast %28 : vector<16x1xf32> to vector<16x128xf32>
    %30 = arith.subf %26, %29 : vector<16x128xf32>
    %31 = math.exp %30 : vector<16x128xf32>
    %cst_19 = arith.constant dense<0.000000e+00> : vector<16xf32>
    %32 = vector.multi_reduction <add>, %31, %cst_19 [1] : vector<16x128xf32> to vector<16xf32>
    %33 = vector.shape_cast %32 : vector<16xf32> to vector<16x1xf32>
    %34 = math.log %33 : vector<16x1xf32>
    %35 = vector.broadcast %34 : vector<16x1xf32> to vector<16x128xf32>
    %36 = arith.subf %30, %35 : vector<16x128xf32>
    %c0_20 = arith.constant 0 : index
    %c0_21 = arith.constant 0 : index
    %37 = vector.load %arg8[%c0_20, %c0_21] : memref<16x128xf32, #tpu.memory_space<vmem>>, vector<16x128xf32>
    tpu.vector_store %arg8[%c0_20, %c0_21], %36 {strides = array<i32>} : memref<16x128xf32, #tpu.memory_space<vmem>>, vector<16x128xf32>,
    return
  }
  func.func @transform_0(%arg0: i32) -> (i32, i32) {
    %c0_i32 = arith.constant 0 : i32
    %c0_i32_0 = arith.constant 0 : i32
    return %arg0, %c0_i32 : i32, i32
  }
  func.func @transform_1(%arg0: i32) -> (i32, i32) {
    %c0_i32 = arith.constant 0 : i32
    %c0_i32_0 = arith.constant 0 : i32
    %c0_i32_1 = arith.constant 0 : i32
    return %c0_i32, %c0_i32_0 : i32, i32
  }
  func.func @transform_2(%arg0: i32) -> (i32, i32) {
    %c0_i32 = arith.constant 0 : i32
    %c0_i32_0 = arith.constant 0 : i32
    %c0_i32_1 = arith.constant 0 : i32
    return %c0_i32, %c0_i32_0 : i32, i32
  }
  func.func @transform_3(%arg0: i32) -> (i32, i32) {
    %c0_i32 = arith.constant 0 : i32
    %c0_i32_0 = arith.constant 0 : i32
    %c0_i32_1 = arith.constant 0 : i32
    return %c0_i32, %c0_i32_0 : i32, i32
  }
  func.func @transform_4(%arg0: i32) -> (i32, i32) {
    %c0_i32 = arith.constant 0 : i32
    %c0_i32_0 = arith.constant 0 : i32
    %c0_i32_1 = arith.constant 0 : i32
    return %c0_i32, %c0_i32_0 : i32, i32
  }
  func.func @transform_5(%arg0: i32) -> (i32, i32) {
    %c0_i32 = arith.constant 0 : i32
    %c0_i32_0 = arith.constant 0 : i32
    %c0_i32_1 = arith.constant 0 : i32
    return %c0_i32, %c0_i32_0 : i32, i32
  }
  func.func @transform_6(%arg0: i32) -> (i32, i32) {
    %c0_i32 = arith.constant 0 : i32
    %c0_i32_0 = arith.constant 0 : i32
    %c0_i32_1 = arith.constant 0 : i32
    return %c0_i32, %c0_i32_0 : i32, i32
  }
  func.func @transform_7(%arg0: i32) -> (i32, i32) {
    %c0_i32 = arith.constant 0 : i32
    %c0_i32_0 = arith.constant 0 : i32
    return %arg0, %c0_i32 : i32, i32
  }
}

</mosaic_0001>

<bundles_post_ra>
// kernel: lenet_forward.3
= control target key start
LH: loop header
LB: loop body
LE: loop exit
PB: predicated region body
PF: predicated region fallthrough
CT: control target
= control target key end

     0   :  { %v878_v34 = vmov 0.0   ;;  %vm879_vm0 = vmmov 0   ;;  %s1109_s1 = inlined_call_operand.vmem [shape: bf16[512,128], index: 1, kind: input, shape index: {}]   ;;  %s1110_s0 = inlined_call_operand.vmem [shape: bf16[16,512], index: 0, kind: input, shape index: {}]   ;;  %s1111_s3 = inlined_call_operand.vmem [shape: bf16[128,128], index: 3, kind: input, shape index: {}]   ;;  %s1112_s5 = inlined_call_operand.vmem [shape: bf16[128,128], index: 5, kind: input, shape index: {}]   ;;  %s1113_s2 = inlined_call_operand.vmem [shape: f32[1,128], index: 2, kind: input, shape index: {}]   ;;  %s1114_s4 = inlined_call_operand.vmem [shape: f32[1,128], index: 4, kind: input, shape index: {}]   ;;  %s1115_s6 = inlined_call_operand.vmem [shape: f32[1,128], index: 6, kind: input, shape index: {}]   ;;  %s1116_s7 = inlined_call_operand.vmem [shape: f32[16,128], index: 7, kind: output, shape index: {}]  }
   0x1   :  { %v816_v0 = vld [vmem:[%s1109_s1 + $0x40] sm:$0xff]   ;;  %v820_v4 = vld [vmem:[%s1109_s1 + $0x48] sm:$0xff]   ;;  %v824_v8 = vld [vmem:[%s1109_s1 + $0x50] sm:$0xff]  }
   0x2   :  { %v817_v1 = vld [vmem:[%s1109_s1 + $0xc0] sm:$0xff]   ;;  %712 = vmatprep.subr.bf16.mxu0 %v816_v0  ;;  %v821_v5 = vld [vmem:[%s1109_s1 + $0xc8] sm:$0xff]   ;;  %v825_v9 = vld [vmem:[%s1109_s1 + $0xd0] sm:$0xff]  }
   0x3   :  { %v818_v2 = vld [vmem:[%s1109_s1] sm:$0xff]   ;;  %734 = vmatprep.subr.bf16.mxu1 %v817_v1  ;;  %v822_v6 = vld [vmem:[%s1109_s1 + $0x8] sm:$0xff]   ;;  %v826_v10 = vld [vmem:[%s1109_s1 + $0x10] sm:$0xff]  }
   0x4   :  { %v819_v3 = vld [vmem:[%s1109_s1 + $0x80] sm:$0xff]   ;;  %713 = vmatpush3.bf16.msra.mxu0 %v818_v2  ;;  %v823_v7 = vld [vmem:[%s1109_s1 + $0x88] sm:$0xff]   ;;  %v827_v11 = vld [vmem:[%s1109_s1 + $0x90] sm:$0xff]  }
   0x5   :  { %735 = vmatpush3.bf16.msra.mxu1 %v819_v3  ;;  %714 = vmatprep.subr.bf16.mxu0 %v820_v4  ;;  %v828_v12 = vld [vmem:[%s1109_s1 + $0x58] sm:$0xff]   ;;  %v832_v16 = vld [vmem:[%s1109_s1 + $0x60] sm:$0xff]   ;;  %v836_v20 = vld [vmem:[%s1109_s1 + $0x68] sm:$0xff]  }
   0x6   :  { %736 = vmatprep.subr.bf16.mxu1 %v821_v5  ;;  %v829_v13 = vld [vmem:[%s1109_s1 + $0xd8] sm:$0xff]   ;;  %v833_v17 = vld [vmem:[%s1109_s1 + $0xe0] sm:$0xff]   ;;  %v837_v21 = vld [vmem:[%s1109_s1 + $0xe8] sm:$0xff]  }
   0x7   :  { %v830_v14 = vld [vmem:[%s1109_s1 + $0x18] sm:$0xff]   ;;  %v834_v18 = vld [vmem:[%s1109_s1 + $0x20] sm:$0xff]   ;;  %v838_v22 = vld [vmem:[%s1109_s1 + $0x28] sm:$0xff]  }
   0x8   :  { %715 = vmatpush3.bf16.msra.mxu0 %v822_v6  ;;  %v831_v15 = vld [vmem:[%s1109_s1 + $0x98] sm:$0xff]   ;;  %v835_v19 = vld [vmem:[%s1109_s1 + $0xa0] sm:$0xff]   ;;  %v839_v23 = vld [vmem:[%s1109_s1 + $0xa8] sm:$0xff]  }
   0x9   :  { %737 = vmatpush3.bf16.msra.mxu1 %v823_v7  ;;  %716 = vmatprep.subr.bf16.mxu0 %v824_v8  ;;  %v840_v24 = vld [vmem:[%s1109_s1 + $0x70] sm:$0xff]   ;;  %v844_v28 = vld [vmem:[%s1109_s1 + $0x78] sm:$0xff]   ;;  %v854_v37 = vld [vmem:[%s1111_s3] sm:$0xff]  }
   0xa   :  { %738 = vmatprep.subr.bf16.mxu1 %v825_v9  ;;  %v841_v25 = vld [vmem:[%s1109_s1 + $0xf0] sm:$0xff]   ;;  %v845_v29 = vld [vmem:[%s1109_s1 + $0xf8] sm:$0xff]   ;;  %v855_v38 = vld [vmem:[%s1111_s3 + $0x8] sm:$0xff]  }
   0xb   :  { %v842_v26 = vld [vmem:[%s1109_s1 + $0x30] sm:$0xff]   ;;  %v846_v30 = vld [vmem:[%s1109_s1 + $0x38] sm:$0xff]   ;;  %v858_v41 = vld [vmem:[%s1111_s3 + $0x20] sm:$0xff]  }
   0xc   :  { %717 = vmatpush3.bf16.msra.mxu0 %v826_v10  ;;  %v843_v27 = vld [vmem:[%s1109_s1 + $0xb0] sm:$0xff]   ;;  %v847_v31 = vld [vmem:[%s1109_s1 + $0xb8] sm:$0xff]   ;;  %v859_v42 = vld [vmem:[%s1111_s3 + $0x28] sm:$0xff]  }
   0xd   :  { %739 = vmatpush3.bf16.msra.mxu1 %v827_v11  ;;  %718 = vmatprep.subr.bf16.mxu0 %v828_v12  ;;  %v848_v32 = vld [vmem:[%s1110_s0] ss:$16 sps:$4 sm:$0xff]   ;;  %v850_v33 = vld [vmem:[%s1110_s0 + $0x4] ss:$16 sps:$4 sm:$0xff]   ;;  %v851_v35 = vld [vmem:[%s1110_s0 + $0x8] ss:$16 sps:$4 sm:$0xff]  }
   0xe   :  { %740 = vmatprep.subr.bf16.mxu1 %v829_v13  ;;  %v853_v36 = vld [vmem:[%s1110_s0 + $0xc] ss:$16 sps:$4 sm:$0xff]   ;;  %346 = vmatprep.mubr.bf16.mxu0 %v850_v33  ;;  %v856_v39 = vld [vmem:[%s1111_s3 + $0x10] sm:$0xff]   ;;  %v862_v45 = vld [vmem:[%s1112_s5] sm:$0xff]  }
   0xf   :  { %387 = vmatprep.mubr.bf16.mxu1 %v853_v36  ;;  %v857_v40 = vld [vmem:[%s1111_s3 + $0x18] sm:$0xff]   ;;  %v860_v43 = vld [vmem:[%s1111_s3 + $0x30] sm:$0xff]   ;;  %v863_v46 = vld [vmem:[%s1112_s5 + $0x8] sm:$0xff]  }
  0x10   :  { %719 = vmatpush3.bf16.msra.mxu0 %v830_v14  ;;  %v861_v44 = vld [vmem:[%s1111_s3 + $0x38] sm:$0xff]   ;;  %v864_v47 = vld [vmem:[%s1112_s5 + $0x10] sm:$0xff]   ;;  %v866_v49 = vld [vmem:[%s1112_s5 + $0x20] sm:$0xff]  }
  0x11   :  { %741 = vmatpush3.bf16.msra.mxu1 %v831_v15  ;;  %720 = vmatprep.subr.bf16.mxu0 %v832_v16  ;;  %v865_v48 = vld [vmem:[%s1112_s5 + $0x18] sm:$0xff]   ;;  %v867_v50 = vld [vmem:[%s1112_s5 + $0x28] sm:$0xff]   ;;  %v657_v53 = vld [vmem:[%s1113_s2] ss:$0 sm:$0xff] }
  0x12   :  { %742 = vmatprep.subr.bf16.mxu1 %v833_v17  ;;  %v868_v7 = vld [vmem:[%s1112_s5 + $0x30] sm:$0xff]   ;;  %v869_v8 = vld [vmem:[%s1112_s5 + $0x38] sm:$0xff]   ;;  %v694_v9 = vld [vmem:[%s1114_s4] ss:$0 sm:$0xff] }
  0x14   :  { %721 = vmatpush3.bf16.msra.mxu0 %v834_v18 }
  0x15   :  { %743 = vmatpush3.bf16.msra.mxu1 %v835_v19  ;;  %722 = vmatprep.subr.bf16.mxu0 %v836_v20  ;;  %v626_v19 = vlaneseq }
  0x16   :  { %744 = vmatprep.subr.bf16.mxu1 %v837_v21  ;;  %v703_v21 = vld [vmem:[%s1115_s6] ss:$0 sm:$0xff] }
  0x17   :  { %v627_v20 = vand.u32 127, %v626_v19 }
  0x18   :  { %723 = vmatpush3.bf16.msra.mxu0 %v838_v22 }
  0x19   :  { %745 = vmatpush3.bf16.msra.mxu1 %v839_v23  ;;  %724 = vmatprep.subr.bf16.mxu0 %v840_v24  ;;  %vm628_vm1 = vcmp.lt.s32.totalorder %v627_v20, 10 }
  0x1a   :  { %746 = vmatprep.subr.bf16.mxu1 %v841_v25 }
  0x1c   :  { %725 = vmatpush3.bf16.msra.mxu0 %v842_v26 }
  0x1d   :  { %747 = vmatpush3.bf16.msra.mxu1 %v843_v27  ;;  %726 = vmatprep.subr.bf16.mxu0 %v844_v28 }
  0x1e   :  { %748 = vmatprep.subr.bf16.mxu1 %v845_v29 }
  0x20   :  { %727 = vmatpush3.bf16.msra.mxu0 %v846_v30 }
  0x21   :  { %749 = vmatpush3.bf16.msra.mxu1 %v847_v31  ;;  %774 = vmatprep.subr.bf16.mxu0 %v878_v34 }
  0x22   :  { %794 = vmatprep.subr.bf16.mxu1 %v878_v34 }
  0x23   :  { %347 = vmatmul.mubr.bf16.vlgmr.msra.gmra.mrb[0].mxu0 %v848_v32 }
  0x24   :  { %388 = vmatmul.mubr.bf16.vlgmr.msra.gmra.mrb[0].mxu1 %v851_v35  ;;  %775 = vmatpush3.bf16.msra.mxu0 %v854_v37 }
  0x25   :  { %776 = vmatprep.subr.bf16.mxu0 %v878_v34  ;;  %790 = vmatprep.mubr.msk.bf16.mxu0 %vm879_vm0, %v878_v34 }
  0x26   :  { %810 = vmatprep.mubr.msk.bf16.mxu1 %vm879_vm0, %v878_v34  ;;  %795 = vmatpush3.bf16.msra.mxu1 %v862_v45 }
  0x27   :  { %796 = vmatprep.subr.bf16.mxu1 %v878_v34 }
  0x28   :  { %777 = vmatpush3.bf16.msra.mxu0 %v855_v38 }
  0x29   :  { %778 = vmatprep.subr.bf16.mxu0 %v878_v34 }
  0x2a   :  { %797 = vmatpush3.bf16.msra.mxu1 %v863_v46 }
  0x2b   :  { %798 = vmatprep.subr.bf16.mxu1 %v878_v34 }
  0x2c   :  { %779 = vmatpush3.bf16.msra.mxu0 %v856_v39 }
  0x2d   :  { %780 = vmatprep.subr.bf16.mxu0 %v878_v34 }
  0x2e   :  { %799 = vmatpush3.bf16.msra.mxu1 %v864_v47 }
  0x2f   :  { %800 = vmatprep.subr.bf16.mxu1 %v878_v34 }
  0x30   :  { %781 = vmatpush3.bf16.msra.mxu0 %v857_v40 }
  0x31   :  { %782 = vmatprep.subr.bf16.mxu0 %v878_v34 }
  0x32   :  { %801 = vmatpush3.bf16.msra.mxu1 %v865_v48 }
  0x33   :  { %802 = vmatprep.subr.bf16.mxu1 %v878_v34 }
  0x34   :  { %783 = vmatpush3.bf16.msra.mxu0 %v858_v41 }
  0x35   :  { %784 = vmatprep.subr.bf16.mxu0 %v878_v34 }
  0x36   :  { %803 = vmatpush3.bf16.msra.mxu1 %v866_v49 }
  0x37   :  { %804 = vmatprep.subr.bf16.mxu1 %v878_v34 }
  0x38   :  { %785 = vmatpush3.bf16.msra.mxu0 %v859_v42 }
  0x39   :  { %786 = vmatprep.subr.bf16.mxu0 %v878_v34 }
  0x3a   :  { %805 = vmatpush3.bf16.msra.mxu1 %v867_v50 }
  0x3b   :  { %806 = vmatprep.subr.bf16.mxu1 %v878_v34 }
  0x3c   :  { %787 = vmatpush3.bf16.msra.mxu0 %v860_v43 }
  0x3d   :  { %788 = vmatprep.subr.bf16.mxu0 %v878_v34 }
  0x3e   :  { %807 = vmatpush3.bf16.msra.mxu1 %v868_v7 }
  0x3f   :  { %808 = vmatprep.subr.bf16.mxu1 %v878_v34 }
  0x40   :  { %789 = vmatpush3.bf16.msra.mxu0 %v861_v44 }
  0x42   :  { %809 = vmatpush3.bf16.msra.mxu1 %v869_v8 }
  0xf6   :  { %v728_v51 = vpop.f32.mrb[0].mxu0 }
  0xf7   :  { %v750_v52 = vpop.f32.mrb[0].mxu1  ;;  %v729_v54 = vpop.f32.mrb[1].mxu0 }
  0xf8   :  { %v730_v55 = vadd.f32 %v729_v54, %v728_v51  ;;  %v751_v56 = vpop.f32.mrb[1].mxu1  ;;  %v731_v57 = vpop.f32.mrb[2].mxu0 }
  0xf9   :  { %v752_v58 = vadd.f32 %v751_v56, %v750_v52  ;;  %v753_v59 = vpop.f32.mrb[2].mxu1  ;;  %v732_v60 = vpop.f32.mrb[3].mxu0 }
  0xfa   :  { %v349_v61 = vadd.f32 %v730_v55, %v657_v53  ;;  %v733_v62 = vadd.f32 %v732_v60, %v731_v57  ;;  %v754_v63 = vpop.f32.mrb[3].mxu1 }
  0xfb   :  { %v755_v0 = vadd.f32 %v754_v63, %v753_v59 }
  0xfc   :  { %v390_v1 = vadd.f32 %v752_v58, %v349_v61  ;;  %v352_v2 = vadd.f32 %v733_v62, %v657_v53 }
  0xfe   :  { %v393_v3 = vadd.f32 %v755_v0, %v352_v2  ;;  %v396_v4 = vmax.f32 %v390_v1, 0.0 }
 0x100   :  { %v397_v5 = vmax.f32 %v393_v3, 0.0 }
 0x102   :  { %v398_v6 = vpack.c.bf16 %v397_v5, %v396_v4 }
 0x104   :  { %791 = vmatmul.mubr.bf16.vlgmr.msra.gmra.mrb[4].mxu0 %v398_v6 }
 0x1d7   :  { %v504_v10 = vpop.f32.mrb[4].mxu0 }
 0x1d8   :  { %v505_v11 = vadd.f32 %v694_v9, %v504_v10  ;;  %v792_v12 = vpop.f32.mrb[5].mxu0 }
 0x1d9   :  { %v507_v13 = vpop.f32.mrb[6].mxu0 }
 0x1da   :  { %v508_v14 = vadd.f32 %v694_v9, %v507_v13  ;;  %v793_v15 = vpop.f32.mrb[7].mxu0  ;;  %v511_v16 = vmax.f32 %v505_v11, 0.0 }
 0x1dc   :  { %v512_v17 = vmax.f32 %v508_v14, 0.0 }
 0x1de   :  { %v513_v18 = vpack.c.bf16 %v512_v17, %v511_v16 }
 0x1e0   :  { %811 = vmatmul.mubr.bf16.vlgmr.msra.gmra.mrb[4].mxu1 %v513_v18 }
 0x2b3   :  { %v619_v22 = vpop.f32.mrb[4].mxu1 }
 0x2b4   :  { %v620_v23 = vadd.f32 %v703_v21, %v619_v22  ;;  %v812_v24 = vpop.f32.mrb[5].mxu1 }
 0x2b5   :  { %v622_v25 = vpop.f32.mrb[6].mxu1 }
 0x2b6   :  { %v623_v26 = vadd.f32 %v703_v21, %v622_v25  ;;  %v813_v27 = vpop.f32.mrb[7].mxu1  ;;  %v629_v28 = vsel %vm628_vm1, %v620_v23, -1e+30 }
 0x2b7   :  { %631 = vmax.xlane.f32.xlu0 %v629_v28 }
 0x2b8   :  { %v630_v29 = vsel %vm628_vm1, %v623_v26, -1e+30 }
 0x2bb   :  { %633 = vmax.xlane.f32.xlu0 %v630_v29 }
 0x344   :  { %v632_v30 = vpop.xlane.xlu0 %631 }
 0x345   :  { %v635_v31 = vsub.f32 %v629_v28, %v632_v30 }
 0x347   :  { %v637_v32 = vmul.f32 1.442695, %v635_v31 }
 0x348   :  { %v634_v33 = vpop.xlane.xlu0 %633 }
 0x349   :  { %v636_v34 = vsub.f32 %v630_v29, %v634_v33  ;;  %870 = vpow2.f32 %v637_v32 }
 0x34b   :  { %v639_v35 = vmul.f32 1.442695, %v636_v34 }
 0x34d   :  { %872 = vpow2.f32 %v639_v35 }
 0x353   :  { %v871_v36 = vpop.eup %870 }
 0x354   :  { %641 = vadd.xlane.f32.xlu1 %v871_v36 }
 0x357   :  { %v873_v37 = vpop.eup %872 }
 0x358   :  { %643 = vadd.xlane.f32.xlu1 %v873_v37 }
 0x3e1   :  { %v642_v38 = vpop.xlane.xlu1 %641 }
 0x3e2   :  { %874 = vlog2.f32 %v642_v38 }
 0x3e5   :  { %v644_v39 = vpop.xlane.xlu1 %643 }
 0x3e6   :  { %876 = vlog2.f32 %v644_v39 }
 0x3ec   :  { %v875_v40 = vpop.eup %874 }
 0x3ed   :  { %v646_v41 = vmul.f32 0.6931472, %v875_v40 }
 0x3ef   :  { %v649_v42 = vsub.f32 %v635_v31, %v646_v41 }
 0x3f0   :  { %v877_v43 = vpop.eup %876 }
 0x3f1   :  { %651 = vst [vmem:[%s1116_s7] sm:$0xff] %v649_v42  ;;  %v648_v44 = vmul.f32 0.6931472, %v877_v43 }
 0x3f3   :  { %v650_v45 = vsub.f32 %v636_v34, %v648_v44 }
 0x3f5   :  { %652 = vst [vmem:[%s1116_s7 + $0x8] sm:$0xff] %v650_v45 }

// kernel: lenet_forward.2
= control target key start
LH: loop header
LB: loop body
LE: loop exit
PB: predicated region body
PF: predicated region fallthrough
CT: control target
= control target key end

     0   :  { %s9896_s24 = smov 0   ;;  %s11985_s0 = inlined_call_operand.vmem [shape: f32[2,8,1280], index: 0, kind: input, shape index: {}]   ;;  %s11986_s1 = inlined_call_operand.vmem [shape: bf16[25,8,8], index: 1, kind: input, shape index: {}]   ;;  %s11987_s2 = inlined_call_operand.vmem [shape: f32[8,1], index: 2, kind: input, shape index: {}]   ;;  %s11988_s3 = inlined_call_operand.vmem [shape: bf16[25,16,8], index: 3, kind: input, shape index: {}]   ;;  %s11989_s4 = inlined_call_operand.vmem [shape: f32[16,1], index: 4, kind: input, shape index: {}]   ;;  %s11990_s5 = inlined_call_operand.vmem [shape: bf16[1024,224], index: 5, kind: input, shape index: {}]   ;;  %s11991_s6 = inlined_call_operand.vmem [shape: bf16[224,32], index: 6, kind: input, shape index: {}]   ;;  %s11992_s7 = inlined_call_operand.vmem [shape: bf16[2,16,32], index: 7, kind: output, shape index: {}]  }
   0x1 LB: > { %s8869_s25 = sadd.s32 4294967295, %s9822_s24   ;;  %p8873_p0 = scmp.ge.s32.totalorder %s9822_s24, 1  ;;  %s9822_s24 = sphi %s9896_s24, %s17_s24  }
   0x2   : > { %p237_p1 = scmp.lt.s32.totalorder %s9822_s24, 3 }
   0x4   : > { %p238_p2 = pnand %p8873_p0, %p237_p1 }
   0x6   : > { %241 = sbr.rel (%p238_p2) target bundleno = 2581 (0xa15), region = 48 }
   0xd   : > { %p269_p3 = scmp.lt.s32.totalorder %s8869_s25, 1  ;;  %v9824_v0 = vmov 0   ;;  %s9825_s30 = smov 127   ;;  %vm333_vm0 = vcmask 1039360   ;;  %vm346_vm1 = vcmask 1043456   ;;  %vm342_vm2 = vcmask 64512  }
   0xe   : > { %403 = vmatprep.mubr.bf16.mxu0 %v9824_v0  ;;  %444 = vmatprep.mubr.bf16.mxu1 %v9824_v0  ;;  %s9826_s8 = smov 126   ;;  %s9827_s9 = smov 125   ;;  %v8877_v28 = vld [vmem:[%s11986_s1 + $0x4] sm:$0xf]  ;;  %v303_v48 = vld [vmem:[%s11986_s1] sm:$0xf] }
   0xf   : > { %s12015_s25 = smov (!%p269_p3, %s8869_s25), 1  ;;  %9523 = vset.pattern.permute.xlu1 %v9824_v0  ;;  %9564 = vset.pattern.permute.xlu0 %v9824_v0  ;;  %s9828_s10 = smov 124   ;;  %vm746_vm3 = vcmask 1031168   ;;  %vm974_vm4 = vcmask 1022976   ;;  %vm1202_vm5 = vcmask 1014784   ;;  %vm1430_vm6 = vcmask 785408  }
  0x10   : > { %s9482_s26 = smul.u32 80, %s12015_s25  ;;  %s9829_s11 = smov 96   ;;  %vm1658_vm7 = vcmask 777216   ;;  %vm1886_vm8 = vcmask 769024   ;;  %vm2114_vm9 = vcmask 760832   ;;  %vm2342_vm10 = vcmask 752640  }
  0x11   : > { %s9830_s12 = smov 95   ;;  %s9831_s13 = smov 94   ;;  %vm2570_vm11 = vcmask 523264   ;;  %vm2798_vm12 = vcmask 515072   ;;  %vm3026_vm13 = vcmask 506880   ;;  %vm11993_vm14 = vcmask 498688  }
  0x12   : > { %s9910_s29 = scalar_lea.vmem %s11985_s0, %s9482_s26  ;;  %s9832_s16 = smov 93   ;;  %vm11996_vm15 = vcmask 490496  }
  0x13   : > { %v285_v1 = vld [vmem:[%s9910_s29 + $0x10] sm:$0xff]  ;;  %v283_v2 = vld [vmem:[%s9910_s29] sm:$0xff]  ;;  %v286_v3 = vld [vmem:[%s9910_s29 + $0x18] sm:$0xff]  ;;  %s9833_s19 = smov 92   ;;  %s9834_s22 = smov 64  }
  0x14   : > { %v9919_v4 = vpack.c.bf16 %v285_v1, %v285_v1  ;;  %v9921_v5 = vpack.c.bf16 %v283_v2, %v283_v2  ;;  %v284_v6 = vld [vmem:[%s9910_s29 + $0x8] sm:$0xff]  ;;  %v287_v8 = vld [vmem:[%s9910_s29 + $0x20] sm:$0xff]  ;;  %v9930_v9 = vpack.c.bf16 %v286_v3, %v286_v3  ;;  %v290_v11 = vld [vmem:[%s9910_s29 + $0x38] sm:$0xff]  ;;  %s9835_s27 = smov 63   ;;  %s12001_s15 = smov 62  }
  0x15   : > { %v288_v7 = vld [vmem:[%s9910_s29 + $0x28] sm:$0xff]  ;;  %v9932_v10 = vpack.c.bf16 %v284_v6, %v284_v6  ;;  %v289_v12 = vld [vmem:[%s9910_s29 + $0x30] sm:$0xff]  ;;  %v9942_v14 = vpack.c.bf16 %v287_v8, %v287_v8  ;;  %v291_v15 = vld [vmem:[%s9910_s29 + $0x40] sm:$0xff]  ;;  %v9949_v16 = vpack.c.bf16 %v290_v11, %v290_v11  ;;  %s11999_s20 = smov 61   ;;  %s11997_s26 = smov 60  }
  0x16   : > { %319 = vrot.lane.b32.xlu1 %v9919_v4, %s9825_s30  ;;  %315 = vrot.lane.b32.xlu0 %v9921_v5, %s9825_s30  ;;  %v9940_v13 = vpack.c.bf16 %v288_v7, %v288_v7  ;;  %v9951_v17 = vpack.c.bf16 %v289_v12, %v289_v12  ;;  %v9957_v18 = vpack.c.bf16 %v291_v15, %v291_v15  ;;  %v539_v41 = vsel %vm346_vm1, %v9921_v5, 0  ;;  %v8894_v7 = vld [vmem:[%s11986_s1 + $0x8] sm:$0xf]  ;;  %s9839_s21 = smov 32   ;;  %s9840_s14 = smov 31  }
  0x17   : > { %v545_v45 = vsel %vm346_vm1, %v9919_v4, 0  ;;  %v551_v49 = vsel %vm346_vm1, %v9942_v14, 0  ;;  %s9847_s17 = smov 110  }
  0x18   : > { %v557_v53 = vsel %vm346_vm1, %v9951_v17, 0 }
  0x1a   : > { %321 = vrot.lane.b32.xlu1 %v9930_v9, %s9825_s30  ;;  %317 = vrot.lane.b32.xlu0 %v9932_v10, %s9825_s30 }
  0x1e   : > { %325 = vrot.lane.b32.xlu1 %v9940_v13, %s9825_s30  ;;  %323 = vrot.lane.b32.xlu0 %v9942_v14, %s9825_s30 }
  0x22   : > { %329 = vrot.lane.b32.xlu1 %v9949_v16, %s9825_s30  ;;  %327 = vrot.lane.b32.xlu0 %v9951_v17, %s9825_s30 }
  0x26   : > { %728 = vrot.lane.b32.xlu1 %v9921_v5, %s9826_s8  ;;  %331 = vrot.lane.b32.xlu0 %v9957_v18, %s9825_s30 }
  0x2a   : > { %732 = vrot.lane.b32.xlu1 %v9919_v4, %s9826_s8  ;;  %730 = vrot.lane.b32.xlu0 %v9932_v10, %s9826_s8 }
  0x2e   : > { %736 = vrot.lane.b32.xlu1 %v9942_v14, %s9826_s8  ;;  %734 = vrot.lane.b32.xlu0 %v9930_v9, %s9826_s8 }
  0x32   : > { %740 = vrot.lane.b32.xlu1 %v9951_v17, %s9826_s8  ;;  %738 = vrot.lane.b32.xlu0 %v9940_v13, %s9826_s8 }
  0x36   : > { %744 = vrot.lane.b32.xlu1 %v9957_v18, %s9826_s8  ;;  %742 = vrot.lane.b32.xlu0 %v9949_v16, %s9826_s8 }
  0x3a   : > { %958 = vrot.lane.b32.xlu1 %v9932_v10, %s9827_s9  ;;  %956 = vrot.lane.b32.xlu0 %v9921_v5, %s9827_s9 }
  0x3e   : > { %962 = vrot.lane.b32.xlu1 %v9930_v9, %s9827_s9  ;;  %960 = vrot.lane.b32.xlu0 %v9919_v4, %s9827_s9 }
  0x42   : > { %966 = vrot.lane.b32.xlu1 %v9940_v13, %s9827_s9  ;;  %964 = vrot.lane.b32.xlu0 %v9942_v14, %s9827_s9 }
  0x46   : > { %970 = vrot.lane.b32.xlu1 %v9949_v16, %s9827_s9  ;;  %968 = vrot.lane.b32.xlu0 %v9951_v17, %s9827_s9 }
  0x4a   : > { %1184 = vrot.lane.b32.xlu1 %v9921_v5, %s9828_s10  ;;  %972 = vrot.lane.b32.xlu0 %v9957_v18, %s9827_s9 }
  0x4e   : > { %1188 = vrot.lane.b32.xlu1 %v9919_v4, %s9828_s10  ;;  %1186 = vrot.lane.b32.xlu0 %v9932_v10, %s9828_s10 }
  0x52   : > { %1192 = vrot.lane.b32.xlu1 %v9942_v14, %s9828_s10  ;;  %1190 = vrot.lane.b32.xlu0 %v9930_v9, %s9828_s10 }
  0x56   : > { %1196 = vrot.lane.b32.xlu1 %v9951_v17, %s9828_s10  ;;  %1194 = vrot.lane.b32.xlu0 %v9940_v13, %s9828_s10 }
  0x5a   : > { %1200 = vrot.lane.b32.xlu1 %v9957_v18, %s9828_s10  ;;  %1198 = vrot.lane.b32.xlu0 %v9949_v16, %s9828_s10 }
  0x5e   : > { %1414 = vrot.lane.b32.xlu1 %v9932_v10, %s9829_s11  ;;  %1412 = vrot.lane.b32.xlu0 %v9921_v5, %s9829_s11 }
  0x62   : > { %1418 = vrot.lane.b32.xlu1 %v9930_v9, %s9829_s11  ;;  %1416 = vrot.lane.b32.xlu0 %v9919_v4, %s9829_s11 }
  0x66   : > { %1422 = vrot.lane.b32.xlu1 %v9940_v13, %s9829_s11  ;;  %1420 = vrot.lane.b32.xlu0 %v9942_v14, %s9829_s11 }
  0x6a   : > { %1426 = vrot.lane.b32.xlu1 %v9949_v16, %s9829_s11  ;;  %1424 = vrot.lane.b32.xlu0 %v9951_v17, %s9829_s11 }
  0x6e   : > { %1640 = vrot.lane.b32.xlu1 %v9921_v5, %s9830_s12  ;;  %1428 = vrot.lane.b32.xlu0 %v9957_v18, %s9829_s11 }
  0x72   : > { %1644 = vrot.lane.b32.xlu1 %v9919_v4, %s9830_s12  ;;  %1642 = vrot.lane.b32.xlu0 %v9932_v10, %s9830_s12 }
  0x76   : > { %1648 = vrot.lane.b32.xlu1 %v9942_v14, %s9830_s12  ;;  %1646 = vrot.lane.b32.xlu0 %v9930_v9, %s9830_s12 }
  0x7a   : > { %1652 = vrot.lane.b32.xlu1 %v9951_v17, %s9830_s12  ;;  %1650 = vrot.lane.b32.xlu0 %v9940_v13, %s9830_s12 }
  0x7e   : > { %1656 = vrot.lane.b32.xlu1 %v9957_v18, %s9830_s12  ;;  %1654 = vrot.lane.b32.xlu0 %v9949_v16, %s9830_s12 }
  0x82   : > { %1870 = vrot.lane.b32.xlu1 %v9932_v10, %s9831_s13  ;;  %1868 = vrot.lane.b32.xlu0 %v9921_v5, %s9831_s13 }
  0x86   : > { %1874 = vrot.lane.b32.xlu1 %v9930_v9, %s9831_s13  ;;  %1872 = vrot.lane.b32.xlu0 %v9919_v4, %s9831_s13 }
  0x88   : > { %v320_v19 = vpop.permute.xlu1 %319  ;;  %v316_v20 = vpop.permute.xlu0 %315 }
  0x8a   : > { %1878 = vrot.lane.b32.xlu1 %v9940_v13, %s9831_s13  ;;  %1876 = vrot.lane.b32.xlu0 %v9942_v14, %s9831_s13 }
  0x8c   : > { %v322_v21 = vpop.permute.xlu1 %321  ;;  %v318_v22 = vpop.permute.xlu0 %317 }
  0x8d   : > { %v10064_v23 = vsel %vm333_vm0, %v318_v22, %v320_v19  ;;  %v334_v24 = vsel %vm333_vm0, %v316_v20, %v318_v22  ;;  %v10078_v29 = vsel %vm333_vm0, %v320_v19, %v322_v21 }
  0x8e   : > { %1882 = vrot.lane.b32.xlu1 %v9949_v16, %s9831_s13  ;;  %1880 = vrot.lane.b32.xlu0 %v9951_v17, %s9831_s13  ;;  %v348_v25 = vsel %vm346_vm1, %v334_v24, 0  ;;  %v354_v31 = vsel %vm346_vm1, %v10078_v29, 0 }
  0x8f   : > { %8878 = vmatprep.subr.msk.bf16.mxu0 %vm346_vm1, %v10064_v23 }
  0x90   : > { %372 = vmatpush1.bf16.msra.mxu0 %v348_v25  ;;  %v326_v26 = vpop.permute.xlu1 %325  ;;  %v324_v27 = vpop.permute.xlu0 %323 }
  0x91   : > { %v10081_v30 = vsel %vm333_vm0, %v322_v21, %v324_v27  ;;  %v10093_v32 = vsel %vm333_vm0, %v324_v27, %v326_v26 }
  0x92   : > { %2096 = vrot.lane.b32.xlu1 %v9921_v5, %s9832_s16  ;;  %1884 = vrot.lane.b32.xlu0 %v9957_v18, %s9831_s13  ;;  %v360_v36 = vsel %vm346_vm1, %v10093_v32, 0 }
  0x93   : > { %8879 = vmatmul.mubr.msk.bf16.vlgmr.msra.gmra.mrb[0].mxu0 %vm342_vm2, %v8877_v28  ;;  %8880 = vmatprep.subr.msk.bf16.mxu1 %vm346_vm1, %v10081_v30 }
  0x94   : > { %413 = vmatpush1.bf16.msra.mxu1 %v354_v31  ;;  %v330_v33 = vpop.permute.xlu1 %329  ;;  %v328_v34 = vpop.permute.xlu0 %327  ;;  %485 = vmatprep.mubr.bf16.mxu0 %v9824_v0 }
  0x95   : > { %v10097_v35 = vsel %vm333_vm0, %v326_v26, %v328_v34  ;;  %v10109_v37 = vsel %vm333_vm0, %v328_v34, %v330_v33 }
  0x96   : > { %2100 = vrot.lane.b32.xlu1 %v9919_v4, %s9832_s16  ;;  %2098 = vrot.lane.b32.xlu0 %v9932_v10, %s9832_s16  ;;  %v366_v42 = vsel %vm346_vm1, %v10109_v37, 0 }
  0x97   : > { %8881 = vmatmul.mubr.msk.bf16.vlgmr.msra.gmra.mrb[0].mxu1 %vm342_vm2, %v8877_v28  ;;  %8882 = vmatprep.subr.msk.bf16.mxu0 %vm346_vm1, %v10097_v35 }
  0x98   : > { %454 = vmatpush1.bf16.msra.mxu0 %v360_v36  ;;  %v729_v38 = vpop.permute.xlu1 %728  ;;  %v10111_v39 = vpop.permute.xlu0 %331  ;;  %526 = vmatprep.mubr.bf16.mxu1 %v9824_v0 }
  0x99   : > { %v10116_v40 = vsel %vm333_vm0, %v330_v33, %v10111_v39  ;;  %8886 = vmatprep.subr.msk.bf16.mxu0 %vm346_vm1, %v9932_v10 }
  0x9a   : > { %2104 = vrot.lane.b32.xlu1 %v9942_v14, %s9832_s16  ;;  %2102 = vrot.lane.b32.xlu0 %v9930_v9, %s9832_s16 }
  0x9b   : > { %8883 = vmatmul.mubr.msk.bf16.vlgmr.msra.gmra.mrb[4].mxu0 %vm342_vm2, %v8877_v28  ;;  %8884 = vmatprep.subr.msk.bf16.mxu1 %vm346_vm1, %v10116_v40 }
  0x9c   : > { %495 = vmatpush1.bf16.msra.mxu1 %v366_v42  ;;  %v733_v43 = vpop.permute.xlu1 %732  ;;  %v731_v44 = vpop.permute.xlu0 %730  ;;  %563 = vmatpush1.bf16.msra.mxu0 %v539_v41 }
  0x9d   : > { %594 = vmatprep.mubr.bf16.mxu0 %v9824_v0  ;;  %8888 = vmatprep.subr.msk.bf16.mxu1 %vm346_vm1, %v9930_v9  ;;  %v10157_v50 = vsel %vm746_vm3, %v731_v44, %v733_v43  ;;  %v747_v54 = vsel %vm746_vm3, %v729_v38, %v731_v44 }
  0x9e   : > { %2108 = vrot.lane.b32.xlu1 %v9951_v17, %s9832_s16  ;;  %2106 = vrot.lane.b32.xlu0 %v9940_v13, %s9832_s16  ;;  %v759_v58 = vsel %vm346_vm1, %v747_v54, 0 }
  0x9f   : > { %8885 = vmatmul.mubr.msk.bf16.vlgmr.msra.gmra.mrb[4].mxu1 %vm342_vm2, %v8877_v28  ;;  %8890 = vmatprep.subr.msk.bf16.mxu0 %vm346_vm1, %v9940_v13 }
  0xa0   : > { %v737_v46 = vpop.permute.xlu1 %736  ;;  %v735_v47 = vpop.permute.xlu0 %734  ;;  %604 = vmatpush1.bf16.msra.mxu1 %v545_v45  ;;  %635 = vmatprep.mubr.bf16.mxu1 %v9824_v0 }
  0xa1   : > { %8892 = vmatprep.subr.msk.bf16.mxu1 %vm346_vm1, %v9949_v16  ;;  %v10171_v55 = vsel %vm746_vm3, %v735_v47, %v737_v46  ;;  %v10185_v59 = vsel %vm746_vm3, %v733_v43, %v735_v47  ;;  %v8903_v43 = vld [vmem:[%s11986_s1 + $0xc] sm:$0xf] }
  0xa2   : > { %2112 = vrot.lane.b32.xlu1 %v9957_v18, %s9832_s16  ;;  %2110 = vrot.lane.b32.xlu0 %v9949_v16, %s9832_s16  ;;  %v765_v63 = vsel %vm346_vm1, %v10185_v59, 0 }
  0xa3   : > { %8887 = vmatmul.mubr.msk.bf16.vlgmr.msra.gmra.mrb[8].mxu0 %vm342_vm2, %v303_v48 }
  0xa4   : > { %645 = vmatpush1.bf16.msra.mxu0 %v551_v49  ;;  %v741_v51 = vpop.permute.xlu1 %740  ;;  %v739_v52 = vpop.permute.xlu0 %738  ;;  %676 = vmatprep.mubr.bf16.mxu0 %v9824_v0 }
  0xa5   : > { %8895 = vmatprep.subr.msk.bf16.mxu0 %vm346_vm1, %v10157_v50  ;;  %v10188_v60 = vsel %vm746_vm3, %v739_v52, %v741_v51  ;;  %v10201_v1 = vsel %vm746_vm3, %v737_v46, %v739_v52 }
  0xa6   : > { %2326 = vrot.lane.b32.xlu1 %v9932_v10, %s9833_s19  ;;  %2324 = vrot.lane.b32.xlu0 %v9921_v5, %s9833_s19  ;;  %v771_v11 = vsel %vm346_vm1, %v10201_v1, 0 }
  0xa7   : > { %8889 = vmatmul.mubr.msk.bf16.vlgmr.msra.gmra.mrb[8].mxu1 %vm342_vm2, %v303_v48 }
  0xa8   : > { %686 = vmatpush1.bf16.msra.mxu1 %v557_v53  ;;  %v10173_v56 = vpop.permute.xlu1 %744  ;;  %v743_v57 = vpop.permute.xlu0 %742  ;;  %717 = vmatprep.mubr.bf16.mxu1 %v9824_v0 }
  0xa9   : > { %8897 = vmatprep.subr.msk.bf16.mxu1 %vm346_vm1, %v10171_v55  ;;  %v10205_v2 = vsel %vm746_vm3, %v743_v57, %v10173_v56  ;;  %v10224_v12 = vsel %vm746_vm3, %v741_v51, %v743_v57 }
  0xaa   : > { %2330 = vrot.lane.b32.xlu1 %v9930_v9, %s9833_s19  ;;  %2328 = vrot.lane.b32.xlu0 %v9919_v4, %s9833_s19  ;;  %v777_v21 = vsel %vm346_vm1, %v10224_v12, 0 }
  0xab   : > { %8891 = vmatmul.mubr.msk.bf16.vlgmr.msra.gmra.mrb[12].mxu0 %vm342_vm2, %v303_v48 }
  0xac   : > { %783 = vmatpush1.bf16.msra.mxu0 %v759_v58  ;;  %v959_v61 = vpop.permute.xlu1 %958  ;;  %v957_v62 = vpop.permute.xlu0 %956  ;;  %814 = vmatprep.mubr.bf16.mxu0 %v9824_v0 }
  0xad   : > { %8899 = vmatprep.subr.msk.bf16.mxu0 %vm346_vm1, %v10188_v60  ;;  %v975_v22 = vsel %vm974_vm4, %v957_v62, %v959_v61 }
  0xae   : > { %2334 = vrot.lane.b32.xlu1 %v9940_v13, %s9833_s19  ;;  %2332 = vrot.lane.b32.xlu0 %v9942_v14, %s9833_s19  ;;  %v987_v27 = vsel %vm346_vm1, %v975_v22, 0 }
  0xaf   : > { %8893 = vmatmul.mubr.msk.bf16.vlgmr.msra.gmra.mrb[12].mxu1 %vm342_vm2, %v303_v48 }
  0xb0   : > { %824 = vmatpush1.bf16.msra.mxu1 %v765_v63  ;;  %v963_v3 = vpop.permute.xlu1 %962  ;;  %v961_v6 = vpop.permute.xlu0 %960  ;;  %855 = vmatprep.mubr.bf16.mxu1 %v9824_v0 }
  0xb1   : > { %8901 = vmatprep.subr.msk.bf16.mxu1 %vm346_vm1, %v10205_v2  ;;  %v10218_v8 = vsel %vm974_vm4, %v959_v61, %v961_v6  ;;  %v10253_v28 = vsel %vm974_vm4, %v961_v6, %v963_v3 }
  0xb2   : > { %2338 = vrot.lane.b32.xlu1 %v9949_v16, %s9833_s19  ;;  %2336 = vrot.lane.b32.xlu0 %v9951_v17, %s9833_s19  ;;  %v993_v36 = vsel %vm346_vm1, %v10253_v28, 0 }
  0xb3   : > { %8896 = vmatmul.mubr.msk.bf16.vlgmr.msra.gmra.mrb[16].mxu0 %vm342_vm2, %v8894_v7 }
  0xb4   : > { %865 = vmatpush1.bf16.msra.mxu0 %v771_v11  ;;  %v967_v15 = vpop.permute.xlu1 %966  ;;  %v965_v19 = vpop.permute.xlu0 %964  ;;  %896 = vmatprep.mubr.bf16.mxu0 %v9824_v0 }
  0xb5   : > { %8904 = vmatprep.subr.msk.bf16.mxu0 %vm346_vm1, %v10218_v8  ;;  %v10234_v20 = vsel %vm974_vm4, %v963_v3, %v965_v19  ;;  %v10272_v38 = vsel %vm974_vm4, %v965_v19, %v967_v15  ;;  %v8912_v19 = vld [vmem:[%s11986_s1 + $0x10] sm:$0xf] }
  0xb6   : > { %2552 = vrot.lane.b32.xlu1 %v9921_v5, %s9834_s22  ;;  %2340 = vrot.lane.b32.xlu0 %v9957_v18, %s9833_s19  ;;  %v999_v45 = vsel %vm346_vm1, %v10272_v38, 0 }
  0xb7   : > { %8898 = vmatmul.mubr.msk.bf16.vlgmr.msra.gmra.mrb[16].mxu1 %vm342_vm2, %v8894_v7 }
  0xb8   : > { %906 = vmatpush1.bf16.msra.mxu1 %v777_v21  ;;  %v971_v24 = vpop.permute.xlu1 %970  ;;  %v969_v25 = vpop.permute.xlu0 %968  ;;  %937 = vmatprep.mubr.bf16.mxu1 %v9824_v0 }
  0xb9   : > { %8906 = vmatprep.subr.msk.bf16.mxu1 %vm346_vm1, %v10234_v20  ;;  %v10248_v26 = vsel %vm974_vm4, %v967_v15, %v969_v25  ;;  %v10291_v46 = vsel %vm974_vm4, %v969_v25, %v971_v24 }
  0xba   : > { %2556 = vrot.lane.b32.xlu1 %v9919_v4, %s9834_s22  ;;  %2554 = vrot.lane.b32.xlu0 %v9932_v10, %s9834_s22  ;;  %v1005_v51 = vsel %vm346_vm1, %v10291_v46, 0 }
  0xbb   : > { %8900 = vmatmul.mubr.msk.bf16.vlgmr.msra.gmra.mrb[20].mxu0 %vm342_vm2, %v8894_v7 }
  0xbc   : > { %1011 = vmatpush1.bf16.msra.mxu0 %v987_v27  ;;  %v1185_v31 = vpop.permute.xlu1 %1184  ;;  %v10255_v33 = vpop.permute.xlu0 %972  ;;  %1042 = vmatprep.mubr.bf16.mxu0 %v9824_v0 }
  0xbd   : > { %8908 = vmatprep.subr.msk.bf16.mxu0 %vm346_vm1, %v10248_v26  ;;  %v10266_v34 = vsel %vm974_vm4, %v971_v24, %v10255_v33 }
  0xbe   : > { %2560 = vrot.lane.b32.xlu1 %v9942_v14, %s9834_s22  ;;  %2558 = vrot.lane.b32.xlu0 %v9930_v9, %s9834_s22 }
  0xbf   : > { %8902 = vmatmul.mubr.msk.bf16.vlgmr.msra.gmra.mrb[20].mxu1 %vm342_vm2, %v8894_v7 }
  0xc0   : > { %1052 = vmatpush1.bf16.msra.mxu1 %v993_v36  ;;  %v1189_v41 = vpop.permute.xlu1 %1188  ;;  %v1187_v42 = vpop.permute.xlu0 %1186  ;;  %1083 = vmatprep.mubr.bf16.mxu1 %v9824_v0 }
  0xc1   : > { %8910 = vmatprep.subr.msk.bf16.mxu1 %vm346_vm1, %v10266_v34  ;;  %v10285_v44 = vsel %vm1202_vm5, %v1187_v42, %v1189_v41  ;;  %v1203_v52 = vsel %vm1202_vm5, %v1185_v31, %v1187_v42 }
  0xc2   : > { %2564 = vrot.lane.b32.xlu1 %v9951_v17, %s9834_s22  ;;  %2562 = vrot.lane.b32.xlu0 %v9940_v13, %s9834_s22  ;;  %v1215_v58 = vsel %vm346_vm1, %v1203_v52, 0 }
  0xc3   : > { %8905 = vmatmul.mubr.msk.bf16.vlgmr.msra.gmra.mrb[24].mxu0 %vm342_vm2, %v8903_v43 }
  0xc4   : > { %1093 = vmatpush1.bf16.msra.mxu0 %v999_v45  ;;  %v1193_v47 = vpop.permute.xlu1 %1192  ;;  %v1191_v48 = vpop.permute.xlu0 %1190  ;;  %1124 = vmatprep.mubr.bf16.mxu0 %v9824_v0 }
  0xc5   : > { %8913 = vmatprep.subr.msk.bf16.mxu0 %vm346_vm1, %v10285_v44  ;;  %v10301_v49 = vsel %vm1202_vm5, %v1191_v48, %v1193_v47  ;;  %v10320_v61 = vsel %vm1202_vm5, %v1189_v41, %v1191_v48 }
  0xc6   : > { %2568 = vrot.lane.b32.xlu1 %v9957_v18, %s9834_s22  ;;  %2566 = vrot.lane.b32.xlu0 %v9949_v16, %s9834_s22  ;;  %v1221_v6 = vsel %vm346_vm1, %v10320_v61, 0 }
  0xc7   : > { %8907 = vmatmul.mubr.msk.bf16.vlgmr.msra.gmra.mrb[24].mxu1 %vm342_vm2, %v8903_v43 }
  0xc8   : > { %1134 = vmatpush1.bf16.msra.mxu1 %v1005_v51  ;;  %v1197_v53 = vpop.permute.xlu1 %1196  ;;  %v1195_v54 = vpop.permute.xlu0 %1194  ;;  %1165 = vmatprep.mubr.bf16.mxu1 %v9824_v0 }
  0xc9   : > { %8915 = vmatprep.subr.msk.bf16.mxu1 %vm346_vm1, %v10301_v49  ;;  %v10315_v57 = vsel %vm1202_vm5, %v1195_v54, %v1197_v53  ;;  %v10339_v7 = vsel %vm1202_vm5, %v1193_v47, %v1195_v54 }
  0xca   : > { %2782 = vrot.lane.b32.xlu1 %v9932_v10, %s9835_s27  ;;  %2780 = vrot.lane.b32.xlu0 %v9921_v5, %s9835_s27  ;;  %12003 = vst [vmem:[#allocation2_spill] sm:$0xff] %v10315_v57  ;;  %v1227_v21 = vsel %vm346_vm1, %v10339_v7, 0 }
  0xcb   : > { %8909 = vmatmul.mubr.msk.bf16.vlgmr.msra.gmra.mrb[28].mxu0 %vm342_vm2, %v8903_v43 }
  0xcc   : > { %1239 = vmatpush1.bf16.msra.mxu0 %v1215_v58  ;;  %v10322_v62 = vpop.permute.xlu1 %1200  ;;  %v1199_v63 = vpop.permute.xlu0 %1198  ;;  %1270 = vmatprep.mubr.bf16.mxu0 %v9824_v0 }
  0xcd   : > { %8917 = vmatprep.subr.msk.bf16.mxu0 %vm346_vm1, %v10315_v57  ;;  %v10333_v3 = vsel %vm1202_vm5, %v1199_v63, %v10322_v62  ;;  %v10355_v22 = vsel %vm1202_vm5, %v1197_v53, %v1199_v63 }
  0xce   : > { %2786 = vrot.lane.b32.xlu1 %v9930_v9, %s9835_s27  ;;  %2784 = vrot.lane.b32.xlu0 %v9919_v4, %s9835_s27  ;;  %12004 = vst [vmem:[#allocation3_spill] sm:$0xff] %v10333_v3  ;;  %v1233_v31 = vsel %vm346_vm1, %v10355_v22, 0 }
  0xcf   : > { %8911 = vmatmul.mubr.msk.bf16.vlgmr.msra.gmra.mrb[28].mxu1 %vm342_vm2, %v8903_v43 }
  0xd0   : > { %1280 = vmatpush1.bf16.msra.mxu1 %v1221_v6  ;;  %v1415_v11 = vpop.permute.xlu1 %1414  ;;  %v1413_v15 = vpop.permute.xlu0 %1412  ;;  %1311 = vmatprep.mubr.bf16.mxu1 %v9824_v0  ;;  %v8921_v6 = vld [vmem:[%s11986_s1 + $0x14] sm:$0xf] }
  0xd1   : > { %8919 = vmatprep.subr.msk.bf16.mxu1 %vm346_vm1, %v10333_v3  ;;  %v1431_v36 = vsel %vm1430_vm6, %v1413_v15, %v1415_v11 }
  0xd2   : > { %2790 = vrot.lane.b32.xlu1 %v9940_v13, %s9835_s27  ;;  %2788 = vrot.lane.b32.xlu0 %v9942_v14, %s9835_s27  ;;  %v1443_v45 = vsel %vm346_vm1, %v1431_v36, 0 }
  0xd3   : > { %8914 = vmatmul.mubr.msk.bf16.vlgmr.msra.gmra.mrb[32].mxu0 %vm342_vm2, %v8912_v19 }
  0xd4   : > { %1321 = vmatpush1.bf16.msra.mxu0 %v1227_v21  ;;  %v1419_v24 = vpop.permute.xlu1 %1418  ;;  %v1417_v25 = vpop.permute.xlu0 %1416  ;;  %1352 = vmatprep.mubr.bf16.mxu0 %v9824_v0 }
  0xd5   : > { %v1432_v27 = vsel %vm1430_vm6, %v1415_v11, %v1417_v25  ;;  %v1433_v47 = vsel %vm1430_vm6, %v1417_v25, %v1419_v24 }
  0xd6   : > { %2794 = vrot.lane.b32.xlu1 %v9949_v16, %s9835_s27  ;;  %2792 = vrot.lane.b32.xlu0 %v9951_v17, %s9835_s27  ;;  %v1449_v53 = vsel %vm346_vm1, %v1433_v47, 0 }
  0xd7   : > { %8916 = vmatmul.mubr.msk.bf16.vlgmr.msra.gmra.mrb[32].mxu1 %vm342_vm2, %v8912_v19  ;;  %8922 = vmatprep.subr.msk.bf16.mxu0 %vm346_vm1, %v1432_v27 }
  0xd8   : > { %1362 = vmatpush1.bf16.msra.mxu1 %v1233_v31  ;;  %v1423_v41 = vpop.permute.xlu1 %1422  ;;  %v1421_v42 = vpop.permute.xlu0 %1420  ;;  %1393 = vmatprep.mubr.bf16.mxu1 %v9824_v0 }
  0xd9   : > { %v1434_v43 = vsel %vm1430_vm6, %v1419_v24, %v1421_v42  ;;  %v1435_v54 = vsel %vm1430_vm6, %v1421_v42, %v1423_v41 }
  0xda   : > { %3008 = vrot.lane.b32.xlu1 %v9921_v5, %s12001_s15  ;;  %2796 = vrot.lane.b32.xlu0 %v9957_v18, %s9835_s27  ;;  %v1455_v15 = vsel %vm346_vm1, %v1435_v54, 0 }
  0xdb   : > { %8918 = vmatmul.mubr.msk.bf16.vlgmr.msra.gmra.mrb[36].mxu0 %vm342_vm2, %v8912_v19  ;;  %8924 = vmatprep.subr.msk.bf16.mxu1 %vm346_vm1, %v1434_v43 }
  0xdc   : > { %1467 = vmatpush1.bf16.msra.mxu0 %v1443_v45  ;;  %v1427_v48 = vpop.permute.xlu1 %1426  ;;  %v1425_v51 = vpop.permute.xlu0 %1424  ;;  %1498 = vmatprep.mubr.bf16.mxu0 %v9824_v0 }
  0xdd   : > { %v1436_v52 = vsel %vm1430_vm6, %v1423_v41, %v1425_v51 }
  0xde   : > { %3012 = vrot.lane.b32.xlu1 %v9919_v4, %s12001_s15  ;;  %3010 = vrot.lane.b32.xlu0 %v9932_v10, %s12001_s15 }
  0xdf   : > { %8920 = vmatmul.mubr.msk.bf16.vlgmr.msra.gmra.mrb[36].mxu1 %vm342_vm2, %v8912_v19  ;;  %8926 = vmatprep.subr.msk.bf16.mxu0 %vm346_vm1, %v1436_v52  ;;  %v1437_v19 = vsel %vm1430_vm6, %v1425_v51, %v1427_v48 }
  0xe0   : > { %1508 = vmatpush1.bf16.msra.mxu1 %v1449_v53  ;;  %v1641_v58 = vpop.permute.xlu1 %1640  ;;  %v1429_v63 = vpop.permute.xlu0 %1428  ;;  %1539 = vmatprep.mubr.bf16.mxu1 %v9824_v0  ;;  %v1461_v27 = vsel %vm346_vm1, %v1437_v19, 0 }
  0xe1   : > { %v1438_v11 = vsel %vm1430_vm6, %v1427_v48, %v1429_v63  ;;  %v8930_v63 = vld [vmem:[%s11986_s1 + $0x18] sm:$0xf] }
  0xe2   : > { %3016 = vrot.lane.b32.xlu1 %v9942_v14, %s12001_s15  ;;  %3014 = vrot.lane.b32.xlu0 %v9930_v9, %s12001_s15 }
  0xe3   : > { %8923 = vmatmul.mubr.msk.bf16.vlgmr.msra.gmra.mrb[40].mxu0 %vm342_vm2, %v8921_v6  ;;  %8928 = vmatprep.subr.msk.bf16.mxu1 %vm346_vm1, %v1438_v11 }
  0xe4   : > { %1549 = vmatpush1.bf16.msra.mxu0 %v1455_v15  ;;  %v1645_v21 = vpop.permute.xlu1 %1644  ;;  %v1643_v24 = vpop.permute.xlu0 %1642  ;;  %1580 = vmatprep.mubr.bf16.mxu0 %v9824_v0 }
  0xe5   : > { %v1660_v25 = vsel %vm1658_vm7, %v1643_v24, %v1645_v21  ;;  %v1659_v31 = vsel %vm1658_vm7, %v1641_v58, %v1643_v24 }
  0xe6   : > { %3020 = vrot.lane.b32.xlu1 %v9951_v17, %s12001_s15  ;;  %3018 = vrot.lane.b32.xlu0 %v9940_v13, %s12001_s15  ;;  %v1671_v43 = vsel %vm346_vm1, %v1659_v31, 0 }
  0xe7   : > { %8925 = vmatmul.mubr.msk.bf16.vlgmr.msra.gmra.mrb[40].mxu1 %vm342_vm2, %v8921_v6  ;;  %8931 = vmatprep.subr.msk.bf16.mxu0 %vm346_vm1, %v1660_v25 }
  0xe8   : > { %1590 = vmatpush1.bf16.msra.mxu1 %v1461_v27  ;;  %v1649_v36 = vpop.permute.xlu1 %1648  ;;  %v1647_v41 = vpop.permute.xlu0 %1646  ;;  %1621 = vmatprep.mubr.bf16.mxu1 %v9824_v0 }
  0xe9   : > { %v1662_v42 = vsel %vm1658_vm7, %v1647_v41, %v1649_v36  ;;  %v1661_v45 = vsel %vm1658_vm7, %v1645_v21, %v1647_v41 }
  0xea   : > { %3024 = vrot.lane.b32.xlu1 %v9957_v18, %s12001_s15  ;;  %3022 = vrot.lane.b32.xlu0 %v9949_v16, %s12001_s15  ;;  %v1677_v52 = vsel %vm346_vm1, %v1661_v45, 0  ;;  %s12007_s15 = smov 62  }
  0xeb   : > { %8927 = vmatmul.mubr.msk.bf16.vlgmr.msra.gmra.mrb[44].mxu0 %vm342_vm2, %v8921_v6  ;;  %8933 = vmatprep.subr.msk.bf16.mxu1 %vm346_vm1, %v1662_v42 }
  0xec   : > { %1695 = vmatpush1.bf16.msra.mxu0 %v1671_v43  ;;  %v1653_v47 = vpop.permute.xlu1 %1652  ;;  %v1651_v48 = vpop.permute.xlu0 %1650  ;;  %1726 = vmatprep.mubr.bf16.mxu0 %v9824_v0 }
  0xed   : > { %v1664_v51 = vsel %vm1658_vm7, %v1651_v48, %v1653_v47  ;;  %v1663_v53 = vsel %vm1658_vm7, %v1649_v36, %v1651_v48 }
  0xee   : > { %3238 = vrot.lane.b32.xlu1 %v9932_v10, %s11999_s20  ;;  %3236 = vrot.lane.b32.xlu0 %v9921_v5, %s11999_s20 }
  0xef   : > { %8929 = vmatmul.mubr.msk.bf16.vlgmr.msra.gmra.mrb[44].mxu1 %vm342_vm2, %v8921_v6  ;;  %8935 = vmatprep.subr.msk.bf16.mxu0 %vm346_vm1, %v1664_v51  ;;  %v1683_v6 = vsel %vm346_vm1, %v1663_v53, 0 }
  0xf0   : > { %1736 = vmatpush1.bf16.msra.mxu1 %v1677_v52  ;;  %v1657_v54 = vpop.permute.xlu1 %1656  ;;  %v1655_v58 = vpop.permute.xlu0 %1654  ;;  %1767 = vmatprep.mubr.bf16.mxu1 %v9824_v0 }
  0xf1   : > { %v1666_v11 = vsel %vm1658_vm7, %v1655_v58, %v1657_v54  ;;  %v1665_v15 = vsel %vm1658_vm7, %v1653_v47, %v1655_v58  ;;  %v8939_v54 = vld [vmem:[%s11986_s1 + $0x1c] sm:$0xf] }
  0xf2   : > { %3242 = vrot.lane.b32.xlu1 %v9930_v9, %s11999_s20  ;;  %3240 = vrot.lane.b32.xlu0 %v9919_v4, %s11999_s20  ;;  %v1689_v24 = vsel %vm346_vm1, %v1665_v15, 0 }
  0xf3   : > { %8932 = vmatmul.mubr.msk.bf16.vlgmr.msra.gmra.mrb[48].mxu0 %vm342_vm2, %v8930_v63  ;;  %8937 = vmatprep.subr.msk.bf16.mxu1 %vm346_vm1, %v1666_v11 }
  0xf4   : > { %1777 = vmatpush1.bf16.msra.mxu0 %v1683_v6  ;;  %v1871_v19 = vpop.permute.xlu1 %1870  ;;  %v1869_v21 = vpop.permute.xlu0 %1868  ;;  %1808 = vmatprep.mubr.bf16.mxu0 %v9824_v0 }
  0xf5   : > { %v1887_v25 = vsel %vm1886_vm8, %v1869_v21, %v1871_v19 }
  0xf6   : > { %3246 = vrot.lane.b32.xlu1 %v9940_v13, %s11999_s20  ;;  %3244 = vrot.lane.b32.xlu0 %v9942_v14, %s11999_s20  ;;  %v1899_v41 = vsel %vm346_vm1, %v1887_v25, 0 }
  0xf7   : > { %8934 = vmatmul.mubr.msk.bf16.vlgmr.msra.gmra.mrb[48].mxu1 %vm342_vm2, %v8930_v63 }
  0xf8   : > { %1818 = vmatpush1.bf16.msra.mxu1 %v1689_v24  ;;  %v1875_v27 = vpop.permute.xlu1 %1874  ;;  %v1873_v31 = vpop.permute.xlu0 %1872  ;;  %1849 = vmatprep.mubr.bf16.mxu1 %v9824_v0 }
  0xf9   : > { %v1888_v36 = vsel %vm1886_vm8, %v1871_v19, %v1873_v31  ;;  %v1889_v42 = vsel %vm1886_vm8, %v1873_v31, %v1875_v27 }
  0xfa   : > { %3250 = vrot.lane.b32.xlu1 %v9949_v16, %s11999_s20  ;;  %3248 = vrot.lane.b32.xlu0 %v9951_v17, %s11999_s20  ;;  %v1905_v48 = vsel %vm346_vm1, %v1889_v42, 0 }
  0xfb   : > { %8936 = vmatmul.mubr.msk.bf16.vlgmr.msra.gmra.mrb[52].mxu0 %vm342_vm2, %v8930_v63  ;;  %8940 = vmatprep.subr.msk.bf16.mxu0 %vm346_vm1, %v1888_v36 }
  0xfc   : > { %1923 = vmatpush1.bf16.msra.mxu0 %v1899_v41  ;;  %v1879_v43 = vpop.permute.xlu1 %1878  ;;  %v1877_v45 = vpop.permute.xlu0 %1876  ;;  %1954 = vmatprep.mubr.bf16.mxu0 %v9824_v0 }
  0xfd   : > { %v1890_v47 = vsel %vm1886_vm8, %v1875_v27, %v1877_v45  ;;  %v1891_v51 = vsel %vm1886_vm8, %v1877_v45, %v1879_v43 }
  0xfe   : > { %3464 = vrot.lane.b32.xlu1 %v9921_v5, %s11997_s26  ;;  %3252 = vrot.lane.b32.xlu0 %v9957_v18, %s11999_s20  ;;  %s12008_s20 = smov 61  }
  0xff   : > { %8938 = vmatmul.mubr.msk.bf16.vlgmr.msra.gmra.mrb[52].mxu1 %vm342_vm2, %v8930_v63  ;;  %8942 = vmatprep.subr.msk.bf16.mxu1 %vm346_vm1, %v1890_v47  ;;  %v1911_v63 = vsel %vm346_vm1, %v1891_v51, 0 }
 0x100   : > { %1964 = vmatpush1.bf16.msra.mxu1 %v1905_v48  ;;  %v1883_v52 = vpop.permute.xlu1 %1882  ;;  %v1881_v53 = vpop.permute.xlu0 %1880  ;;  %1995 = vmatprep.mubr.bf16.mxu1 %v9824_v0 }
 0x101   : > { %v1892_v58 = vsel %vm1886_vm8, %v1879_v43, %v1881_v53  ;;  %v1893_v11 = vsel %vm1886_vm8, %v1881_v53, %v1883_v52 }
 0x102   : > { %3468 = vrot.lane.b32.xlu1 %v9919_v4, %s11997_s26  ;;  %3466 = vrot.lane.b32.xlu0 %v9932_v10, %s11997_s26  ;;  %v1917_v21 = vsel %vm346_vm1, %v1893_v11, 0 }
 0x103   : > { %8941 = vmatmul.mubr.msk.bf16.vlgmr.msra.gmra.mrb[56].mxu0 %vm342_vm2, %v8939_v54  ;;  %8944 = vmatprep.subr.msk.bf16.mxu0 %vm346_vm1, %v1892_v58 }
 0x104   : > { %2005 = vmatpush1.bf16.msra.mxu0 %v1911_v63  ;;  %v2097_v6 = vpop.permute.xlu1 %2096  ;;  %v1885_v15 = vpop.permute.xlu0 %1884  ;;  %2036 = vmatprep.mubr.bf16.mxu0 %v9824_v0 }
 0x105   : > { %v1894_v19 = vsel %vm1886_vm8, %v1883_v52, %v1885_v15  ;;  %v8948_v52 = vld [vmem:[%s11986_s1 + $0x20] sm:$0xf] }
 0x106   : > { %3472 = vrot.lane.b32.xlu1 %v9942_v14, %s11997_s26  ;;  %3470 = vrot.lane.b32.xlu0 %v9930_v9, %s11997_s26 }
 0x107   : > { %8943 = vmatmul.mubr.msk.bf16.vlgmr.msra.gmra.mrb[56].mxu1 %vm342_vm2, %v8939_v54  ;;  %8946 = vmatprep.subr.msk.bf16.mxu1 %vm346_vm1, %v1894_v19 }
 0x108   : > { %2046 = vmatpush1.bf16.msra.mxu1 %v1917_v21  ;;  %v2101_v24 = vpop.permute.xlu1 %2100  ;;  %v2099_v25 = vpop.permute.xlu0 %2098  ;;  %2077 = vmatprep.mubr.bf16.mxu1 %v9824_v0 }
 0x109   : > { %v2115_v27 = vsel %vm2114_vm9, %v2097_v6, %v2099_v25  ;;  %v2116_v31 = vsel %vm2114_vm9, %v2099_v25, %v2101_v24 }
 0x10a   : > { %3476 = vrot.lane.b32.xlu1 %v9951_v17, %s11997_s26  ;;  %3474 = vrot.lane.b32.xlu0 %v9940_v13, %s11997_s26  ;;  %v2127_v36 = vsel %vm346_vm1, %v2115_v27, 0 }
 0x10b   : > { %8945 = vmatmul.mubr.msk.bf16.vlgmr.msra.gmra.mrb[60].mxu0 %vm342_vm2, %v8939_v54  ;;  %8949 = vmatprep.subr.msk.bf16.mxu0 %vm346_vm1, %v2116_v31 }
 0x10c   : > { %2151 = vmatpush1.bf16.msra.mxu0 %v2127_v36  ;;  %v2105_v41 = vpop.permute.xlu1 %2104  ;;  %v2103_v42 = vpop.permute.xlu0 %2102  ;;  %2182 = vmatprep.mubr.bf16.mxu0 %v9824_v0 }
 0x10d   : > { %v2117_v43 = vsel %vm2114_vm9, %v2101_v24, %v2103_v42  ;;  %v2118_v45 = vsel %vm2114_vm9, %v2103_v42, %v2105_v41 }
 0x10e   : > { %3480 = vrot.lane.b32.xlu1 %v9957_v18, %s11997_s26  ;;  %3478 = vrot.lane.b32.xlu0 %v9949_v16, %s11997_s26  ;;  %v2133_v47 = vsel %vm346_vm1, %v2117_v43, 0  ;;  %s9845_s26 = smov 112  }
 0x10f   : > { %8947 = vmatmul.mubr.msk.bf16.vlgmr.msra.gmra.mrb[60].mxu1 %vm342_vm2, %v8939_v54  ;;  %8951 = vmatprep.subr.msk.bf16.mxu1 %vm346_vm1, %v2118_v45 }
 0x110   : > { %2192 = vmatpush1.bf16.msra.mxu1 %v2133_v47  ;;  %v2109_v48 = vpop.permute.xlu1 %2108  ;;  %v2107_v51 = vpop.permute.xlu0 %2106  ;;  %2223 = vmatprep.mubr.bf16.mxu1 %v9824_v0  ;;  %v8957_v47 = vld [vmem:[%s11986_s1 + $0x24] sm:$0xf] }
 0x111   : > { %v2119_v53 = vsel %vm2114_vm9, %v2105_v41, %v2107_v51  ;;  %v2120_v58 = vsel %vm2114_vm9, %v2107_v51, %v2109_v48 }
 0x112   : > { %3694 = vrot.lane.b32.xlu1 %v9932_v10, %s9839_s21  ;;  %3692 = vrot.lane.b32.xlu0 %v9921_v5, %s9839_s21  ;;  %v2139_v54 = vsel %vm346_vm1, %v2119_v53, 0 }
 0x113   : > { %8950 = vmatmul.mubr.msk.bf16.vlgmr.msra.gmra.mrb[64].mxu0 %vm342_vm2, %v8948_v52  ;;  %8953 = vmatprep.subr.msk.bf16.mxu0 %vm346_vm1, %v2120_v58 }
 0x114   : > { %2233 = vmatpush1.bf16.msra.mxu0 %v2139_v54  ;;  %v2113_v63 = vpop.permute.xlu1 %2112  ;;  %v2111_v11 = vpop.permute.xlu0 %2110  ;;  %2264 = vmatprep.mubr.bf16.mxu0 %v9824_v0 }
 0x115   : > { %v2121_v6 = vsel %vm2114_vm9, %v2109_v48, %v2111_v11  ;;  %v2122_v15 = vsel %vm2114_vm9, %v2111_v11, %v2113_v63 }
 0x116   : > { %3698 = vrot.lane.b32.xlu1 %v9930_v9, %s9839_s21  ;;  %3696 = vrot.lane.b32.xlu0 %v9919_v4, %s9839_s21  ;;  %v2145_v19 = vsel %vm346_vm1, %v2121_v6, 0 }
 0x117   : > { %8952 = vmatmul.mubr.msk.bf16.vlgmr.msra.gmra.mrb[64].mxu1 %vm342_vm2, %v8948_v52  ;;  %8955 = vmatprep.subr.msk.bf16.mxu1 %vm346_vm1, %v2122_v15 }
 0x118   : > { %2274 = vmatpush1.bf16.msra.mxu1 %v2145_v19  ;;  %v2327_v21 = vpop.permute.xlu1 %2326  ;;  %v2325_v24 = vpop.permute.xlu0 %2324  ;;  %2305 = vmatprep.mubr.bf16.mxu1 %v9824_v0 }
 0x119   : > { %v2343_v25 = vsel %vm2342_vm10, %v2325_v24, %v2327_v21 }
 0x11a   : > { %3702 = vrot.lane.b32.xlu1 %v9940_v13, %s9839_s21  ;;  %3700 = vrot.lane.b32.xlu0 %v9942_v14, %s9839_s21  ;;  %v2355_v41 = vsel %vm346_vm1, %v2343_v25, 0 }
 0x11b   : > { %8954 = vmatmul.mubr.msk.bf16.vlgmr.msra.gmra.mrb[68].mxu0 %vm342_vm2, %v8948_v52 }
 0x11c   : > { %v2331_v27 = vpop.permute.xlu1 %2330  ;;  %v2329_v31 = vpop.permute.xlu0 %2328  ;;  %2410 = vmatprep.mubr.bf16.mxu0 %v9824_v0 }
 0x11d   : > { %v2344_v36 = vsel %vm2342_vm10, %v2327_v21, %v2329_v31  ;;  %v2345_v42 = vsel %vm2342_vm10, %v2329_v31, %v2331_v27 }
 0x11e   : > { %3706 = vrot.lane.b32.xlu1 %v9949_v16, %s9839_s21  ;;  %3704 = vrot.lane.b32.xlu0 %v9951_v17, %s9839_s21  ;;  %v2361_v51 = vsel %vm346_vm1, %v2345_v42, 0 }
 0x11f   : > { %8956 = vmatmul.mubr.msk.bf16.vlgmr.msra.gmra.mrb[68].mxu1 %vm342_vm2, %v8948_v52  ;;  %8958 = vmatprep.subr.msk.bf16.mxu0 %vm346_vm1, %v2344_v36 }
 0x120   : > { %2379 = vmatpush1.bf16.msra.mxu0 %v2355_v41  ;;  %v2335_v43 = vpop.permute.xlu1 %2334  ;;  %v2333_v45 = vpop.permute.xlu0 %2332  ;;  %2451 = vmatprep.mubr.bf16.mxu1 %v9824_v0 }
 0x121   : > { %v2346_v48 = vsel %vm2342_vm10, %v2331_v27, %v2333_v45  ;;  %v2347_v52 = vsel %vm2342_vm10, %v2333_v45, %v2335_v43 }
 0x122   : > { %3920 = vrot.lane.b32.xlu1 %v9921_v5, %s9840_s14  ;;  %3708 = vrot.lane.b32.xlu0 %v9957_v18, %s9839_s21  ;;  %v2367_v63 = vsel %vm346_vm1, %v2347_v52, 0  ;;  %s9841_s21 = smov 30  }
 0x123   : > { %8959 = vmatmul.mubr.msk.bf16.vlgmr.msra.gmra.mrb[72].mxu0 %vm342_vm2, %v8957_v47  ;;  %8960 = vmatprep.subr.msk.bf16.mxu1 %vm346_vm1, %v2346_v48 }
 0x124   : > { %2420 = vmatpush1.bf16.msra.mxu1 %v2361_v51  ;;  %v2339_v53 = vpop.permute.xlu1 %2338  ;;  %v2337_v58 = vpop.permute.xlu0 %2336  ;;  %2492 = vmatprep.mubr.bf16.mxu0 %v9824_v0 }
 0x125   : > { %v2348_v54 = vsel %vm2342_vm10, %v2335_v43, %v2337_v58  ;;  %v2349_v11 = vsel %vm2342_vm10, %v2337_v58, %v2339_v53  ;;  %v8966_v43 = vld [vmem:[%s11986_s1 + $0x28] sm:$0xf] }
 0x126   : > { %3924 = vrot.lane.b32.xlu1 %v9919_v4, %s9840_s14  ;;  %3922 = vrot.lane.b32.xlu0 %v9932_v10, %s9840_s14  ;;  %v2373_v21 = vsel %vm346_vm1, %v2349_v11, 0 }
 0x127   : > { %8961 = vmatmul.mubr.msk.bf16.vlgmr.msra.gmra.mrb[72].mxu1 %vm342_vm2, %v8957_v47  ;;  %8962 = vmatprep.subr.msk.bf16.mxu0 %vm346_vm1, %v2348_v54 }
 0x128   : > { %2461 = vmatpush1.bf16.msra.mxu0 %v2367_v63  ;;  %v2553_v6 = vpop.permute.xlu1 %2552  ;;  %v2341_v15 = vpop.permute.xlu0 %2340  ;;  %2533 = vmatprep.mubr.bf16.mxu1 %v9824_v0 }
 0x129   : > { %v2350_v19 = vsel %vm2342_vm10, %v2339_v53, %v2341_v15 }
 0x12a   : > { %3928 = vrot.lane.b32.xlu1 %v9942_v14, %s9840_s14  ;;  %3926 = vrot.lane.b32.xlu0 %v9930_v9, %s9840_s14 }
 0x12b   : > { %8963 = vmatmul.mubr.msk.bf16.vlgmr.msra.gmra.mrb[76].mxu0 %vm342_vm2, %v8957_v47  ;;  %8964 = vmatprep.subr.msk.bf16.mxu1 %vm346_vm1, %v2350_v19 }
 0x12c   : > { %2502 = vmatpush1.bf16.msra.mxu1 %v2373_v21  ;;  %v2557_v24 = vpop.permute.xlu1 %2556  ;;  %v2555_v25 = vpop.permute.xlu0 %2554  ;;  %2638 = vmatprep.mubr.bf16.mxu0 %v9824_v0 }
 0x12d   : > { %v2571_v27 = vsel %vm2570_vm11, %v2553_v6, %v2555_v25  ;;  %v2572_v31 = vsel %vm2570_vm11, %v2555_v25, %v2557_v24 }
 0x12e   : > { %3932 = vrot.lane.b32.xlu1 %v9951_v17, %s9840_s14  ;;  %3930 = vrot.lane.b32.xlu0 %v9940_v13, %s9840_s14  ;;  %v2583_v36 = vsel %vm346_vm1, %v2571_v27, 0 }
 0x12f   : > { %8965 = vmatmul.mubr.msk.bf16.vlgmr.msra.gmra.mrb[76].mxu1 %vm342_vm2, %v8957_v47  ;;  %8967 = vmatprep.subr.msk.bf16.mxu0 %vm346_vm1, %v2572_v31 }
 0x130   : > { %2607 = vmatpush1.bf16.msra.mxu0 %v2583_v36  ;;  %v2561_v41 = vpop.permute.xlu1 %2560  ;;  %v2559_v42 = vpop.permute.xlu0 %2558  ;;  %2679 = vmatprep.mubr.bf16.mxu1 %v9824_v0 }
 0x131   : > { %v2573_v45 = vsel %vm2570_vm11, %v2557_v24, %v2559_v42  ;;  %v2574_v48 = vsel %vm2570_vm11, %v2559_v42, %v2561_v41 }
 0x132   : > { %3936 = vrot.lane.b32.xlu1 %v9957_v18, %s9840_s14  ;;  %3934 = vrot.lane.b32.xlu0 %v9949_v16, %s9840_s14  ;;  %v2589_v47 = vsel %vm346_vm1, %v2573_v45, 0  ;;  %s9842_s14 = smov 29  }
 0x133   : > { %8968 = vmatmul.mubr.msk.bf16.vlgmr.msra.gmra.mrb[80].mxu0 %vm342_vm2, %v8966_v43  ;;  %8969 = vmatprep.subr.msk.bf16.mxu1 %vm346_vm1, %v2574_v48  ;;  %v8975_v48 = vld [vmem:[%s11986_s1 + $0x2c] sm:$0xf] }
 0x134   : > { %2648 = vmatpush1.bf16.msra.mxu1 %v2589_v47  ;;  %v2565_v51 = vpop.permute.xlu1 %2564  ;;  %v2563_v52 = vpop.permute.xlu0 %2562  ;;  %2720 = vmatprep.mubr.bf16.mxu0 %v9824_v0 }
 0x135   : > { %v2575_v53 = vsel %vm2570_vm11, %v2561_v41, %v2563_v52  ;;  %v2576_v58 = vsel %vm2570_vm11, %v2563_v52, %v2565_v51 }
 0x136   : > { %4150 = vrot.lane.b32.xlu1 %v9932_v10, %s9841_s21  ;;  %4148 = vrot.lane.b32.xlu0 %v9921_v5, %s9841_s21  ;;  %v2595_v54 = vsel %vm346_vm1, %v2575_v53, 0 }
 0x137   : > { %8970 = vmatmul.mubr.msk.bf16.vlgmr.msra.gmra.mrb[80].mxu1 %vm342_vm2, %v8966_v43  ;;  %8971 = vmatprep.subr.msk.bf16.mxu0 %vm346_vm1, %v2576_v58 }
 0x138   : > { %2689 = vmatpush1.bf16.msra.mxu0 %v2595_v54  ;;  %v2569_v63 = vpop.permute.xlu1 %2568  ;;  %v2567_v11 = vpop.permute.xlu0 %2566  ;;  %2761 = vmatprep.mubr.bf16.mxu1 %v9824_v0 }
 0x139   : > { %v2577_v6 = vsel %vm2570_vm11, %v2565_v51, %v2567_v11  ;;  %v2578_v15 = vsel %vm2570_vm11, %v2567_v11, %v2569_v63 }
 0x13a   : > { %4154 = vrot.lane.b32.xlu1 %v9930_v9, %s9841_s21  ;;  %4152 = vrot.lane.b32.xlu0 %v9919_v4, %s9841_s21  ;;  %v2601_v19 = vsel %vm346_vm1, %v2577_v6, 0 }
 0x13b   : > { %8972 = vmatmul.mubr.msk.bf16.vlgmr.msra.gmra.mrb[84].mxu0 %vm342_vm2, %v8966_v43  ;;  %8973 = vmatprep.subr.msk.bf16.mxu1 %vm346_vm1, %v2578_v15 }
 0x13c   : > { %2730 = vmatpush1.bf16.msra.mxu1 %v2601_v19  ;;  %v2783_v21 = vpop.permute.xlu1 %2782  ;;  %v2781_v24 = vpop.permute.xlu0 %2780  ;;  %2866 = vmatprep.mubr.bf16.mxu0 %v9824_v0 }
 0x13d   : > { %v2799_v25 = vsel %vm2798_vm12, %v2781_v24, %v2783_v21 }
 0x13e   : > { %4158 = vrot.lane.b32.xlu1 %v9940_v13, %s9841_s21  ;;  %4156 = vrot.lane.b32.xlu0 %v9942_v14, %s9841_s21  ;;  %v2811_v41 = vsel %vm346_vm1, %v2799_v25, 0 }
 0x13f   : > { %8974 = vmatmul.mubr.msk.bf16.vlgmr.msra.gmra.mrb[84].mxu1 %vm342_vm2, %v8966_v43 }
 0x140   : > { %v2787_v27 = vpop.permute.xlu1 %2786  ;;  %v2785_v31 = vpop.permute.xlu0 %2784  ;;  %2907 = vmatprep.mubr.bf16.mxu1 %v9824_v0 }
 0x141   : > { %v2800_v36 = vsel %vm2798_vm12, %v2783_v21, %v2785_v31  ;;  %v2801_v42 = vsel %vm2798_vm12, %v2785_v31, %v2787_v27 }
 0x142   : > { %4162 = vrot.lane.b32.xlu1 %v9949_v16, %s9841_s21  ;;  %4160 = vrot.lane.b32.xlu0 %v9951_v17, %s9841_s21  ;;  %v2817_v51 = vsel %vm346_vm1, %v2801_v42, 0 }
 0x143   : > { %8976 = vmatprep.subr.msk.bf16.mxu0 %vm346_vm1, %v2800_v36 }
 0x144   : > { %2835 = vmatpush1.bf16.msra.mxu0 %v2811_v41  ;;  %v2791_v43 = vpop.permute.xlu1 %2790  ;;  %v2789_v45 = vpop.permute.xlu0 %2788 }
 0x145   : > { %v2802_v47 = vsel %vm2798_vm12, %v2787_v27, %v2789_v45  ;;  %v2803_v52 = vsel %vm2798_vm12, %v2789_v45, %v2791_v43 }
 0x146   : > { %4376 = vrot.lane.b32.xlu1 %v9921_v5, %s9842_s14  ;;  %4164 = vrot.lane.b32.xlu0 %v9957_v18, %s9841_s21  ;;  %v2823_v63 = vsel %vm346_vm1, %v2803_v52, 0  ;;  %s9843_s21 = smov 28  }
 0x147   : > { %8977 = vmatmul.mubr.msk.bf16.vlgmr.msra.gmra.mrb[88].mxu0 %vm342_vm2, %v8975_v48  ;;  %8978 = vmatprep.subr.msk.bf16.mxu1 %vm346_vm1, %v2802_v47 }
 0x148   : > { %2876 = vmatpush1.bf16.msra.mxu1 %v2817_v51  ;;  %v2795_v53 = vpop.permute.xlu1 %2794  ;;  %v2793_v58 = vpop.permute.xlu0 %2792  ;;  %2948 = vmatprep.mubr.bf16.mxu0 %v9824_v0 }
 0x149   : > { %v2804_v54 = vsel %vm2798_vm12, %v2791_v43, %v2793_v58  ;;  %v2805_v11 = vsel %vm2798_vm12, %v2793_v58, %v2795_v53  ;;  %v8984_v43 = vld [vmem:[%s11986_s1 + $0x30] sm:$0xf] }
 0x14a   : > { %4380 = vrot.lane.b32.xlu1 %v9919_v4, %s9842_s14  ;;  %4378 = vrot.lane.b32.xlu0 %v9932_v10, %s9842_s14  ;;  %v2829_v21 = vsel %vm346_vm1, %v2805_v11, 0 }
 0x14b   : > { %8979 = vmatmul.mubr.msk.bf16.vlgmr.msra.gmra.mrb[88].mxu1 %vm342_vm2, %v8975_v48  ;;  %8980 = vmatprep.subr.msk.bf16.mxu0 %vm346_vm1, %v2804_v54 }
 0x14c   : > { %2917 = vmatpush1.bf16.msra.mxu0 %v2823_v63  ;;  %v3009_v6 = vpop.permute.xlu1 %3008  ;;  %v2797_v15 = vpop.permute.xlu0 %2796  ;;  %2989 = vmatprep.mubr.bf16.mxu1 %v9824_v0 }
 0x14d   : > { %v2806_v19 = vsel %vm2798_vm12, %v2795_v53, %v2797_v15 }
 0x14e   : > { %4384 = vrot.lane.b32.xlu1 %v9942_v14, %s9842_s14  ;;  %4382 = vrot.lane.b32.xlu0 %v9930_v9, %s9842_s14 }
 0x14f   : > { %8981 = vmatmul.mubr.msk.bf16.vlgmr.msra.gmra.mrb[92].mxu0 %vm342_vm2, %v8975_v48  ;;  %8982 = vmatprep.subr.msk.bf16.mxu1 %vm346_vm1, %v2806_v19 }
 0x150   : > { %2958 = vmatpush1.bf16.msra.mxu1 %v2829_v21  ;;  %v3013_v24 = vpop.permute.xlu1 %3012  ;;  %v3011_v25 = vpop.permute.xlu0 %3010  ;;  %3094 = vmatprep.mubr.bf16.mxu0 %v9824_v0 }
 0x151   : > { %v3027_v27 = vsel %vm3026_vm13, %v3009_v6, %v3011_v25  ;;  %v3028_v31 = vsel %vm3026_vm13, %v3011_v25, %v3013_v24 }
 0x152   : > { %4388 = vrot.lane.b32.xlu1 %v9951_v17, %s9842_s14  ;;  %4386 = vrot.lane.b32.xlu0 %v9940_v13, %s9842_s14  ;;  %v3039_v36 = vsel %vm346_vm1, %v3027_v27, 0 }
 0x153   : > { %8983 = vmatmul.mubr.msk.bf16.vlgmr.msra.gmra.mrb[92].mxu1 %vm342_vm2, %v8975_v48  ;;  %8985 = vmatprep.subr.msk.bf16.mxu0 %vm346_vm1, %v3028_v31 }
 0x154   : > { %3063 = vmatpush1.bf16.msra.mxu0 %v3039_v36  ;;  %v3017_v41 = vpop.permute.xlu1 %3016  ;;  %v3015_v42 = vpop.permute.xlu0 %3014  ;;  %3135 = vmatprep.mubr.bf16.mxu1 %v9824_v0 }
 0x155   : > { %v3029_v45 = vsel %vm3026_vm13, %v3013_v24, %v3015_v42  ;;  %v3030_v47 = vsel %vm3026_vm13, %v3015_v42, %v3017_v41  ;;  %v292_v24 = vld [vmem:[%s9910_s29 + $0x48] sm:$0xff] }
 0x156   : > { %4392 = vrot.lane.b32.xlu1 %v9957_v18, %s9842_s14  ;;  %4390 = vrot.lane.b32.xlu0 %v9949_v16, %s9842_s14  ;;  %v3045_v48 = vsel %vm346_vm1, %v3029_v45, 0 }
 0x157   : > { %8986 = vmatmul.mubr.msk.bf16.vlgmr.msra.gmra.mrb[96].mxu0 %vm342_vm2, %v8984_v43  ;;  %8987 = vmatprep.subr.msk.bf16.mxu1 %vm346_vm1, %v3030_v47 }
 0x158   : > { %3104 = vmatpush1.bf16.msra.mxu1 %v3045_v48  ;;  %v3021_v51 = vpop.permute.xlu1 %3020  ;;  %v3019_v52 = vpop.permute.xlu0 %3018  ;;  %3176 = vmatprep.mubr.bf16.mxu0 %v9824_v0 }
 0x159   : > { %v3031_v53 = vsel %vm3026_vm13, %v3017_v41, %v3019_v52  ;;  %v3032_v58 = vsel %vm3026_vm13, %v3019_v52, %v3021_v51  ;;  %v302_v41 = vpack.c.bf16 %v292_v24, %v292_v24  ;;  %v8993_v52 = vld [vmem:[%s11986_s1 + $0x34] sm:$0xf] }
 0x15a   : > { %4606 = vrot.lane.b32.xlu1 %v9932_v10, %s9843_s21  ;;  %4604 = vrot.lane.b32.xlu0 %v9921_v5, %s9843_s21  ;;  %v3051_v54 = vsel %vm346_vm1, %v3031_v53, 0 }
 0x15b   : > { %8988 = vmatmul.mubr.msk.bf16.vlgmr.msra.gmra.mrb[96].mxu1 %vm342_vm2, %v8984_v43  ;;  %8989 = vmatprep.subr.msk.bf16.mxu0 %vm346_vm1, %v3032_v58 }
 0x15c   : > { %3145 = vmatpush1.bf16.msra.mxu0 %v3051_v54  ;;  %v3025_v63 = vpop.permute.xlu1 %3024  ;;  %v3023_v11 = vpop.permute.xlu0 %3022  ;;  %3217 = vmatprep.mubr.bf16.mxu1 %v9824_v0 }
 0x15d   : > { %v3033_v6 = vsel %vm3026_vm13, %v3021_v51, %v3023_v11  ;;  %v3034_v15 = vsel %vm3026_vm13, %v3023_v11, %v3025_v63 }
 0x15e   : > { %4610 = vrot.lane.b32.xlu1 %v9930_v9, %s9843_s21  ;;  %4608 = vrot.lane.b32.xlu0 %v9919_v4, %s9843_s21  ;;  %v3057_v5 = vsel %vm346_vm1, %v3033_v6, 0 }
 0x15f   : > { %8990 = vmatmul.mubr.msk.bf16.vlgmr.msra.gmra.mrb[100].mxu0 %vm342_vm2, %v8984_v43  ;;  %8991 = vmatprep.subr.msk.bf16.mxu1 %vm346_vm1, %v3034_v15 }
 0x160   : > { %3186 = vmatpush1.bf16.msra.mxu1 %v3057_v5  ;;  %v3239_v19 = vpop.permute.xlu1 %3238  ;;  %v3237_v21 = vpop.permute.xlu0 %3236  ;;  %3322 = vmatprep.mubr.bf16.mxu0 %v9824_v0 }
 0x161   : > { %v3255_v25 = vsel %vm11993_vm14, %v3237_v21, %v3239_v19 }
 0x162   : > { %4614 = vrot.lane.b32.xlu1 %v9940_v13, %s9843_s21  ;;  %4612 = vrot.lane.b32.xlu0 %v9942_v14, %s9843_s21  ;;  %v3267_v45 = vsel %vm346_vm1, %v3255_v25, 0 }
 0x163   : > { %8992 = vmatmul.mubr.msk.bf16.vlgmr.msra.gmra.mrb[100].mxu1 %vm342_vm2, %v8984_v43 }
 0x164   : > { %v3243_v27 = vpop.permute.xlu1 %3242  ;;  %v3241_v31 = vpop.permute.xlu0 %3240  ;;  %3363 = vmatprep.mubr.bf16.mxu1 %v9824_v0 }
 0x165   : > { %v3256_v36 = vsel %vm11993_vm14, %v3239_v19, %v3241_v31  ;;  %v3257_v47 = vsel %vm11993_vm14, %v3241_v31, %v3243_v27 }
 0x166   : > { %4618 = vrot.lane.b32.xlu1 %v9949_v16, %s9843_s21  ;;  %4616 = vrot.lane.b32.xlu0 %v9951_v17, %s9843_s21  ;;  %v405_v42 = vpop.f32.mrb[0].mxu0  ;;  %v3273_v11 = vsel %vm346_vm1, %v3257_v47, 0 }
 0x167   : > { %8994 = vmatprep.subr.msk.bf16.mxu0 %vm346_vm1, %v3256_v36  ;;  %v10735_v43 = vpop.f32.mrb[1].mxu0 }
 0x168   : > { %3291 = vmatpush1.bf16.msra.mxu0 %v3267_v45  ;;  %v3247_v48 = vpop.permute.xlu1 %3246  ;;  %v3245_v51 = vpop.permute.xlu0 %3244 }
 0x169   : > { %v3258_v53 = vsel %vm11993_vm14, %v3243_v27, %v3245_v51  ;;  %v409_v58 = vpop.f32.mrb[2].mxu0  ;;  %v3259_v15 = vsel %vm11993_vm14, %v3245_v51, %v3247_v48 }
 0x16a   : > { %5013 = vrot.lane.b32.xlu1 %v302_v41, %s9825_s30  ;;  %4620 = vrot.lane.b32.xlu0 %v9957_v18, %s9843_s21  ;;  %v10745_v54 = vpop.f32.mrb[0].mxu1  ;;  %v410_v63 = vpop.f32.mrb[3].mxu0  ;;  %v3279_v36 = vsel %vm346_vm1, %v3259_v15, 0 }
 0x16b   : > { %8995 = vmatmul.mubr.msk.bf16.vlgmr.msra.gmra.mrb[104].mxu0 %vm342_vm2, %v8993_v52  ;;  %8996 = vmatprep.subr.msk.bf16.mxu1 %vm346_vm1, %v3258_v53  ;;  %v10750_v6 = vpop.f32.mrb[1].mxu1 }
 0x16c   : > { %3332 = vmatpush1.bf16.msra.mxu1 %v3273_v11  ;;  %v3251_v5 = vpop.permute.xlu1 %3250  ;;  %v3249_v19 = vpop.permute.xlu0 %3248  ;;  %3404 = vmatprep.mubr.bf16.mxu0 %v9824_v0 }
 0x16d   : > { %v3260_v21 = vsel %vm11993_vm14, %v3247_v48, %v3249_v19  ;;  %v450_v24 = vpop.f32.mrb[2].mxu1  ;;  %v3261_v31 = vsel %vm11993_vm14, %v3249_v19, %v3251_v5 }
 0x16e   : > { %5379 = vrot.lane.b32.xlu1 %v302_v41, %s9827_s9  ;;  %5196 = vrot.lane.b32.xlu0 %v302_v41, %s9826_s8  ;;  %v451_v25 = vpop.f32.mrb[3].mxu1  ;;  %v10757_v27 = vpop.f32.mrb[4].mxu0  ;;  %v3285_v58 = vsel %vm346_vm1, %v3261_v31, 0 }
 0x16f   : > { %8997 = vmatmul.mubr.msk.bf16.vlgmr.msra.gmra.mrb[104].mxu1 %vm342_vm2, %v8993_v52  ;;  %8998 = vmatprep.subr.msk.bf16.mxu0 %vm346_vm1, %v3260_v21  ;;  %v10763_v45 = vpop.f32.mrb[5].mxu0 }
 0x170   : > { %3373 = vmatpush1.bf16.msra.mxu0 %v3279_v36  ;;  %v3465_v47 = vpop.permute.xlu1 %3464  ;;  %v3253_v48 = vpop.permute.xlu0 %3252  ;;  %3445 = vmatprep.mubr.bf16.mxu1 %v9824_v0 }
 0x171   : > { %v3262_v51 = vsel %vm11993_vm14, %v3251_v5, %v3253_v48  ;;  %v491_v53 = vpop.f32.mrb[6].mxu0  ;;  %vm3710_vm14 = vcmask 261120  }
 0x172   : > { %5562 = vrot.lane.b32.xlu0 %v302_v41, %s9828_s10  ;;  %9000 = vmatprep.subr.msk.bf16.mxu1 %vm346_vm1, %v3262_v51  ;;  %v10770_v63 = vpop.f32.mrb[4].mxu1  ;;  %v492_v11 = vpop.f32.mrb[7].mxu0 }
 0x173   : > { %8999 = vmatmul.mubr.msk.bf16.vlgmr.msra.gmra.mrb[108].mxu0 %vm342_vm2, %v8993_v52  ;;  %3414 = vmatpush1.bf16.msra.mxu1 %v3285_v58  ;;  %v10773_v15 = vpop.f32.mrb[5].mxu1 }
 0x174   : > { %v3469_v19 = vpop.permute.xlu1 %3468  ;;  %v3467_v21 = vpop.permute.xlu0 %3466  ;;  %3550 = vmatprep.mubr.bf16.mxu0 %v9824_v0 }
 0x175   : > { %v3483_v5 = vsel %vm11996_vm15, %v3465_v47, %v3467_v21  ;;  %v3484_v41 = vsel %vm11996_vm15, %v3467_v21, %v3469_v19  ;;  %v532_v24 = vpop.f32.mrb[6].mxu1  ;;  %v9002_v47 = vld [vmem:[%s11986_s1 + $0x38] sm:$0xf] }
 0x176   : > { %9003 = vmatprep.subr.msk.bf16.mxu0 %vm346_vm1, %v3484_v41  ;;  %v3495_v25 = vsel %vm346_vm1, %v3483_v5, 0  ;;  %v533_v31 = vpop.f32.mrb[7].mxu1  ;;  %v596_v36 = vpop.f32.mrb[8].mxu0 }
 0x177   : > { %9001 = vmatmul.mubr.msk.bf16.vlgmr.msra.gmra.mrb[108].mxu1 %vm342_vm2, %v8993_v52  ;;  %3519 = vmatpush1.bf16.msra.mxu0 %v3495_v25  ;;  %v597_v48 = vadd.f32 %v596_v36, %v405_v42  ;;  %v598_v51 = vpop.f32.mrb[9].mxu0 }
 0x178   : > { %v3473_v53 = vpop.permute.xlu1 %3472  ;;  %v3471_v58 = vpop.permute.xlu0 %3470  ;;  %v599_v11 = vadd.f32 %v598_v51, %v10735_v43  ;;  %3591 = vmatprep.mubr.bf16.mxu1 %v9824_v0 }
 0x179   : > { %v3485_v21 = vsel %vm11996_vm15, %v3469_v19, %v3471_v58  ;;  %v3486_v5 = vsel %vm11996_vm15, %v3471_v58, %v3473_v53  ;;  %v600_v41 = vpop.f32.mrb[10].mxu0 }
 0x17a   : > { %9005 = vmatprep.subr.msk.bf16.mxu1 %vm346_vm1, %v3486_v5  ;;  %v3501_v42 = vsel %vm346_vm1, %v3485_v21, 0  ;;  %v637_v52 = vpop.f32.mrb[8].mxu1  ;;  %v601_v24 = vpop.f32.mrb[11].mxu0 }
 0x17b   : > { %9004 = vmatmul.mubr.msk.bf16.vlgmr.msra.gmra.mrb[112].mxu0 %vm342_vm2, %v9002_v47  ;;  %3560 = vmatpush1.bf16.msra.mxu1 %v3501_v42  ;;  %v638_v25 = vadd.f32 %v637_v52, %v10745_v54  ;;  %v639_v31 = vpop.f32.mrb[9].mxu1 }
 0x17c   : > { %v3477_v43 = vpop.permute.xlu1 %3476  ;;  %v3475_v36 = vpop.permute.xlu0 %3474  ;;  %v640_v51 = vadd.f32 %v639_v31, %v10750_v6  ;;  %3632 = vmatprep.mubr.bf16.mxu0 %v9824_v0 }
 0x17d   : > { %v3487_v19 = vsel %vm11996_vm15, %v3473_v53, %v3475_v36  ;;  %v3488_v58 = vsel %vm11996_vm15, %v3475_v36, %v3477_v43  ;;  %v641_v5 = vpop.f32.mrb[10].mxu1 }
 0x17e   : > { %9007 = vmatprep.subr.msk.bf16.mxu0 %vm346_vm1, %v3488_v58  ;;  %v3507_v21 = vsel %vm346_vm1, %v3487_v19, 0  ;;  %v678_v41 = vpop.f32.mrb[12].mxu0  ;;  %v642_v42 = vpop.f32.mrb[11].mxu1 }
 0x17f   : > { %9006 = vmatmul.mubr.msk.bf16.vlgmr.msra.gmra.mrb[112].mxu1 %vm342_vm2, %v9002_v47  ;;  %3601 = vmatpush1.bf16.msra.mxu0 %v3507_v21  ;;  %v679_v54 = vadd.f32 %v678_v41, %v10757_v27  ;;  %v680_v52 = vpop.f32.mrb[13].mxu0 }
 0x180   : > { %v3481_v6 = vpop.permute.xlu1 %3480  ;;  %v3479_v24 = vpop.permute.xlu0 %3478  ;;  %v681_v31 = vadd.f32 %v680_v52, %v10763_v45  ;;  %3673 = vmatprep.mubr.bf16.mxu1 %v9824_v0 }
 0x181   : > { %v3489_v53 = vsel %vm11996_vm15, %v3477_v43, %v3479_v24  ;;  %v3490_v36 = vsel %vm11996_vm15, %v3479_v24, %v3481_v6  ;;  %v682_v58 = vpop.f32.mrb[14].mxu0  ;;  %vm3938_vm15 = vcmask 252928  }
 0x182   : > { %9009 = vmatprep.subr.msk.bf16.mxu1 %vm346_vm1, %v3490_v36  ;;  %v3513_v19 = vsel %vm346_vm1, %v3489_v53, 0  ;;  %v719_v5 = vpop.f32.mrb[12].mxu1  ;;  %v683_v21 = vpop.f32.mrb[15].mxu0 }
 0x183   : > { %9008 = vmatmul.mubr.msk.bf16.vlgmr.msra.gmra.mrb[116].mxu0 %vm342_vm2, %v9002_v47  ;;  %3642 = vmatpush1.bf16.msra.mxu1 %v3513_v19  ;;  %v720_v27 = vadd.f32 %v719_v5, %v10770_v63  ;;  %v721_v41 = vpop.f32.mrb[13].mxu1 }
 0x184   : > { %v3695_v45 = vpop.permute.xlu1 %3694  ;;  %v3693_v42 = vpop.permute.xlu0 %3692  ;;  %v722_v43 = vadd.f32 %v721_v41, %v10773_v15  ;;  %3778 = vmatprep.mubr.bf16.mxu0 %v9824_v0 }
 0x185   : > { %v723_v52 = vpop.f32.mrb[14].mxu1  ;;  %v3711_v53 = vsel %vm3710_vm14, %v3693_v42, %v3695_v45 }
 0x186   : > { %v816_v6 = vpop.f32.mrb[16].mxu0  ;;  %v724_v24 = vpop.f32.mrb[15].mxu1  ;;  %v3723_v15 = vsel %vm346_vm1, %v3711_v53, 0 }
 0x187   : > { %v946_v36 = vadd.f32 %v816_v6, %v597_v48  ;;  %v818_v58 = vpop.f32.mrb[17].mxu0  ;;  %9010 = vmatmul.mubr.msk.bf16.vlgmr.msra.gmra.mrb[116].mxu1 %vm342_vm2, %v9002_v47  ;;  %v9011_v47 = vld [vmem:[%s11986_s1 + $0x3c] sm:$0xf] }
 0x188   : > { %v947_v19 = vadd.f32 %v818_v58, %v599_v11  ;;  %v3699_v21 = vpop.permute.xlu1 %3698  ;;  %v3697_v63 = vpop.permute.xlu0 %3696  ;;  %3819 = vmatprep.mubr.bf16.mxu1 %v9824_v0 }
 0x189   : > { %v3712_v5 = vsel %vm3710_vm14, %v3695_v45, %v3697_v63  ;;  %v820_v3 = vpop.f32.mrb[18].mxu0  ;;  %v3713_v42 = vsel %vm3710_vm14, %v3697_v63, %v3699_v21 }
 0x18a   : > { %v857_v41 = vpop.f32.mrb[16].mxu1  ;;  %9012 = vmatprep.subr.msk.bf16.mxu0 %vm346_vm1, %v3712_v5  ;;  %v821_v52 = vpop.f32.mrb[19].mxu0  ;;  %v3729_v63 = vsel %vm346_vm1, %v3713_v42, 0 }
 0x18b   : > { %v948_v48 = vadd.f32 %v857_v41, %v638_v25  ;;  %v859_v6 = vpop.f32.mrb[17].mxu1  ;;  %3747 = vmatpush1.bf16.msra.mxu0 %v3723_v15 }
 0x18c   : > { %v949_v11 = vadd.f32 %v859_v6, %v640_v51  ;;  %v3703_v24 = vpop.permute.xlu1 %3702  ;;  %v3701_v58 = vpop.permute.xlu0 %3700 }
 0x18d   : > { %v3714_v3 = vsel %vm3710_vm14, %v3699_v21, %v3701_v58  ;;  %v861_v45 = vpop.f32.mrb[18].mxu1  ;;  %v3715_v5 = vsel %vm3710_vm14, %v3701_v58, %v3703_v24 }
 0x18e   : > { %v898_v53 = vpop.f32.mrb[20].mxu0  ;;  %9013 = vmatmul.mubr.msk.bf16.vlgmr.msra.gmra.mrb[120].mxu0 %vm342_vm2, %v9011_v47  ;;  %9014 = vmatprep.subr.msk.bf16.mxu1 %vm346_vm1, %v3714_v3  ;;  %v862_v25 = vpop.f32.mrb[19].mxu1  ;;  %v3735_v42 = vsel %vm346_vm1, %v3715_v5, 0 }
 0x18f   : > { %v950_v15 = vadd.f32 %v898_v53, %v679_v54  ;;  %v900_v41 = vpop.f32.mrb[21].mxu0  ;;  %3788 = vmatpush1.bf16.msra.mxu1 %v3729_v63  ;;  %3860 = vmatprep.mubr.bf16.mxu0 %v9824_v0 }
 0x190   : > { %v951_v51 = vadd.f32 %v900_v41, %v681_v31  ;;  %v3707_v52 = vpop.permute.xlu1 %3706  ;;  %v3705_v6 = vpop.permute.xlu0 %3704 }
 0x191   : > { %v3716_v21 = vsel %vm3710_vm14, %v3703_v24, %v3705_v6  ;;  %v902_v45 = vpop.f32.mrb[22].mxu0  ;;  %v3717_v54 = vsel %vm3710_vm14, %v3705_v6, %v3707_v52 }
 0x192   : > { %v939_v57 = vpop.f32.mrb[20].mxu1  ;;  %9015 = vmatmul.mubr.msk.bf16.vlgmr.msra.gmra.mrb[120].mxu1 %vm342_vm2, %v9011_v47  ;;  %9016 = vmatprep.subr.msk.bf16.mxu0 %vm346_vm1, %v3716_v21  ;;  %v903_v3 = vpop.f32.mrb[23].mxu0  ;;  %v3741_v5 = vsel %vm346_vm1, %v3717_v54, 0 }
 0x193   : > { %v952_v58 = vadd.f32 %v939_v57, %v720_v27  ;;  %v941_v53 = vpop.f32.mrb[21].mxu1  ;;  %3829 = vmatpush1.bf16.msra.mxu0 %v3735_v42  ;;  %3901 = vmatprep.mubr.bf16.mxu1 %v9824_v0 }
 0x194   : > { %v953_v31 = vadd.f32 %v941_v53, %v722_v43  ;;  %v3921_v63 = vpop.permute.xlu1 %3920  ;;  %v3709_v25 = vpop.permute.xlu0 %3708 }
 0x195   : > { %v3718_v24 = vsel %vm3710_vm14, %v3707_v52, %v3709_v25  ;;  %v943_v41 = vpop.f32.mrb[22].mxu1  ;;  %vm4166_vm14 = vcmask 244736  }
 0x196   : > { %v1044_v45 = vpop.f32.mrb[24].mxu0  ;;  %9017 = vmatmul.mubr.msk.bf16.vlgmr.msra.gmra.mrb[124].mxu0 %vm342_vm2, %v9011_v47  ;;  %9018 = vmatprep.subr.msk.bf16.mxu1 %vm346_vm1, %v3718_v24  ;;  %v944_v21 = vpop.f32.mrb[23].mxu1 }
 0x197   : > { %v1174_v57 = vadd.f32 %v1044_v45, %v946_v36  ;;  %v1046_v27 = vpop.f32.mrb[25].mxu0  ;;  %3870 = vmatpush1.bf16.msra.mxu1 %v3741_v5  ;;  %4006 = vmatprep.mubr.bf16.mxu0 %v9824_v0 }
 0x198   : > { %v1175_v43 = vadd.f32 %v1046_v27, %v947_v19  ;;  %v3925_v6 = vpop.permute.xlu1 %3924  ;;  %v3923_v42 = vpop.permute.xlu0 %3922  ;;  %v9020_v19 = vld [vmem:[%s11986_s1 + $0x40] sm:$0xf] }
 0x199   : > { %v3939_v52 = vsel %vm3938_vm15, %v3921_v63, %v3923_v42  ;;  %v3940_v3 = vsel %vm3938_vm15, %v3923_v42, %v3925_v6  ;;  %v1048_v53 = vpop.f32.mrb[26].mxu0 }
 0x19a   : > { %v1085_v25 = vpop.f32.mrb[24].mxu1  ;;  %9019 = vmatmul.mubr.msk.bf16.vlgmr.msra.gmra.mrb[124].mxu1 %vm342_vm2, %v9011_v47  ;;  %9021 = vmatprep.subr.msk.bf16.mxu0 %vm346_vm1, %v3940_v3  ;;  %v3951_v54 = vsel %vm346_vm1, %v3939_v52, 0  ;;  %v1049_v36 = vpop.f32.mrb[27].mxu0 }
 0x19b   : > { %v1176_v24 = vadd.f32 %v1085_v25, %v948_v48  ;;  %v1087_v41 = vpop.f32.mrb[25].mxu1  ;;  %3975 = vmatpush1.bf16.msra.mxu0 %v3951_v54  ;;  %4047 = vmatprep.mubr.bf16.mxu1 %v9824_v0 }
 0x19c   : > { %v1177_v63 = vadd.f32 %v1087_v41, %v949_v11  ;;  %v3929_v45 = vpop.permute.xlu1 %3928  ;;  %v3927_v5 = vpop.permute.xlu0 %3926 }
 0x19d   : > { %v3941_v21 = vsel %vm3938_vm15, %v3925_v6, %v3927_v5  ;;  %v3942_v47 = vsel %vm3938_vm15, %v3927_v5, %v3929_v45  ;;  %v1089_v27 = vpop.f32.mrb[26].mxu1 }
 0x19e   : > { %v1126_v42 = vpop.f32.mrb[28].mxu0  ;;  %9022 = vmatmul.mubr.msk.bf16.vlgmr.msra.gmra.mrb[128].mxu0 %vm342_vm2, %v9020_v19  ;;  %9023 = vmatprep.subr.msk.bf16.mxu1 %vm346_vm1, %v3942_v47  ;;  %v3957_v48 = vsel %vm346_vm1, %v3941_v21, 0  ;;  %v1090_v52 = vpop.f32.mrb[27].mxu1 }
 0x19f   : > { %v1178_v3 = vadd.f32 %v1126_v42, %v950_v15  ;;  %v1128_v53 = vpop.f32.mrb[29].mxu0  ;;  %4016 = vmatpush1.bf16.msra.mxu1 %v3957_v48  ;;  %4088 = vmatprep.mubr.bf16.mxu0 %v9824_v0 }
 0x1a0   : > { %v1179_v11 = vadd.f32 %v1128_v53, %v951_v51  ;;  %v3933_v25 = vpop.permute.xlu1 %3932  ;;  %v3931_v54 = vpop.permute.xlu0 %3930 }
 0x1a1   : > { %v3943_v6 = vsel %vm3938_vm15, %v3929_v45, %v3931_v54  ;;  %v3944_v36 = vsel %vm3938_vm15, %v3931_v54, %v3933_v25  ;;  %v1130_v41 = vpop.f32.mrb[30].mxu0 }
 0x1a2   : > { %v1167_v5 = vpop.f32.mrb[28].mxu1  ;;  %9024 = vmatmul.mubr.msk.bf16.vlgmr.msra.gmra.mrb[128].mxu1 %vm342_vm2, %v9020_v19  ;;  %9025 = vmatprep.subr.msk.bf16.mxu0 %vm346_vm1, %v3944_v36  ;;  %v3963_v21 = vsel %vm346_vm1, %v3943_v6, 0  ;;  %v1131_v15 = vpop.f32.mrb[31].mxu0 }
 0x1a3   : > { %v1180_v47 = vadd.f32 %v1167_v5, %v952_v58  ;;  %v1169_v27 = vpop.f32.mrb[29].mxu1  ;;  %4057 = vmatpush1.bf16.msra.mxu0 %v3963_v21  ;;  %4129 = vmatprep.mubr.bf16.mxu1 %v9824_v0 }
 0x1a4   : > { %v1181_v51 = vadd.f32 %v1169_v27, %v953_v31  ;;  %v3937_v42 = vpop.permute.xlu1 %3936  ;;  %v3935_v48 = vpop.permute.xlu0 %3934 }
 0x1a5   : > { %v3945_v45 = vsel %vm3938_vm15, %v3933_v25, %v3935_v48  ;;  %v3946_v52 = vsel %vm3938_vm15, %v3935_v48, %v3937_v42  ;;  %v1171_v53 = vpop.f32.mrb[30].mxu1  ;;  %vm4394_vm15 = vcmask 236544  }
 0x1a6   : > { %v1272_v54 = vpop.f32.mrb[32].mxu0  ;;  %9026 = vmatmul.mubr.msk.bf16.vlgmr.msra.gmra.mrb[132].mxu0 %vm342_vm2, %v9020_v19  ;;  %9027 = vmatprep.subr.msk.bf16.mxu1 %vm346_vm1, %v3946_v52  ;;  %v3969_v6 = vsel %vm346_vm1, %v3945_v45, 0  ;;  %v1172_v58 = vpop.f32.mrb[31].mxu1 }
 0x1a7   : > { %v1402_v36 = vadd.f32 %v1272_v54, %v1174_v57  ;;  %v1274_v41 = vpop.f32.mrb[33].mxu0  ;;  %4098 = vmatpush1.bf16.msra.mxu1 %v3969_v6  ;;  %4234 = vmatprep.mubr.bf16.mxu0 %v9824_v0 }
 0x1a8   : > { %v1403_v31 = vadd.f32 %v1274_v41, %v1175_v43  ;;  %v4151_v5 = vpop.permute.xlu1 %4150  ;;  %v4149_v25 = vpop.permute.xlu0 %4148 }
 0x1a9   : > { %v1276_v21 = vpop.f32.mrb[34].mxu0  ;;  %v4167_v42 = vsel %vm4166_vm14, %v4149_v25, %v4151_v5 }
 0x1aa   : > { %v1313_v15 = vpop.f32.mrb[32].mxu1  ;;  %9028 = vmatmul.mubr.msk.bf16.vlgmr.msra.gmra.mrb[132].mxu1 %vm342_vm2, %v9020_v19  ;;  %v1277_v27 = vpop.f32.mrb[35].mxu0  ;;  %v4179_v6 = vsel %vm346_vm1, %v4167_v42, 0 }
 0x1ab   : > { %v1404_v48 = vadd.f32 %v1313_v15, %v1176_v24  ;;  %v1315_v52 = vpop.f32.mrb[33].mxu1  ;;  %4275 = vmatprep.mubr.bf16.mxu1 %v9824_v0  ;;  %v9029_v24 = vld [vmem:[%s11986_s1 + $0x44] sm:$0xf] }
 0x1ac   : > { %v1405_v57 = vadd.f32 %v1315_v52, %v1177_v63  ;;  %v4155_v45 = vpop.permute.xlu1 %4154  ;;  %v4153_v53 = vpop.permute.xlu0 %4152 }
 0x1ad   : > { %v4168_v54 = vsel %vm4166_vm14, %v4151_v5, %v4153_v53  ;;  %v1317_v43 = vpop.f32.mrb[34].mxu1  ;;  %v4169_v19 = vsel %vm4166_vm14, %v4153_v53, %v4155_v45 }
 0x1ae   : > { %v1354_v58 = vpop.f32.mrb[36].mxu0  ;;  %9030 = vmatprep.subr.msk.bf16.mxu0 %vm346_vm1, %v4168_v54  ;;  %v1318_v41 = vpop.f32.mrb[35].mxu1  ;;  %v4185_v53 = vsel %vm346_vm1, %v4169_v19, 0 }
 0x1af   : > { %v1406_v21 = vadd.f32 %v1354_v58, %v1178_v3  ;;  %v1356_v25 = vpop.f32.mrb[37].mxu0  ;;  %4203 = vmatpush1.bf16.msra.mxu0 %v4179_v6 }
 0x1b0   : > { %v1407_v63 = vadd.f32 %v1356_v25, %v1179_v11  ;;  %v4159_v15 = vpop.permute.xlu1 %4158  ;;  %v4157_v27 = vpop.permute.xlu0 %4156 }
 0x1b1   : > { %v4170_v5 = vsel %vm4166_vm14, %v4155_v45, %v4157_v27  ;;  %v1358_v52 = vpop.f32.mrb[38].mxu0  ;;  %v4171_v54 = vsel %vm4166_vm14, %v4157_v27, %v4159_v15 }
 0x1b2   : > { %v1395_v42 = vpop.f32.mrb[36].mxu1  ;;  %9031 = vmatmul.mubr.msk.bf16.vlgmr.msra.gmra.mrb[136].mxu0 %vm342_vm2, %v9029_v24  ;;  %9032 = vmatprep.subr.msk.bf16.mxu1 %vm346_vm1, %v4170_v5  ;;  %v1359_v3 = vpop.f32.mrb[39].mxu0  ;;  %v4191_v19 = vsel %vm346_vm1, %v4171_v54, 0 }
 0x1b3   : > { %v1408_v43 = vadd.f32 %v1395_v42, %v1180_v47  ;;  %v1397_v6 = vpop.f32.mrb[37].mxu1  ;;  %4244 = vmatpush1.bf16.msra.mxu1 %v4185_v53  ;;  %4316 = vmatprep.mubr.bf16.mxu0 %v9824_v0 }
 0x1b4   : > { %v1409_v11 = vadd.f32 %v1397_v6, %v1181_v51  ;;  %v4163_v58 = vpop.permute.xlu1 %4162  ;;  %v4161_v41 = vpop.permute.xlu0 %4160 }
 0x1b5   : > { %v4172_v45 = vsel %vm4166_vm14, %v4159_v15, %v4161_v41  ;;  %v1399_v25 = vpop.f32.mrb[38].mxu1  ;;  %v4173_v47 = vsel %vm4166_vm14, %v4161_v41, %v4163_v58 }
 0x1b6   : > { %v1500_v52 = vpop.f32.mrb[40].mxu0  ;;  %9033 = vmatmul.mubr.msk.bf16.vlgmr.msra.gmra.mrb[136].mxu1 %vm342_vm2, %v9029_v24  ;;  %9034 = vmatprep.subr.msk.bf16.mxu0 %vm346_vm1, %v4172_v45  ;;  %v1400_v5 = vpop.f32.mrb[39].mxu1  ;;  %v4197_v54 = vsel %vm346_vm1, %v4173_v47, 0 }
 0x1b7   : > { %v1630_v27 = vadd.f32 %v1500_v52, %v1402_v36  ;;  %v1502_v42 = vpop.f32.mrb[41].mxu0  ;;  %4285 = vmatpush1.bf16.msra.mxu0 %v4191_v19  ;;  %4357 = vmatprep.mubr.bf16.mxu1 %v9824_v0 }
 0x1b8   : > { %v1631_v51 = vadd.f32 %v1502_v42, %v1403_v31  ;;  %v4377_v53 = vpop.permute.xlu1 %4376  ;;  %v4165_v3 = vpop.permute.xlu0 %4164 }
 0x1b9   : > { %v4174_v15 = vsel %vm4166_vm14, %v4163_v58, %v4165_v3  ;;  %v1504_v6 = vpop.f32.mrb[42].mxu0  ;;  %vm4622_vm14 = vcmask 228352  }
 0x1ba   : > { %v1541_v25 = vpop.f32.mrb[40].mxu1  ;;  %9035 = vmatmul.mubr.msk.bf16.vlgmr.msra.gmra.mrb[140].mxu0 %vm342_vm2, %v9029_v24  ;;  %9036 = vmatprep.subr.msk.bf16.mxu1 %vm346_vm1, %v4174_v15  ;;  %v1505_v41 = vpop.f32.mrb[43].mxu0 }
 0x1bb   : > { %v1632_v36 = vadd.f32 %v1541_v25, %v1404_v48  ;;  %v1543_v45 = vpop.f32.mrb[41].mxu1  ;;  %4326 = vmatpush1.bf16.msra.mxu1 %v4197_v54  ;;  %4462 = vmatprep.mubr.bf16.mxu0 %v9824_v0 }
 0x1bc   : > { %v1633_v31 = vadd.f32 %v1543_v45, %v1405_v57  ;;  %v4381_v52 = vpop.permute.xlu1 %4380  ;;  %v4379_v19 = vpop.permute.xlu0 %4378  ;;  %v9038_v57 = vld [vmem:[%s11986_s1 + $0x48] sm:$0xf] }
 0x1bd   : > { %v4395_v58 = vsel %vm4394_vm15, %v4377_v53, %v4379_v19  ;;  %v4396_v5 = vsel %vm4394_vm15, %v4379_v19, %v4381_v52  ;;  %v1545_v42 = vpop.f32.mrb[42].mxu1 }
 0x1be   : > { %v1582_v3 = vpop.f32.mrb[44].mxu0  ;;  %9037 = vmatmul.mubr.msk.bf16.vlgmr.msra.gmra.mrb[140].mxu1 %vm342_vm2, %v9029_v24  ;;  %9039 = vmatprep.subr.msk.bf16.mxu0 %vm346_vm1, %v4396_v5  ;;  %v4407_v47 = vsel %vm346_vm1, %v4395_v58, 0  ;;  %v1546_v48 = vpop.f32.mrb[43].mxu1 }
 0x1bf   : > { %v1634_v15 = vadd.f32 %v1582_v3, %v1406_v21  ;;  %v1584_v6 = vpop.f32.mrb[45].mxu0  ;;  %4431 = vmatpush1.bf16.msra.mxu0 %v4407_v47  ;;  %4503 = vmatprep.mubr.bf16.mxu1 %v9824_v0 }
 0x1c0   : > { %v1635_v53 = vadd.f32 %v1584_v6, %v1407_v63  ;;  %v4385_v25 = vpop.permute.xlu1 %4384  ;;  %v4383_v54 = vpop.permute.xlu0 %4382 }
 0x1c1   : > { %v4397_v41 = vsel %vm4394_vm15, %v4381_v52, %v4383_v54  ;;  %v4398_v24 = vsel %vm4394_vm15, %v4383_v54, %v4385_v25  ;;  %v1586_v45 = vpop.f32.mrb[46].mxu0 }
 0x1c2   : > { %v4413_v19 = vsel %vm346_vm1, %v4397_v41, 0  ;;  %v1623_v58 = vpop.f32.mrb[44].mxu1  ;;  %9040 = vmatmul.mubr.msk.bf16.vlgmr.msra.gmra.mrb[144].mxu0 %vm342_vm2, %v9038_v57  ;;  %9041 = vmatprep.subr.msk.bf16.mxu1 %vm346_vm1, %v4398_v24  ;;  %v1587_v21 = vpop.f32.mrb[47].mxu0 }
 0x1c3   : > { %v1636_v5 = vadd.f32 %v1623_v58, %v1408_v43  ;;  %v1625_v42 = vpop.f32.mrb[45].mxu1  ;;  %4472 = vmatpush1.bf16.msra.mxu1 %v4413_v19  ;;  %4544 = vmatprep.mubr.bf16.mxu0 %v9824_v0 }
 0x1c4   : > { %v1637_v63 = vadd.f32 %v1625_v42, %v1409_v11  ;;  %v4389_v3 = vpop.permute.xlu1 %4388  ;;  %v4387_v47 = vpop.permute.xlu0 %4386 }
 0x1c5   : > { %v4399_v52 = vsel %vm4394_vm15, %v4385_v25, %v4387_v47  ;;  %v4400_v48 = vsel %vm4394_vm15, %v4387_v47, %v4389_v3  ;;  %v1627_v6 = vpop.f32.mrb[46].mxu1 }
 0x1c6   : > { %v4419_v54 = vsel %vm346_vm1, %v4399_v52, 0  ;;  %v1728_v41 = vpop.f32.mrb[48].mxu0  ;;  %9042 = vmatmul.mubr.msk.bf16.vlgmr.msra.gmra.mrb[144].mxu1 %vm342_vm2, %v9038_v57  ;;  %9043 = vmatprep.subr.msk.bf16.mxu0 %vm346_vm1, %v4400_v48  ;;  %v1628_v43 = vpop.f32.mrb[47].mxu1 }
 0x1c7   : > { %v1858_v24 = vadd.f32 %v1728_v41, %v1630_v27  ;;  %v1730_v45 = vpop.f32.mrb[49].mxu0  ;;  %4513 = vmatpush1.bf16.msra.mxu0 %v4419_v54  ;;  %4585 = vmatprep.mubr.bf16.mxu1 %v9824_v0 }
 0x1c8   : > { %v1859_v11 = vadd.f32 %v1730_v45, %v1631_v51  ;;  %v4393_v19 = vpop.permute.xlu1 %4392  ;;  %v4391_v58 = vpop.permute.xlu0 %4390 }
 0x1c9   : > { %v4401_v25 = vsel %vm4394_vm15, %v4389_v3, %v4391_v58  ;;  %v4402_v21 = vsel %vm4394_vm15, %v4391_v58, %v4393_v19  ;;  %v1732_v42 = vpop.f32.mrb[50].mxu0  ;;  %vm7369_vm15 = vcmask 891904  }
 0x1ca   : > { %v4425_v47 = vsel %vm346_vm1, %v4401_v25, 0  ;;  %v1769_v52 = vpop.f32.mrb[48].mxu1  ;;  %9044 = vmatmul.mubr.msk.bf16.vlgmr.msra.gmra.mrb[148].mxu0 %vm342_vm2, %v9038_v57  ;;  %9045 = vmatprep.subr.msk.bf16.mxu1 %vm346_vm1, %v4402_v21  ;;  %v1733_v27 = vpop.f32.mrb[51].mxu0 }
 0x1cb   : > { %v1860_v48 = vadd.f32 %v1769_v52, %v1632_v36  ;;  %v1771_v6 = vpop.f32.mrb[49].mxu1  ;;  %4554 = vmatpush1.bf16.msra.mxu1 %v4425_v47  ;;  %4690 = vmatprep.mubr.bf16.mxu0 %v9824_v0 }
 0x1cc   : > { %v1861_v51 = vadd.f32 %v1771_v6, %v1633_v31  ;;  %v4607_v54 = vpop.permute.xlu1 %4606  ;;  %v4605_v3 = vpop.permute.xlu0 %4604 }
 0x1cd   : > { %v1773_v41 = vpop.f32.mrb[50].mxu1  ;;  %v4623_v19 = vsel %vm4622_vm14, %v4605_v3, %v4607_v54 }
 0x1ce   : > { %v1810_v43 = vpop.f32.mrb[52].mxu0  ;;  %9046 = vmatmul.mubr.msk.bf16.vlgmr.msra.gmra.mrb[148].mxu1 %vm342_vm2, %v9038_v57  ;;  %v1774_v45 = vpop.f32.mrb[51].mxu1  ;;  %v4635_v52 = vsel %vm346_vm1, %v4623_v19, 0 }
 0x1cf   : > { %v1862_v58 = vadd.f32 %v1810_v43, %v1634_v15  ;;  %v1812_v25 = vpop.f32.mrb[53].mxu0  ;;  %4731 = vmatprep.mubr.bf16.mxu1 %v9824_v0  ;;  %v9047_v15 = vld [vmem:[%s11986_s1 + $0x4c] sm:$0xf] }
 0x1d0   : > { %v1863_v36 = vadd.f32 %v1812_v25, %v1635_v53  ;;  %v4611_v21 = vpop.permute.xlu1 %4610  ;;  %v4609_v42 = vpop.permute.xlu0 %4608 }
 0x1d1   : > { %v4624_v47 = vsel %vm4622_vm14, %v4607_v54, %v4609_v42  ;;  %v1814_v31 = vpop.f32.mrb[54].mxu0  ;;  %v4625_v57 = vsel %vm4622_vm14, %v4609_v42, %v4611_v21 }
 0x1d2   : > { %v1851_v27 = vpop.f32.mrb[52].mxu1  ;;  %9048 = vmatprep.subr.msk.bf16.mxu0 %vm346_vm1, %v4624_v47  ;;  %v1815_v6 = vpop.f32.mrb[55].mxu0  ;;  %v4641_v19 = vsel %vm346_vm1, %v4625_v57, 0 }
 0x1d3   : > { %v1864_v41 = vadd.f32 %v1851_v27, %v1636_v5  ;;  %v1853_v3 = vpop.f32.mrb[53].mxu1  ;;  %4659 = vmatpush1.bf16.msra.mxu0 %v4635_v52 }
 0x1d4   : > { %v1865_v53 = vadd.f32 %v1853_v3, %v1637_v63  ;;  %v4615_v43 = vpop.permute.xlu1 %4614  ;;  %v4613_v45 = vpop.permute.xlu0 %4612 }
 0x1d5   : > { %v4626_v54 = vsel %vm4622_vm14, %v4611_v21, %v4613_v45  ;;  %v1855_v25 = vpop.f32.mrb[54].mxu1  ;;  %v4627_v42 = vsel %vm4622_vm14, %v4613_v45, %v4615_v43 }
 0x1d6   : > { %v1956_v31 = vpop.f32.mrb[56].mxu0  ;;  %9049 = vmatmul.mubr.msk.bf16.vlgmr.msra.gmra.mrb[152].mxu0 %vm342_vm2, %v9047_v15  ;;  %9050 = vmatprep.subr.msk.bf16.mxu1 %vm346_vm1, %v4626_v54  ;;  %v1856_v5 = vpop.f32.mrb[55].mxu1  ;;  %v4647_v57 = vsel %vm346_vm1, %v4627_v42, 0 }
 0x1d7   : > { %v2086_v47 = vadd.f32 %v1956_v31, %v1858_v24  ;;  %v1958_v52 = vpop.f32.mrb[57].mxu0  ;;  %4700 = vmatpush1.bf16.msra.mxu1 %v4641_v19  ;;  %4772 = vmatprep.mubr.bf16.mxu0 %v9824_v0 }
 0x1d8   : > { %v2087_v63 = vadd.f32 %v1958_v52, %v1859_v11  ;;  %v4619_v27 = vpop.permute.xlu1 %4618  ;;  %v4617_v6 = vpop.permute.xlu0 %4616 }
 0x1d9   : > { %v4628_v21 = vsel %vm4622_vm14, %v4615_v43, %v4617_v6  ;;  %v1960_v3 = vpop.f32.mrb[58].mxu0  ;;  %v4629_v24 = vsel %vm4622_vm14, %v4617_v6, %v4619_v27  ;;  %v542_v43 = vsel %vm346_vm1, %v9932_v10, 0 }
 0x1da   : > { %v1997_v25 = vpop.f32.mrb[56].mxu1  ;;  %9051 = vmatmul.mubr.msk.bf16.vlgmr.msra.gmra.mrb[152].mxu1 %vm342_vm2, %v9047_v15  ;;  %9052 = vmatprep.subr.msk.bf16.mxu0 %vm346_vm1, %v4628_v21  ;;  %v1961_v54 = vpop.f32.mrb[59].mxu0  ;;  %v4653_v52 = vsel %vm346_vm1, %v4629_v24, 0 }
 0x1db   : > { %v2088_v45 = vadd.f32 %v1997_v25, %v1860_v48  ;;  %v1999_v19 = vpop.f32.mrb[57].mxu1  ;;  %4741 = vmatpush1.bf16.msra.mxu0 %v4647_v57  ;;  %4813 = vmatprep.mubr.bf16.mxu1 %v9824_v0 }
 0x1dc   : > { %v2089_v11 = vadd.f32 %v1999_v19, %v1861_v51  ;;  %v4621_v31 = vpop.permute.xlu0 %4620  ;;  %9057 = vmatprep.subr.msk.bf16.mxu0 %vm346_vm1, %v9919_v4  ;;  %v2001_v42 = vpop.f32.mrb[58].mxu1  ;;  %v548_v4 = vsel %vm346_vm1, %v9930_v9, 0  ;;  %v554_v9 = vsel %vm346_vm1, %v9940_v13, 0  ;;  %v560_v13 = vsel %vm346_vm1, %v9949_v16, 0 }
 0x1dd   : > { %v4630_v5 = vsel %vm4622_vm14, %v4619_v27, %v4621_v31  ;;  %v2002_v48 = vpop.f32.mrb[59].mxu1  ;;  %vm7439_vm14 = vcmask 883712  }
 0x1de   : > { %v2038_v21 = vpop.f32.mrb[60].mxu0  ;;  %9053 = vmatmul.mubr.msk.bf16.vlgmr.msra.gmra.mrb[156].mxu0 %vm342_vm2, %v9047_v15  ;;  %9054 = vmatprep.subr.msk.bf16.mxu1 %vm346_vm1, %v4630_v5 }
 0x1df   : > { %v2090_v6 = vadd.f32 %v2038_v21, %v1862_v58  ;;  %v2040_v51 = vpop.f32.mrb[61].mxu0  ;;  %4782 = vmatpush1.bf16.msra.mxu1 %v4653_v52  ;;  %4839 = vmatpush1.bf16.msra.mxu0 %v542_v43 }
 0x1e0   : > { %v2091_v3 = vadd.f32 %v2040_v51, %v1863_v36  ;;  %4870 = vmatprep.mubr.bf16.mxu0 %v9824_v0  ;;  %9059 = vmatprep.subr.msk.bf16.mxu1 %vm346_vm1, %v9942_v14  ;;  %v2042_v10 = vpop.f32.mrb[62].mxu0  ;;  %v9056_v36 = vld [vmem:[%s11986_s1 + $0x50] sm:$0xf]  ;;  %v357_v51 = vsel %vm346_vm1, %v10081_v30, 0 }
 0x1e1   : > { %9061 = vmatprep.subr.msk.bf16.mxu0 %vm346_vm1, %v9951_v17  ;;  %v2043_v58 = vpop.f32.mrb[63].mxu0 }
 0x1e2   : > { %v2079_v27 = vpop.f32.mrb[60].mxu1  ;;  %9055 = vmatmul.mubr.msk.bf16.vlgmr.msra.gmra.mrb[156].mxu1 %vm342_vm2, %v9047_v15 }
 0x1e3   : > { %v2092_v57 = vadd.f32 %v2079_v27, %v1864_v41  ;;  %v2081_v25 = vpop.f32.mrb[61].mxu1  ;;  %4880 = vmatpush1.bf16.msra.mxu1 %v548_v4  ;;  %4911 = vmatprep.mubr.bf16.mxu1 %v9824_v0 }
 0x1e4   : > { %v2093_v14 = vadd.f32 %v2081_v25, %v1865_v53  ;;  %v2083_v54 = vpop.f32.mrb[62].mxu1  ;;  %9063 = vmatprep.subr.msk.bf16.mxu1 %vm346_vm1, %v9957_v18 }
 0x1e5   : > { %v2084_v17 = vpop.f32.mrb[63].mxu1 }
 0x1e6   : > { %v2184_v15 = vpop.f32.mrb[64].mxu0  ;;  %9058 = vmatmul.mubr.msk.bf16.vlgmr.msra.gmra.mrb[160].mxu0 %vm342_vm2, %v9056_v36  ;;  %v369_v17 = vsel %vm346_vm1, %v10116_v40, 0  ;;  %v762_v40 = vsel %vm346_vm1, %v10157_v50, 0 }
 0x1e7   : > { %v2314_v41 = vadd.f32 %v2184_v15, %v2086_v47  ;;  %v2186_v24 = vpop.f32.mrb[65].mxu0  ;;  %4921 = vmatpush1.bf16.msra.mxu0 %v554_v9  ;;  %4952 = vmatprep.mubr.bf16.mxu0 %v9824_v0 }
 0x1e8   : > { %v2315_v19 = vadd.f32 %v2186_v24, %v2087_v63  ;;  %9066 = vmatprep.subr.msk.bf16.mxu0 %vm346_vm1, %v10078_v29  ;;  %v2188_v53 = vpop.f32.mrb[66].mxu0  ;;  %v351_v29 = vsel %vm346_vm1, %v10064_v23, 0 }
 0x1e9   : > { %v2189_v31 = vpop.f32.mrb[67].mxu0 }
 0x1ea   : > { %v2225_v43 = vpop.f32.mrb[64].mxu1  ;;  %9060 = vmatmul.mubr.msk.bf16.vlgmr.msra.gmra.mrb[160].mxu1 %vm342_vm2, %v9056_v36 }
 0x1eb   : > { %v2316_v18 = vadd.f32 %v2225_v43, %v2088_v45  ;;  %v2227_v5 = vpop.f32.mrb[65].mxu1  ;;  %4962 = vmatpush1.bf16.msra.mxu1 %v560_v13  ;;  %4993 = vmatprep.mubr.bf16.mxu1 %v9824_v0  ;;  %v5014_v45 = vpop.permute.xlu1 %5013 }
 0x1ec   : > { %v2317_v47 = vadd.f32 %v2227_v5, %v2089_v11  ;;  %9068 = vmatprep.subr.msk.bf16.mxu1 %vm346_vm1, %v10093_v32  ;;  %v2229_v63 = vpop.f32.mrb[66].mxu1  ;;  %v5015_v23 = vsel %vm333_vm0, %v10111_v39, %v5014_v45  ;;  %v363_v39 = vsel %vm346_vm1, %v10097_v35, 0  ;;  %v280_v35 = vld [vmem:[%s11987_s2] sm:$0xff]  ;;  %v5197_v43 = vpop.permute.xlu0 %5196 }
 0x1ed   : > { %v2230_v42 = vpop.f32.mrb[67].mxu1  ;;  %5745 = vperm.xlu1 %9523, %v280_v35   ;;  %v768_v63 = vsel %vm346_vm1, %v10171_v55, 0  ;;  %v5198_v50 = vsel %vm746_vm3, %v10173_v56, %v5197_v43  ;;  %v774_v55 = vsel %vm346_vm1, %v10188_v60, 0 }
 0x1ee   : > { %v2266_v16 = vpop.f32.mrb[68].mxu0  ;;  %9062 = vmatmul.mubr.msk.bf16.vlgmr.msra.gmra.mrb[164].mxu0 %vm342_vm2, %v9056_v36 }
 0x1ef   : > { %v2318_v52 = vadd.f32 %v2266_v16, %v2090_v6  ;;  %v2268_v21 = vpop.f32.mrb[69].mxu0  ;;  %5023 = vmatpush1.bf16.msra.mxu0 %v351_v29  ;;  %5054 = vmatprep.mubr.bf16.mxu0 %v9824_v0  ;;  %v9074_v16 = vld [vmem:[%s11986_s1 + $0x58] sm:$0xf] }
 0x1f0   : > { %v2319_v48 = vadd.f32 %v2268_v21, %v2091_v3  ;;  %9070 = vmatprep.subr.msk.bf16.mxu0 %vm346_vm1, %v10109_v37  ;;  %v2270_v11 = vpop.f32.mrb[70].mxu0  ;;  %v9065_v3 = vld [vmem:[%s11986_s1 + $0x54] sm:$0xf] }
 0x1f1   : > { %v2271_v32 = vpop.f32.mrb[71].mxu0 }
 0x1f2   : > { %v2307_v4 = vpop.f32.mrb[68].mxu1  ;;  %9064 = vmatmul.mubr.msk.bf16.vlgmr.msra.gmra.mrb[164].mxu1 %vm342_vm2, %v9056_v36 }
 0x1f3   : > { %v2320_v6 = vadd.f32 %v2307_v4, %v2092_v57  ;;  %v2309_v10 = vpop.f32.mrb[69].mxu1  ;;  %5064 = vmatpush1.bf16.msra.mxu1 %v357_v51  ;;  %5095 = vmatprep.mubr.bf16.mxu1 %v9824_v0 }
 0x1f4   : > { %v2321_v37 = vadd.f32 %v2309_v10, %v2093_v14  ;;  %9072 = vmatprep.subr.msk.bf16.mxu1 %vm346_vm1, %v5015_v23  ;;  %v2311_v27 = vpop.f32.mrb[70].mxu1  ;;  %v780_v23 = vsel %vm346_vm1, %v10205_v2, 0  ;;  %v5380_v2 = vpop.permute.xlu1 %5379 }
 0x1f5   : > { %v2312_v30 = vpop.f32.mrb[71].mxu1  ;;  %v990_v27 = vsel %vm346_vm1, %v10218_v8, 0  ;;  %v5381_v8 = vsel %vm974_vm4, %v10255_v33, %v5380_v2 }
 0x1f6   : > { %v2412_v58 = vpop.f32.mrb[72].mxu0  ;;  %9067 = vmatmul.mubr.msk.bf16.vlgmr.msra.gmra.mrb[168].mxu0 %vm342_vm2, %v9065_v3 }
 0x1f7   : > { %v2542_v57 = vadd.f32 %v2412_v58, %v2314_v41  ;;  %v2414_v25 = vpop.f32.mrb[73].mxu0  ;;  %5105 = vmatpush1.bf16.msra.mxu0 %v363_v39  ;;  %5136 = vmatprep.mubr.bf16.mxu0 %v9824_v0 }
 0x1f8   : > { %v2543_v36 = vadd.f32 %v2414_v25, %v2315_v19  ;;  %9075 = vmatprep.subr.msk.bf16.mxu0 %vm346_vm1, %v10185_v59  ;;  %v2416_v14 = vpop.f32.mrb[74].mxu0 }
 0x1f9   : > { %v2417_v9 = vpop.f32.mrb[75].mxu0 }
 0x1fa   : > { %v2453_v54 = vpop.f32.mrb[72].mxu1  ;;  %9069 = vmatmul.mubr.msk.bf16.vlgmr.msra.gmra.mrb[168].mxu1 %vm342_vm2, %v9065_v3 }
 0x1fb   : > { %v2544_v15 = vadd.f32 %v2453_v54, %v2316_v18  ;;  %v2455_v24 = vpop.f32.mrb[73].mxu1  ;;  %5146 = vmatpush1.bf16.msra.mxu1 %v369_v17  ;;  %5177 = vmatprep.mubr.bf16.mxu1 %v9824_v0  ;;  %v9083_v54 = vld [vmem:[%s11986_s1 + $0x5c] sm:$0xf] }
 0x1fc   : > { %v2545_v41 = vadd.f32 %v2455_v24, %v2317_v47  ;;  %9077 = vmatprep.subr.msk.bf16.mxu1 %vm346_vm1, %v10201_v1  ;;  %v2457_v59 = vpop.f32.mrb[74].mxu1  ;;  %v1008_v24 = vsel %vm346_vm1, %v10266_v34, 0  ;;  %v5563_v34 = vpop.permute.xlu0 %5562 }
 0x1fd   : > { %v2458_v19 = vpop.f32.mrb[75].mxu1 }
 0x1fe   : > { %v2494_v13 = vpop.f32.mrb[76].mxu0  ;;  %9071 = vmatmul.mubr.msk.bf16.vlgmr.msra.gmra.mrb[172].mxu0 %vm342_vm2, %v9065_v3 }
 0x1ff   : > { %v2546_v53 = vadd.f32 %v2494_v13, %v2318_v52  ;;  %v2496_v31 = vpop.f32.mrb[77].mxu0  ;;  %5206 = vmatpush1.bf16.msra.mxu0 %v762_v40  ;;  %5237 = vmatprep.mubr.bf16.mxu0 %v9824_v0 }
 0x200   : > { %v2547_v18 = vadd.f32 %v2496_v31, %v2319_v48  ;;  %9079 = vmatprep.subr.msk.bf16.mxu0 %vm346_vm1, %v10224_v12  ;;  %v2498_v1 = vpop.f32.mrb[78].mxu0 }
 0x201   : > { %v2499_v5 = vpop.f32.mrb[79].mxu0  ;;  %v1224_v1 = vsel %vm346_vm1, %v10301_v49, 0  ;;  %v12005_v49 = vld [vmem:[#allocation2_spill] sm:$0xff] }
 0x202   : > { %v2535_v47 = vpop.f32.mrb[76].mxu1  ;;  %9073 = vmatmul.mubr.msk.bf16.vlgmr.msra.gmra.mrb[172].mxu1 %vm342_vm2, %v9065_v3 }
 0x203   : > { %v2548_v42 = vadd.f32 %v2535_v47, %v2320_v6  ;;  %v2537_v29 = vpop.f32.mrb[77].mxu1  ;;  %5247 = vmatpush1.bf16.msra.mxu1 %v768_v63  ;;  %5278 = vmatprep.mubr.bf16.mxu1 %v9824_v0  ;;  %v9092_v63 = vld [vmem:[%s11986_s1 + $0x60] sm:$0xf] }
 0x204   : > { %v2549_v12 = vadd.f32 %v2537_v29, %v2321_v37  ;;  %9081 = vmatprep.subr.msk.bf16.mxu1 %vm346_vm1, %v5198_v50  ;;  %v2539_v52 = vpop.f32.mrb[78].mxu1 }
 0x205   : > { %v2540_v21 = vpop.f32.mrb[79].mxu1 }
 0x206   : > { %v2640_v45 = vpop.f32.mrb[80].mxu0  ;;  %9076 = vmatmul.mubr.msk.bf16.vlgmr.msra.gmra.mrb[176].mxu0 %vm342_vm2, %v9074_v16 }
 0x207   : > { %v2770_v56 = vadd.f32 %v2640_v45, %v2542_v57  ;;  %v2642_v48 = vpop.f32.mrb[81].mxu0  ;;  %5288 = vmatpush1.bf16.msra.mxu0 %v774_v55  ;;  %5319 = vmatprep.mubr.bf16.mxu0 %v9824_v0 }
 0x208   : > { %v2771_v11 = vadd.f32 %v2642_v48, %v2543_v36  ;;  %9084 = vmatprep.subr.msk.bf16.mxu0 %vm346_vm1, %v10253_v28  ;;  %v2644_v32 = vpop.f32.mrb[82].mxu0  ;;  %v996_v36 = vsel %vm346_vm1, %v10234_v20, 0  ;;  %v1002_v20 = vsel %vm346_vm1, %v10248_v26, 0 }
 0x209   : > { %v2645_v51 = vpop.f32.mrb[83].mxu0 }
 0x20a   : > { %v2681_v4 = vpop.f32.mrb[80].mxu1  ;;  %9078 = vmatmul.mubr.msk.bf16.vlgmr.msra.gmra.mrb[176].mxu1 %vm342_vm2, %v9074_v16 }
 0x20b   : > { %v2772_v6 = vadd.f32 %v2681_v4, %v2544_v15  ;;  %v2683_v10 = vpop.f32.mrb[81].mxu1  ;;  %5329 = vmatpush1.bf16.msra.mxu1 %v780_v23  ;;  %5360 = vmatprep.mubr.bf16.mxu1 %v9824_v0 }
 0x20c   : > { %v2773_v60 = vadd.f32 %v2683_v10, %v2545_v41  ;;  %9086 = vmatprep.subr.msk.bf16.mxu1 %vm346_vm1, %v10272_v38  ;;  %v2685_v3 = vpop.f32.mrb[82].mxu1 }
 0x20d   : > { %v2686_v37 = vpop.f32.mrb[83].mxu1 }
 0x20e   : > { %v2722_v28 = vpop.f32.mrb[84].mxu0  ;;  %9080 = vmatmul.mubr.msk.bf16.vlgmr.msra.gmra.mrb[180].mxu0 %vm342_vm2, %v9074_v16 }
 0x20f   : > { %v2774_v30 = vadd.f32 %v2722_v28, %v2546_v53  ;;  %v2724_v58 = vpop.f32.mrb[85].mxu0  ;;  %5389 = vmatpush1.bf16.msra.mxu0 %v990_v27  ;;  %5420 = vmatprep.mubr.bf16.mxu0 %v9824_v0 }
 0x210   : > { %v2775_v39 = vadd.f32 %v2724_v58, %v2547_v18  ;;  %9088 = vmatprep.subr.msk.bf16.mxu0 %vm346_vm1, %v10291_v46  ;;  %v2726_v57 = vpop.f32.mrb[86].mxu0 }
 0x211   : > { %v2727_v38 = vpop.f32.mrb[87].mxu0 }
 0x212   : > { %v2763_v25 = vpop.f32.mrb[84].mxu1  ;;  %9082 = vmatmul.mubr.msk.bf16.vlgmr.msra.gmra.mrb[180].mxu1 %vm342_vm2, %v9074_v16 }
 0x213   : > { %v2776_v14 = vadd.f32 %v2763_v25, %v2548_v42  ;;  %v2765_v9 = vpop.f32.mrb[85].mxu1  ;;  %5430 = vmatpush1.bf16.msra.mxu1 %v996_v36  ;;  %5461 = vmatprep.mubr.bf16.mxu1 %v9824_v0 }
 0x214   : > { %v2777_v46 = vadd.f32 %v2765_v9, %v2549_v12  ;;  %9090 = vmatprep.subr.msk.bf16.mxu1 %vm346_vm1, %v5381_v8  ;;  %v2767_v17 = vpop.f32.mrb[86].mxu1 }
 0x215   : > { %v2768_v15 = vpop.f32.mrb[87].mxu1 }
 0x216   : > { %9085 = vmatmul.mubr.msk.bf16.vlgmr.msra.gmra.mrb[184].mxu0 %vm342_vm2, %v9083_v54 }
 0x217   : > { %5471 = vmatpush1.bf16.msra.mxu0 %v1002_v20  ;;  %5502 = vmatprep.mubr.bf16.mxu0 %v9824_v0 }
 0x218   : > { %9093 = vmatprep.subr.msk.bf16.mxu0 %vm346_vm1, %v10320_v61  ;;  %v1218_v61 = vsel %vm346_vm1, %v10285_v44, 0  ;;  %v5564_v44 = vsel %vm1202_vm5, %v10322_v62, %v5563_v34  ;;  %v1230_v62 = vsel %vm346_vm1, %v12005_v49, 0 }
 0x21a   : > { %v2868_v33 = vpop.f32.mrb[88].mxu0  ;;  %9087 = vmatmul.mubr.msk.bf16.vlgmr.msra.gmra.mrb[184].mxu1 %vm342_vm2, %v9083_v54 }
 0x21b   : > { %v2998_v35 = vadd.f32 %v2868_v33, %v2770_v56  ;;  %v2870_v41 = vpop.f32.mrb[89].mxu0  ;;  %5512 = vmatpush1.bf16.msra.mxu1 %v1008_v24  ;;  %5543 = vmatprep.mubr.bf16.mxu1 %v9824_v0  ;;  %v12006_v56 = vld [vmem:[#allocation3_spill] sm:$0xff] }
 0x21c   : > { %v2999_v59 = vadd.f32 %v2870_v41, %v2771_v11  ;;  %9095 = vmatprep.subr.msk.bf16.mxu1 %vm346_vm1, %v10339_v7  ;;  %v2872_v26 = vpop.f32.mrb[90].mxu0  ;;  %v1236_v48 = vsel %vm346_vm1, %v12006_v56, 0 }
 0x21d   : > { %v2873_v19 = vpop.f32.mrb[91].mxu0 }
 0x21e   : > { %v2909_v13 = vpop.f32.mrb[88].mxu1  ;;  %9089 = vmatmul.mubr.msk.bf16.vlgmr.msra.gmra.mrb[188].mxu0 %vm342_vm2, %v9083_v54 }
 0x21f   : > { %v3000_v40 = vadd.f32 %v2909_v13, %v2772_v6  ;;  %v2911_v53 = vpop.f32.mrb[89].mxu1  ;;  %5572 = vmatpush1.bf16.msra.mxu0 %v1218_v61  ;;  %5603 = vmatprep.mubr.bf16.mxu0 %v9824_v0 }
 0x220   : > { %v3001_v31 = vadd.f32 %v2911_v53, %v2773_v60  ;;  %9097 = vmatprep.subr.msk.bf16.mxu0 %vm346_vm1, %v10355_v22  ;;  %v2913_v43 = vpop.f32.mrb[90].mxu1 }
 0x221   : > { %v2914_v7 = vpop.f32.mrb[91].mxu1 }
 0x222   : > { %v2950_v18 = vpop.f32.mrb[92].mxu0  ;;  %9091 = vmatmul.mubr.msk.bf16.vlgmr.msra.gmra.mrb[188].mxu1 %vm342_vm2, %v9083_v54 }
 0x223   : > { %v3002_v5 = vadd.f32 %v2950_v18, %v2774_v30  ;;  %v2952_v47 = vpop.f32.mrb[93].mxu0  ;;  %5613 = vmatpush1.bf16.msra.mxu1 %v1224_v1  ;;  %5644 = vmatprep.mubr.bf16.mxu1 %v9824_v0 }
 0x224   : > { %v3003_v22 = vadd.f32 %v2952_v47, %v2775_v39  ;;  %9099 = vmatprep.subr.msk.bf16.mxu1 %vm346_vm1, %v5564_v44  ;;  %v2954_v50 = vpop.f32.mrb[94].mxu0 }
 0x225   : > { %v2955_v42 = vpop.f32.mrb[95].mxu0 }
 0x226   : > { %v2991_v29 = vpop.f32.mrb[92].mxu1  ;;  %9094 = vmatmul.mubr.msk.bf16.vlgmr.msra.gmra.mrb[192].mxu0 %vm342_vm2, %v9092_v63 }
 0x227   : > { %v3004_v16 = vadd.f32 %v2991_v29, %v2776_v14  ;;  %v2993_v12 = vpop.f32.mrb[93].mxu1  ;;  %5654 = vmatpush1.bf16.msra.mxu0 %v1230_v62  ;;  %5685 = vmatprep.mubr.bf16.mxu0 %v9824_v0 }
 0x228   : > { %v3005_v52 = vadd.f32 %v2993_v12, %v2777_v46  ;;  %v2995_v21 = vpop.f32.mrb[94].mxu1 }
 0x229   : > { %v2996_v45 = vpop.f32.mrb[95].mxu1 }
 0x22a   : > { %v3096_v55 = vpop.f32.mrb[96].mxu0  ;;  %9096 = vmatmul.mubr.msk.bf16.vlgmr.msra.gmra.mrb[192].mxu1 %vm342_vm2, %v9092_v63 }
 0x22b   : > { %v3226_v11 = vadd.f32 %v3096_v55, %v2998_v35  ;;  %v3098_v32 = vpop.f32.mrb[97].mxu0  ;;  %5695 = vmatpush1.bf16.msra.mxu1 %v1236_v48  ;;  %5726 = vmatprep.mubr.bf16.mxu1 %v9824_v0 }
 0x22c   : > { %v3227_v51 = vadd.f32 %v3098_v32, %v2999_v59  ;;  %v3100_v4 = vpop.f32.mrb[98].mxu0 }
 0x22d   : > { %v3101_v23 = vpop.f32.mrb[99].mxu0 }
 0x22e   : > { %v3137_v6 = vpop.f32.mrb[96].mxu1  ;;  %9098 = vmatmul.mubr.msk.bf16.vlgmr.msra.gmra.mrb[196].mxu0 %vm342_vm2, %v9092_v63 }
 0x22f   : > { %v3228_v10 = vadd.f32 %v3137_v6, %v3000_v40  ;;  %v3139_v60 = vpop.f32.mrb[97].mxu1 }
 0x230   : > { %v3229_v3 = vadd.f32 %v3139_v60, %v3001_v31  ;;  %v3141_v37 = vpop.f32.mrb[98].mxu1 }
 0x231   : > { %v3142_v28 = vpop.f32.mrb[99].mxu1 }
 0x232   : > { %v3178_v27 = vpop.f32.mrb[100].mxu0  ;;  %9100 = vmatmul.mubr.msk.bf16.vlgmr.msra.gmra.mrb[196].mxu1 %vm342_vm2, %v9092_v63 }
 0x233   : > { %v3230_v30 = vadd.f32 %v3178_v27, %v3002_v5  ;;  %v3180_v58 = vpop.f32.mrb[101].mxu0  ;;  %6872 = vmatprep.mubr.bf16.mxu1 %v9824_v0 }
 0x234   : > { %v3231_v2 = vadd.f32 %v3180_v58, %v3003_v22  ;;  %v3182_v39 = vpop.f32.mrb[102].mxu0 }
 0x235   : > { %v3183_v57 = vpop.f32.mrb[103].mxu0 }
 0x236   : > { %v3219_v38 = vpop.f32.mrb[100].mxu1 }
 0x237   : > { %v3232_v25 = vadd.f32 %v3219_v38, %v3004_v16  ;;  %v3221_v36 = vpop.f32.mrb[101].mxu1 }
 0x238   : > { %v3233_v8 = vadd.f32 %v3221_v36, %v3005_v52  ;;  %v3223_v14 = vpop.f32.mrb[102].mxu1 }
 0x239   : > { %v3224_v9 = vpop.f32.mrb[103].mxu1 }
 0x23e   : > { %v3324_v54 = vpop.f32.mrb[104].mxu0 }
 0x23f   : > { %v3454_v46 = vadd.f32 %v3324_v54, %v3226_v11  ;;  %v3326_v17 = vpop.f32.mrb[105].mxu0 }
 0x240   : > { %v3455_v15 = vadd.f32 %v3326_v17, %v3227_v51  ;;  %v3328_v20 = vpop.f32.mrb[106].mxu0 }
 0x241   : > { %v3329_v33 = vpop.f32.mrb[107].mxu0 }
 0x242   : > { %v3365_v24 = vpop.f32.mrb[104].mxu1 }
 0x243   : > { %v3456_v35 = vadd.f32 %v3365_v24, %v3228_v10  ;;  %v3367_v41 = vpop.f32.mrb[105].mxu1 }
 0x244   : > { %v3457_v59 = vadd.f32 %v3367_v41, %v3229_v3  ;;  %v3369_v26 = vpop.f32.mrb[106].mxu1 }
 0x245   : > { %v3370_v19 = vpop.f32.mrb[107].mxu1 }
 0x246   : > { %v3406_v13 = vpop.f32.mrb[108].mxu0 }
 0x247   : > { %v3458_v61 = vadd.f32 %v3406_v13, %v3230_v30  ;;  %v3408_v40 = vpop.f32.mrb[109].mxu0 }
 0x248   : > { %v3459_v53 = vadd.f32 %v3408_v40, %v3231_v2  ;;  %v3410_v34 = vpop.f32.mrb[110].mxu0 }
 0x249   : > { %v3411_v31 = vpop.f32.mrb[111].mxu0 }
 0x24a   : > { %v3447_v43 = vpop.f32.mrb[108].mxu1 }
 0x24b   : > { %v3460_v7 = vadd.f32 %v3447_v43, %v3232_v25  ;;  %v3449_v18 = vpop.f32.mrb[109].mxu1 }
 0x24c   : > { %v3461_v1 = vadd.f32 %v3449_v18, %v3233_v8  ;;  %v3451_v44 = vpop.f32.mrb[110].mxu1 }
 0x24d   : > { %v3452_v5 = vpop.f32.mrb[111].mxu1 }
 0x24e   : > { %v3552_v47 = vpop.f32.mrb[112].mxu0 }
 0x24f   : > { %v3682_v63 = vadd.f32 %v3552_v47, %v3454_v46  ;;  %v3554_v22 = vpop.f32.mrb[113].mxu0 }
 0x250   : > { %v3683_v50 = vadd.f32 %v3554_v22, %v3455_v15  ;;  %v3556_v42 = vpop.f32.mrb[114].mxu0 }
 0x251   : > { %v3557_v29 = vpop.f32.mrb[115].mxu0 }
 0x252   : > { %v3593_v49 = vpop.f32.mrb[112].mxu1 }
 0x253   : > { %v3684_v62 = vadd.f32 %v3593_v49, %v3456_v35  ;;  %v3595_v16 = vpop.f32.mrb[113].mxu1 }
 0x254   : > { %v3685_v12 = vadd.f32 %v3595_v16, %v3457_v59  ;;  %v3597_v52 = vpop.f32.mrb[114].mxu1 }
 0x255   : > { %v3598_v21 = vpop.f32.mrb[115].mxu1 }
 0x256   : > { %v3634_v45 = vpop.f32.mrb[116].mxu0 }
 0x257   : > { %v3686_v55 = vadd.f32 %v3634_v45, %v3458_v61  ;;  %v3636_v56 = vpop.f32.mrb[117].mxu0 }
 0x258   : > { %v3687_v48 = vadd.f32 %v3636_v56, %v3459_v53  ;;  %v3638_v11 = vpop.f32.mrb[118].mxu0 }
 0x259   : > { %v3639_v32 = vpop.f32.mrb[119].mxu0 }
 0x25a   : > { %v3675_v51 = vpop.f32.mrb[116].mxu1 }
 0x25b   : > { %v3688_v4 = vadd.f32 %v3675_v51, %v3460_v7  ;;  %v3677_v23 = vpop.f32.mrb[117].mxu1 }
 0x25c   : > { %v3689_v6 = vadd.f32 %v3677_v23, %v3461_v1  ;;  %v3679_v10 = vpop.f32.mrb[118].mxu1 }
 0x25d   : > { %v3680_v60 = vpop.f32.mrb[119].mxu1 }
 0x261   : > { %v3780_v3 = vpop.f32.mrb[120].mxu0 }
 0x262   : > { %v3910_v37 = vadd.f32 %v3780_v3, %v3682_v63  ;;  %v3782_v28 = vpop.f32.mrb[121].mxu0 }
 0x263   : > { %v3911_v27 = vadd.f32 %v3782_v28, %v3683_v50  ;;  %v3784_v30 = vpop.f32.mrb[122].mxu0 }
 0x264   : > { %v3785_v58 = vpop.f32.mrb[123].mxu0 }
 0x265   : > { %v3821_v2 = vpop.f32.mrb[120].mxu1 }
 0x266   : > { %v3912_v39 = vadd.f32 %v3821_v2, %v3684_v62  ;;  %v3823_v57 = vpop.f32.mrb[121].mxu1 }
 0x267   : > { %v3913_v38 = vadd.f32 %v3823_v57, %v3685_v12  ;;  %v3825_v25 = vpop.f32.mrb[122].mxu1 }
 0x268   : > { %v3826_v36 = vpop.f32.mrb[123].mxu1 }
 0x269   : > { %v3862_v8 = vpop.f32.mrb[124].mxu0 }
 0x26a   : > { %v3914_v14 = vadd.f32 %v3862_v8, %v3686_v55  ;;  %v3864_v9 = vpop.f32.mrb[125].mxu0 }
 0x26b   : > { %v3915_v54 = vadd.f32 %v3864_v9, %v3687_v48  ;;  %v3866_v46 = vpop.f32.mrb[126].mxu0 }
 0x26c   : > { %v3867_v17 = vpop.f32.mrb[127].mxu0 }
 0x26d   : > { %v3903_v15 = vpop.f32.mrb[124].mxu1 }
 0x26e   : > { %v3916_v20 = vadd.f32 %v3903_v15, %v3688_v4  ;;  %v3905_v33 = vpop.f32.mrb[125].mxu1 }
 0x26f   : > { %v3917_v24 = vadd.f32 %v3905_v33, %v3689_v6  ;;  %v3907_v35 = vpop.f32.mrb[126].mxu1 }
 0x270   : > { %v3908_v41 = vpop.f32.mrb[127].mxu1 }
 0x271   : > { %v4008_v59 = vpop.f32.mrb[128].mxu0 }
 0x272   : > { %v4138_v26 = vadd.f32 %v4008_v59, %v3910_v37  ;;  %v4010_v19 = vpop.f32.mrb[129].mxu0 }
 0x273   : > { %v4139_v13 = vadd.f32 %v4010_v19, %v3911_v27  ;;  %v4012_v61 = vpop.f32.mrb[130].mxu0 }
 0x274   : > { %v4013_v40 = vpop.f32.mrb[131].mxu0 }
 0x275   : > { %v4049_v53 = vpop.f32.mrb[128].mxu1 }
 0x276   : > { %v4140_v34 = vadd.f32 %v4049_v53, %v3912_v39  ;;  %v4051_v31 = vpop.f32.mrb[129].mxu1 }
 0x277   : > { %v4141_v43 = vadd.f32 %v4051_v31, %v3913_v38  ;;  %v4053_v7 = vpop.f32.mrb[130].mxu1 }
 0x278   : > { %v4054_v18 = vpop.f32.mrb[131].mxu1 }
 0x279   : > { %v4090_v1 = vpop.f32.mrb[132].mxu0 }
 0x27a   : > { %v4142_v44 = vadd.f32 %v4090_v1, %v3914_v14  ;;  %v4092_v5 = vpop.f32.mrb[133].mxu0 }
 0x27b   : > { %v4143_v47 = vadd.f32 %v4092_v5, %v3915_v54  ;;  %v4094_v63 = vpop.f32.mrb[134].mxu0 }
 0x27c   : > { %v4095_v22 = vpop.f32.mrb[135].mxu0 }
 0x27d   : > { %v4131_v50 = vpop.f32.mrb[132].mxu1 }
 0x27e   : > { %v4144_v42 = vadd.f32 %v4131_v50, %v3916_v20  ;;  %v4133_v29 = vpop.f32.mrb[133].mxu1 }
 0x27f   : > { %v4145_v49 = vadd.f32 %v4133_v29, %v3917_v24  ;;  %v4135_v62 = vpop.f32.mrb[134].mxu1 }
 0x280   : > { %v4136_v16 = vpop.f32.mrb[135].mxu1 }
 0x285   : > { %v4236_v12 = vpop.f32.mrb[136].mxu0 }
 0x286   : > { %v4366_v52 = vadd.f32 %v4236_v12, %v4138_v26  ;;  %v4238_v21 = vpop.f32.mrb[137].mxu0 }
 0x287   : > { %v4367_v45 = vadd.f32 %v4238_v21, %v4139_v13  ;;  %v4240_v55 = vpop.f32.mrb[138].mxu0 }
 0x288   : > { %v4241_v56 = vpop.f32.mrb[139].mxu0 }
 0x289   : > { %v4277_v48 = vpop.f32.mrb[136].mxu1 }
 0x28a   : > { %v4368_v11 = vadd.f32 %v4277_v48, %v4140_v34  ;;  %v4279_v32 = vpop.f32.mrb[137].mxu1 }
 0x28b   : > { %v4369_v51 = vadd.f32 %v4279_v32, %v4141_v43  ;;  %v4281_v4 = vpop.f32.mrb[138].mxu1 }
 0x28c   : > { %v4282_v23 = vpop.f32.mrb[139].mxu1 }
 0x28d   : > { %v4318_v6 = vpop.f32.mrb[140].mxu0 }
 0x28e   : > { %v4370_v10 = vadd.f32 %v4318_v6, %v4142_v44  ;;  %v4320_v60 = vpop.f32.mrb[141].mxu0 }
 0x28f   : > { %v4371_v3 = vadd.f32 %v4320_v60, %v4143_v47  ;;  %v4322_v37 = vpop.f32.mrb[142].mxu0 }
 0x290   : > { %v4323_v28 = vpop.f32.mrb[143].mxu0 }
 0x291   : > { %v4359_v27 = vpop.f32.mrb[140].mxu1 }
 0x292   : > { %v4372_v30 = vadd.f32 %v4359_v27, %v4144_v42  ;;  %v4361_v58 = vpop.f32.mrb[141].mxu1 }
 0x293   : > { %v4373_v2 = vadd.f32 %v4361_v58, %v4145_v49  ;;  %v4363_v39 = vpop.f32.mrb[142].mxu1 }
 0x294   : > { %v4364_v57 = vpop.f32.mrb[143].mxu1 }
 0x295   : > { %v4464_v38 = vpop.f32.mrb[144].mxu0 }
 0x296   : > { %v4594_v25 = vadd.f32 %v4464_v38, %v4366_v52  ;;  %v4466_v36 = vpop.f32.mrb[145].mxu0 }
 0x297   : > { %v4595_v8 = vadd.f32 %v4466_v36, %v4367_v45  ;;  %v4468_v14 = vpop.f32.mrb[146].mxu0 }
 0x298   : > { %v4469_v9 = vpop.f32.mrb[147].mxu0 }
 0x299   : > { %v4505_v54 = vpop.f32.mrb[144].mxu1 }
 0x29a   : > { %v4596_v46 = vadd.f32 %v4505_v54, %v4368_v11  ;;  %v4507_v17 = vpop.f32.mrb[145].mxu1 }
 0x29b   : > { %v4597_v15 = vadd.f32 %v4507_v17, %v4369_v51  ;;  %v4509_v20 = vpop.f32.mrb[146].mxu1 }
 0x29c   : > { %v4510_v33 = vpop.f32.mrb[147].mxu1 }
 0x29d   : > { %v4546_v24 = vpop.f32.mrb[148].mxu0 }
 0x29e   : > { %v4598_v35 = vadd.f32 %v4546_v24, %v4370_v10  ;;  %v4548_v41 = vpop.f32.mrb[149].mxu0 }
 0x29f   : > { %v4599_v59 = vadd.f32 %v4548_v41, %v4371_v3  ;;  %v4550_v26 = vpop.f32.mrb[150].mxu0 }
 0x2a0   : > { %v4551_v19 = vpop.f32.mrb[151].mxu0 }
 0x2a1   : > { %v4587_v13 = vpop.f32.mrb[148].mxu1 }
 0x2a2   : > { %v4600_v61 = vadd.f32 %v4587_v13, %v4372_v30  ;;  %v4589_v40 = vpop.f32.mrb[149].mxu1 }
 0x2a3   : > { %v4601_v53 = vadd.f32 %v4589_v40, %v4373_v2  ;;  %v4591_v34 = vpop.f32.mrb[150].mxu1 }
 0x2a4   : > { %v4592_v31 = vpop.f32.mrb[151].mxu1 }
 0x2a9   : > { %v4692_v43 = vpop.f32.mrb[152].mxu0 }
 0x2aa   : > { %v4822_v7 = vadd.f32 %v4692_v43, %v4594_v25  ;;  %v4694_v18 = vpop.f32.mrb[153].mxu0 }
 0x2ab   : > { %v4823_v1 = vadd.f32 %v4694_v18, %v4595_v8  ;;  %v4696_v44 = vpop.f32.mrb[154].mxu0 }
 0x2ac   : > { %v4697_v5 = vpop.f32.mrb[155].mxu0 }
 0x2ad   : > { %v4733_v47 = vpop.f32.mrb[152].mxu1 }
 0x2ae   : > { %v4824_v63 = vadd.f32 %v4733_v47, %v4596_v46  ;;  %v4735_v22 = vpop.f32.mrb[153].mxu1 }
 0x2af   : > { %v4825_v50 = vadd.f32 %v4735_v22, %v4597_v15  ;;  %v4737_v42 = vpop.f32.mrb[154].mxu1 }
 0x2b0   : > { %v4738_v29 = vpop.f32.mrb[155].mxu1 }
 0x2b1   : > { %v4774_v49 = vpop.f32.mrb[156].mxu0 }
 0x2b2   : > { %v4826_v62 = vadd.f32 %v4774_v49, %v4598_v35  ;;  %v4776_v16 = vpop.f32.mrb[157].mxu0 }
 0x2b3   : > { %v4827_v12 = vadd.f32 %v4776_v16, %v4599_v59  ;;  %v4778_v52 = vpop.f32.mrb[158].mxu0 }
 0x2b4   : > { %v4779_v21 = vpop.f32.mrb[159].mxu0 }
 0x2b5   : > { %v4815_v45 = vpop.f32.mrb[156].mxu1 }
 0x2b6   : > { %v4828_v55 = vadd.f32 %v4815_v45, %v4600_v61  ;;  %v4817_v56 = vpop.f32.mrb[157].mxu1 }
 0x2b7   : > { %v4829_v48 = vadd.f32 %v4817_v56, %v4601_v53  ;;  %v4819_v11 = vpop.f32.mrb[158].mxu1 }
 0x2b8   : > { %v4820_v32 = vpop.f32.mrb[159].mxu1 }
 0x2b9   : > { %v4872_v51 = vpop.f32.mrb[160].mxu0 }
 0x2ba   : > { %v5002_v4 = vadd.f32 %v4872_v51, %v4822_v7  ;;  %v4874_v23 = vpop.f32.mrb[161].mxu0 }
 0x2bb   : > { %v5003_v6 = vadd.f32 %v4874_v23, %v4823_v1  ;;  %v4876_v10 = vpop.f32.mrb[162].mxu0 }
 0x2bc   : > { %v4877_v60 = vpop.f32.mrb[163].mxu0 }
 0x2bd   : > { %v4913_v3 = vpop.f32.mrb[160].mxu1 }
 0x2be   : > { %v5004_v37 = vadd.f32 %v4913_v3, %v4824_v63  ;;  %v4915_v28 = vpop.f32.mrb[161].mxu1 }
 0x2bf   : > { %v5005_v27 = vadd.f32 %v4915_v28, %v4825_v50  ;;  %v4917_v30 = vpop.f32.mrb[162].mxu1 }
 0x2c0   : > { %v4918_v58 = vpop.f32.mrb[163].mxu1 }
 0x2c1   : > { %v4954_v2 = vpop.f32.mrb[164].mxu0 }
 0x2c2   : > { %v5006_v39 = vadd.f32 %v4954_v2, %v4826_v62  ;;  %v4956_v57 = vpop.f32.mrb[165].mxu0 }
 0x2c3   : > { %v5007_v38 = vadd.f32 %v4956_v57, %v4827_v12  ;;  %v4958_v25 = vpop.f32.mrb[166].mxu0 }
 0x2c4   : > { %v4959_v36 = vpop.f32.mrb[167].mxu0 }
 0x2c5   : > { %v4995_v8 = vpop.f32.mrb[164].mxu1 }
 0x2c6   : > { %v5008_v14 = vadd.f32 %v4995_v8, %v4828_v55  ;;  %v4997_v9 = vpop.f32.mrb[165].mxu1 }
 0x2c7   : > { %v5009_v54 = vadd.f32 %v4997_v9, %v4829_v48  ;;  %v4999_v46 = vpop.f32.mrb[166].mxu1 }
 0x2c8   : > { %v5000_v17 = vpop.f32.mrb[167].mxu1 }
 0x2c9   : > { %v5056_v15 = vpop.f32.mrb[168].mxu0 }
 0x2ca   : > { %v5186_v20 = vadd.f32 %v5056_v15, %v5002_v4  ;;  %v5058_v33 = vpop.f32.mrb[169].mxu0 }
 0x2cb   : > { %v5187_v24 = vadd.f32 %v5058_v33, %v5003_v6  ;;  %v5060_v35 = vpop.f32.mrb[170].mxu0 }
 0x2cc   : > { %v5061_v41 = vpop.f32.mrb[171].mxu0 }
 0x2cd   : > { %v5097_v59 = vpop.f32.mrb[168].mxu1 }
 0x2ce   : > { %v5188_v26 = vadd.f32 %v5097_v59, %v5004_v37  ;;  %v5099_v19 = vpop.f32.mrb[169].mxu1 }
 0x2cf   : > { %v5189_v13 = vadd.f32 %v5099_v19, %v5005_v27  ;;  %v5101_v61 = vpop.f32.mrb[170].mxu1 }
 0x2d0   : > { %v5102_v40 = vpop.f32.mrb[171].mxu1 }
 0x2d1   : > { %v5138_v53 = vpop.f32.mrb[172].mxu0 }
 0x2d2   : > { %v5190_v34 = vadd.f32 %v5138_v53, %v5006_v39  ;;  %v5140_v31 = vpop.f32.mrb[173].mxu0 }
 0x2d3   : > { %v5191_v43 = vadd.f32 %v5140_v31, %v5007_v38  ;;  %v5142_v7 = vpop.f32.mrb[174].mxu0 }
 0x2d4   : > { %v5143_v18 = vpop.f32.mrb[175].mxu0 }
 0x2d5   : > { %v5179_v1 = vpop.f32.mrb[172].mxu1 }
 0x2d6   : > { %v5192_v44 = vadd.f32 %v5179_v1, %v5008_v14  ;;  %v5181_v5 = vpop.f32.mrb[173].mxu1 }
 0x2d7   : > { %v5193_v47 = vadd.f32 %v5181_v5, %v5009_v54  ;;  %v5183_v63 = vpop.f32.mrb[174].mxu1 }
 0x2d8   : > { %v5184_v22 = vpop.f32.mrb[175].mxu1 }
 0x2d9   : > { %v5239_v50 = vpop.f32.mrb[176].mxu0 }
 0x2da   : > { %v5369_v42 = vadd.f32 %v5239_v50, %v5186_v20  ;;  %v5241_v29 = vpop.f32.mrb[177].mxu0 }
 0x2db   : > { %v5370_v49 = vadd.f32 %v5241_v29, %v5187_v24  ;;  %v5243_v62 = vpop.f32.mrb[178].mxu0 }
 0x2dc   : > { %v5244_v16 = vpop.f32.mrb[179].mxu0 }
 0x2dd   : > { %v5280_v12 = vpop.f32.mrb[176].mxu1 }
 0x2de   : > { %v5371_v52 = vadd.f32 %v5280_v12, %v5188_v26  ;;  %v5282_v21 = vpop.f32.mrb[177].mxu1 }
 0x2df   : > { %v5372_v45 = vadd.f32 %v5282_v21, %v5189_v13  ;;  %v5284_v55 = vpop.f32.mrb[178].mxu1 }
 0x2e0   : > { %v5285_v56 = vpop.f32.mrb[179].mxu1 }
 0x2e1   : > { %v5321_v48 = vpop.f32.mrb[180].mxu0 }
 0x2e2   : > { %v5373_v11 = vadd.f32 %v5321_v48, %v5190_v34  ;;  %v5323_v32 = vpop.f32.mrb[181].mxu0  ;;  %v11088_v34 = vpop.permute.xlu1 %5745 }
 0x2e3   : > { %v5374_v51 = vadd.f32 %v5323_v32, %v5191_v43  ;;  %v5325_v4 = vpop.f32.mrb[182].mxu0 }
 0x2e4   : > { %v5326_v23 = vpop.f32.mrb[183].mxu0 }
 0x2e5   : > { %v5362_v6 = vpop.f32.mrb[180].mxu1 }
 0x2e6   : > { %v5375_v10 = vadd.f32 %v5362_v6, %v5192_v44  ;;  %v5364_v60 = vpop.f32.mrb[181].mxu1 }
 0x2e7   : > { %v5376_v3 = vadd.f32 %v5364_v60, %v5193_v47  ;;  %v5366_v37 = vpop.f32.mrb[182].mxu1  ;;  %v9585_v60 = vld [vmem:[%s11990_s5] ss:$8 sps:$4 sm:$0xff]  }
 0x2e8   : > { %v5367_v28 = vpop.f32.mrb[183].mxu1  ;;  %v9590_v37 = vld [vmem:[%s11990_s5 + $0x14] ss:$8 sps:$4 sm:$0xff]  }
 0x2e9   : > { %v5422_v27 = vpop.f32.mrb[184].mxu0  ;;  %v9588_v28 = vld [vmem:[%s11990_s5 + $0x10] ss:$8 sps:$4 sm:$0xff]  }
 0x2ea   : > { %v5552_v30 = vadd.f32 %v5422_v27, %v5369_v42  ;;  %v5424_v58 = vpop.f32.mrb[185].mxu0  ;;  %v9593_v27 = vld [vmem:[%s11990_s5 + $0x24] ss:$8 sps:$4 sm:$0xff]  }
 0x2eb   : > { %v5553_v2 = vadd.f32 %v5424_v58, %v5370_v49  ;;  %v5426_v39 = vpop.f32.mrb[186].mxu0  ;;  %v9596_v58 = vld [vmem:[%s11990_s5 + $0x34] ss:$8 sps:$4 sm:$0xff]  }
 0x2ec   : > { %v5427_v57 = vpop.f32.mrb[187].mxu0  ;;  %v9599_v39 = vld [vmem:[%s11990_s5 + $0x44] ss:$8 sps:$4 sm:$0xff]  }
 0x2ed   : > { %v5463_v38 = vpop.f32.mrb[184].mxu1  ;;  %v9597_v57 = vld [vmem:[%s11990_s5 + $0x40] ss:$8 sps:$4 sm:$0xff]  }
 0x2ee   : > { %v5554_v25 = vadd.f32 %v5463_v38, %v5371_v52  ;;  %v5465_v36 = vpop.f32.mrb[185].mxu1  ;;  %v9602_v38 = vld [vmem:[%s11990_s5 + $0x54] ss:$8 sps:$4 sm:$0xff]  }
 0x2ef   : > { %v5555_v8 = vadd.f32 %v5465_v36, %v5372_v45  ;;  %v5467_v14 = vpop.f32.mrb[186].mxu1  ;;  %v9605_v36 = vld [vmem:[%s11990_s5 + $0x64] ss:$8 sps:$4 sm:$0xff]  }
 0x2f0   : > { %v5468_v9 = vpop.f32.mrb[187].mxu1  ;;  %v9608_v14 = vld [vmem:[%s11990_s5 + $0x74] ss:$8 sps:$4 sm:$0xff]  }
 0x2f1   : > { %v5504_v54 = vpop.f32.mrb[188].mxu0  ;;  %v9606_v9 = vld [vmem:[%s11990_s5 + $0x70] ss:$8 sps:$4 sm:$0xff]  }
 0x2f2   : > { %v5556_v46 = vadd.f32 %v5504_v54, %v5373_v11  ;;  %v5506_v17 = vpop.f32.mrb[189].mxu0  ;;  %v9611_v54 = vld [vmem:[%s11990_s5 + $0x84] ss:$8 sps:$4 sm:$0xff]  }
 0x2f3   : > { %v5557_v15 = vadd.f32 %v5506_v17, %v5374_v51  ;;  %v5508_v20 = vpop.f32.mrb[190].mxu0  ;;  %v9614_v17 = vld [vmem:[%s11990_s5 + $0x94] ss:$8 sps:$4 sm:$0xff]  }
 0x2f4   : > { %v5509_v33 = vpop.f32.mrb[191].mxu0  ;;  %v9617_v20 = vld [vmem:[%s11990_s5 + $0xa4] ss:$8 sps:$4 sm:$0xff]  }
 0x2f5   : > { %v5545_v24 = vpop.f32.mrb[188].mxu1  ;;  %v9615_v33 = vld [vmem:[%s11990_s5 + $0xa0] ss:$8 sps:$4 sm:$0xff]  }
 0x2f6   : > { %v5558_v35 = vadd.f32 %v5545_v24, %v5375_v10  ;;  %v5547_v41 = vpop.f32.mrb[189].mxu1  ;;  %v9620_v24 = vld [vmem:[%s11990_s5 + $0xb4] ss:$8 sps:$4 sm:$0xff]  }
 0x2f7   : > { %v5559_v59 = vadd.f32 %v5547_v41, %v5376_v3  ;;  %v5549_v26 = vpop.f32.mrb[190].mxu1  ;;  %v9587_v3 = vld [vmem:[%s11990_s5 + $0x4] ss:$8 sps:$4 sm:$0xff]  }
 0x2f8   : > { %v5550_v19 = vpop.f32.mrb[191].mxu1  ;;  %6646 = vmatprep.subr.bf16.mxu0 %v9587_v3  ;;  %v9623_v41 = vld [vmem:[%s11990_s5 + $0xc4] ss:$8 sps:$4 sm:$0xff]   ;;  %v9626_v26 = vld [vmem:[%s11990_s5 + $0xd4] ss:$8 sps:$4 sm:$0xff]  }
 0x2f9   : > { %v5605_v13 = vpop.f32.mrb[192].mxu0  ;;  %6647 = vmatpush1.bf16.msra.mxu0 %v9585_v60  ;;  %v9624_v19 = vld [vmem:[%s11990_s5 + $0xd0] ss:$8 sps:$4 sm:$0xff]  }
 0x2fa   : > { %v5735_v61 = vadd.f32 %v5605_v13, %v5552_v30  ;;  %v5607_v40 = vpop.f32.mrb[193].mxu0  ;;  %6648 = vmatprep.subr.bf16.mxu0 %v9590_v37  ;;  %v9591_v30 = vld [vmem:[%s11990_s5 + $0x20] ss:$8 sps:$4 sm:$0xff]   ;;  %v9629_v13 = vld [vmem:[%s11990_s5 + $0xe4] ss:$8 sps:$4 sm:$0xff]  }
 0x2fb   : > { %v5736_v53 = vadd.f32 %v5607_v40, %v5553_v2  ;;  %v5609_v31 = vpop.f32.mrb[194].mxu0  ;;  %v9594_v2 = vld [vmem:[%s11990_s5 + $0x30] ss:$8 sps:$4 sm:$0xff]  }
 0x2fc   : > { %v5610_v43 = vpop.f32.mrb[195].mxu0  ;;  %v11094_v47 = vadd.f32 %v11088_v34, %v5735_v61  ;;  %v9627_v61 = vld [vmem:[%s11990_s5 + $0xe0] ss:$8 sps:$4 sm:$0xff]  }
 0x2fd   : > { %v5646_v7 = vpop.f32.mrb[192].mxu1  ;;  %v11091_v1 = vadd.f32 %v11088_v34, %v5736_v53  ;;  %6649 = vmatpush1.bf16.msra.mxu0 %v9588_v28  ;;  %v9632_v53 = vld [vmem:[%s11990_s5 + $0xf4] ss:$8 sps:$4 sm:$0xff]  }
 0x2fe   : > { %v5737_v18 = vadd.f32 %v5646_v7, %v5554_v25  ;;  %v5648_v44 = vpop.f32.mrb[193].mxu1  ;;  %v5756_v52 = vmax.f32 %v11094_v47, 0.0  ;;  %6650 = vmatprep.subr.bf16.mxu0 %v9593_v27  ;;  %v9600_v25 = vld [vmem:[%s11990_s5 + $0x50] ss:$8 sps:$4 sm:$0xff]  }
 0x2ff   : > { %v5738_v5 = vadd.f32 %v5648_v44, %v5555_v8  ;;  %v5650_v63 = vpop.f32.mrb[194].mxu1  ;;  %v5757_v49 = vmax.f32 %v11091_v1, 0.0  ;;  %v9603_v8 = vld [vmem:[%s11990_s5 + $0x60] ss:$8 sps:$4 sm:$0xff]  }
 0x300   : > { %v11097_v22 = vadd.f32 %v11088_v34, %v5737_v18  ;;  %v5651_v50 = vpop.f32.mrb[195].mxu1  ;;  %v9630_v18 = vld [vmem:[%s11990_s5 + $0xf0] ss:$8 sps:$4 sm:$0xff]  }
 0x301   : > { %v11100_v42 = vadd.f32 %v11088_v34, %v5738_v5  ;;  %v5687_v29 = vpop.f32.mrb[196].mxu0  ;;  %6651 = vmatpush1.bf16.msra.mxu0 %v9591_v30 }
 0x302   : > { %v5758_v62 = vmax.f32 %v11097_v22, 0.0  ;;  %v11104_v16 = vadd.f32 %v5687_v29, %v5556_v46  ;;  %v5689_v12 = vpop.f32.mrb[197].mxu0  ;;  %6652 = vmatprep.subr.bf16.mxu0 %v9596_v58  ;;  %v9609_v46 = vld [vmem:[%s11990_s5 + $0x80] ss:$8 sps:$4 sm:$0xff]  }
 0x303   : > { %v5759_v21 = vmax.f32 %v11100_v42, 0.0  ;;  %v11108_v45 = vadd.f32 %v5689_v12, %v5557_v15  ;;  %v5691_v55 = vpop.f32.mrb[198].mxu0  ;;  %v9612_v15 = vld [vmem:[%s11990_s5 + $0x90] ss:$8 sps:$4 sm:$0xff]  }
 0x304   : > { %v9524_v56 = vpack.i.bf16 %v5758_v62, %v5757_v49  ;;  %v5692_v48 = vpop.f32.mrb[199].mxu0  ;;  %v5752_v44 = vadd.f32 %v11088_v34, %v11104_v16 }
 0x305   : > { %v9529_v11 = vpack.i.bf16 %v5756_v52, %v5759_v21  ;;  %v5728_v32 = vpop.f32.mrb[196].mxu1  ;;  %6653 = vmatpush1.bf16.msra.mxu0 %v9594_v2  ;;  %v5753_v50 = vadd.f32 %v11088_v34, %v11108_v45 }
 0x306   : > { %v11118_v51 = vadd.f32 %v5728_v32, %v5558_v35  ;;  %v5730_v4 = vpop.f32.mrb[197].mxu1  ;;  %9525 = vrot.lane.b32.xlu0 %v9524_v56, %s9825_s30  ;;  %6654 = vmatprep.subr.bf16.mxu0 %v9599_v39  ;;  %v9618_v35 = vld [vmem:[%s11990_s5 + $0xb0] ss:$8 sps:$4 sm:$0xff]  }
 0x307   : > { %v11121_v23 = vadd.f32 %v5730_v4, %v5559_v59  ;;  %9530 = vrot.lane.b32.xlu1 %v9529_v11, %s9825_s30  ;;  %v5732_v6 = vpop.f32.mrb[198].mxu1  ;;  %v9621_v59 = vld [vmem:[%s11990_s5 + $0xc0] ss:$8 sps:$4 sm:$0xff]   ;;  %v5760_v11 = vmax.f32 %v5752_v44, 0.0  ;;  %v5761_v32 = vmax.f32 %v5753_v50, 0.0 }
 0x308   : > { %v5733_v10 = vpop.f32.mrb[199].mxu1  ;;  %v5754_v45 = vadd.f32 %v11088_v34, %v11118_v51  ;;  %v9653_v44 = vld [vmem:[%s11990_s5 + $0x164] ss:$8 sps:$4 sm:$0xff]   ;;  %v9654_v50 = vld [vmem:[%s11990_s5 + $0x170] ss:$8 sps:$4 sm:$0xff]  }
 0x309   : > { %6655 = vmatpush1.bf16.msra.mxu0 %v9597_v57  ;;  %v5755_v1 = vadd.f32 %v11088_v34, %v11121_v23  ;;  %v9539_v47 = vpack.i.bf16 %v5761_v32, %v5760_v11  ;;  %v9844_v34 = vmov 0.0   ;;  %v9633_v57 = vld [vmem:[%s11990_s5 + $0x100] ss:$8 sps:$4 sm:$0xff]  }
 0x30a   : > { %6656 = vmatprep.subr.bf16.mxu0 %v9602_v38 }
 0x30b   : > { %v5763_v4 = vmax.f32 %v5755_v1, 0.0  ;;  %v9671_v1 = vld [vmem:[%s11990_s5 + $0x1c4] ss:$8 sps:$4 sm:$0xff]  }
 0x30d   : > { %6657 = vmatpush1.bf16.msra.mxu0 %v9600_v25 }
 0x30e   : > { %6658 = vmatprep.subr.bf16.mxu0 %v9605_v36  ;;  %v9638_v36 = vld [vmem:[%s11990_s5 + $0x114] ss:$8 sps:$4 sm:$0xff]  }
 0x311   : > { %6659 = vmatpush1.bf16.msra.mxu0 %v9603_v8 }
 0x312   : > { %6660 = vmatprep.subr.bf16.mxu0 %v9608_v14 }
 0x315   : > { %6661 = vmatpush1.bf16.msra.mxu0 %v9606_v9 }
 0x316   : > { %6662 = vmatprep.subr.bf16.mxu0 %v9611_v54 }
 0x319   : > { %6663 = vmatpush1.bf16.msra.mxu0 %v9609_v46 }
 0x31a   : > { %6664 = vmatprep.subr.bf16.mxu0 %v9614_v17 }
 0x31d   : > { %6665 = vmatpush1.bf16.msra.mxu0 %v9612_v15  ;;  %v9636_v15 = vld [vmem:[%s11990_s5 + $0x110] ss:$8 sps:$4 sm:$0xff]  }
 0x31e   : > { %6666 = vmatprep.subr.bf16.mxu0 %v9617_v20 }
 0x321   : > { %6667 = vmatpush1.bf16.msra.mxu0 %v9615_v33 }
 0x322   : > { %6668 = vmatprep.subr.bf16.mxu0 %v9620_v24 }
 0x325   : > { %6669 = vmatpush1.bf16.msra.mxu0 %v9618_v35 }
 0x326   : > { %6670 = vmatprep.subr.bf16.mxu0 %v9623_v41 }
 0x329   : > { %6671 = vmatpush1.bf16.msra.mxu0 %v9621_v59 }
 0x32a   : > { %6672 = vmatprep.subr.bf16.mxu0 %v9626_v26 }
 0x32d   : > { %6673 = vmatpush1.bf16.msra.mxu0 %v9624_v19 }
 0x32e   : > { %6674 = vmatprep.subr.bf16.mxu0 %v9629_v13  ;;  %v9639_v13 = vld [vmem:[%s11990_s5 + $0x120] ss:$8 sps:$4 sm:$0xff]  }
 0x331   : > { %6675 = vmatpush1.bf16.msra.mxu0 %v9627_v61  ;;  %v9644_v61 = vld [vmem:[%s11990_s5 + $0x134] ss:$8 sps:$4 sm:$0xff]  }
 0x332   : > { %6676 = vmatprep.subr.bf16.mxu0 %v9632_v53  ;;  %v9642_v53 = vld [vmem:[%s11990_s5 + $0x130] ss:$8 sps:$4 sm:$0xff]  }
 0x335   : > { %6677 = vmatpush1.bf16.msra.mxu0 %v9630_v18  ;;  %v9648_v18 = vld [vmem:[%s11990_s5 + $0x150] ss:$8 sps:$4 sm:$0xff]  }
 0x378   : > { %v9526_v40 = vpop.permute.xlu0 %9525 }
 0x379   : > { %v9528_v31 = vunpack.i.h.bf16 %v9526_v40  ;;  %v9527_v43 = vunpack.i.l.bf16 %v9526_v40  ;;  %v9531_v7 = vpop.permute.xlu1 %9530 }
 0x37a   : > { %v9533_v5 = vunpack.i.h.bf16 %v9531_v7  ;;  %v9532_v63 = vunpack.i.l.bf16 %v9531_v7  ;;  %v9650_v7 = vld [vmem:[%s11990_s5 + $0x154] ss:$8 sps:$4 sm:$0xff]  }
 0x37b   : > { %v5793_v29 = vsel %vm333_vm0, %v9527_v43, %v9528_v31 }
 0x37c   : > { %v5809_v12 = vmax.f32 %v5757_v49, %v5793_v29  ;;  %v5792_v55 = vsel %vm333_vm0, %v9533_v5, %v9527_v43  ;;  %v5794_v56 = vsel %vm333_vm0, %v9528_v31, %v9532_v63  ;;  %v9647_v31 = vld [vmem:[%s11990_s5 + $0x144] ss:$8 sps:$4 sm:$0xff]   ;;  %v9645_v43 = vld [vmem:[%s11990_s5 + $0x140] ss:$8 sps:$4 sm:$0xff]  }
 0x37d   : > { %v5808_v48 = vmax.f32 %v5756_v52, %v5792_v55  ;;  %v11233_v16 = vmax.f32 %v5758_v62, %v5794_v56  ;;  %v5762_v52 = vmax.f32 %v5754_v45, 0.0  ;;  %v9635_v62 = vld [vmem:[%s11990_s5 + $0x104] ss:$8 sps:$4 sm:$0xff]   ;;  %v9651_v5 = vld [vmem:[%s11990_s5 + $0x160] ss:$8 sps:$4 sm:$0xff]  }
 0x37e   : > { %6687 = vmatprep.subr.bf16.mxu0 %v9635_v62  ;;  %v9659_v29 = vld [vmem:[%s11990_s5 + $0x184] ss:$8 sps:$4 sm:$0xff]   ;;  %v9662_v55 = vld [vmem:[%s11990_s5 + $0x194] ss:$8 sps:$4 sm:$0xff]   ;;  %v9660_v56 = vld [vmem:[%s11990_s5 + $0x190] ss:$8 sps:$4 sm:$0xff]  }
 0x37f   : > { %5827 = vrot.lane.b32.xlu1 %v5808_v48, %s9829_s11  ;;  %v9534_v49 = vpack.i.bf16 %v11233_v16, %v5809_v12  ;;  %v9549_v22 = vpack.i.bf16 %v5763_v4, %v5762_v52  ;;  %v9666_v45 = vld [vmem:[%s11990_s5 + $0x1b0] ss:$8 sps:$4 sm:$0xff]   ;;  %v9680_v62 = vld [vmem:[%s11990_s5 + $0x1f4] ss:$8 sps:$4 sm:$0xff]  }
 0x381   : > { %9535 = vrot.lane.b32.xlu0 %v9534_v49, %s9829_s11  ;;  %v9669_v49 = vld [vmem:[%s11990_s5 + $0x1c0] ss:$8 sps:$4 sm:$0xff]  }
 0x385   : > { %9540 = vrot.lane.b32.xlu0 %v9539_v47, %s9825_s30  ;;  %v9674_v47 = vld [vmem:[%s11990_s5 + $0x1d4] ss:$8 sps:$4 sm:$0xff]  }
 0x389   : > { %9550 = vrot.lane.b32.xlu0 %v9549_v22, %s9825_s30  ;;  %v9675_v22 = vld [vmem:[%s11990_s5 + $0x1e0] ss:$8 sps:$4 sm:$0xff]  }
 0x38d   : > { %5789 = vrot.lane.b32.xlu0 %v9844_v34, %s9825_s30  ;;  %v9678_v34 = vld [vmem:[%s11990_s5 + $0x1f0] ss:$8 sps:$4 sm:$0xff]  }
 0x3f1   : > { %v5828_v10 = vpop.permute.xlu1 %5827 }
 0x3f3   : > { %v11248_v51 = vpop.permute.xlu0 %9535 }
 0x3f4   : > { %v9538_v23 = vunpack.i.h.bf16 %v11248_v51  ;;  %v9537_v6 = vunpack.i.l.bf16 %v11248_v51  ;;  %v9681_v51 = vld [vmem:[%s11990_s5 + $0x200] ss:$8 sps:$4 sm:$0xff]  }
 0x3f6   : > { %v5846_v60 = vsel %vm1430_vm6, %v5828_v10, %v9537_v6  ;;  %v5847_v3 = vsel %vm1430_vm6, %v9537_v6, %v9538_v23  ;;  %v9683_v6 = vld [vmem:[%s11990_s5 + $0x204] ss:$8 sps:$4 sm:$0xff]  }
 0x3f7   : > { %v5862_v37 = vmax.f32 %v5808_v48, %v5846_v60  ;;  %v9541_v28 = vpop.permute.xlu0 %9540  ;;  %v5863_v27 = vmax.f32 %v5809_v12, %v5847_v3  ;;  %v9657_v12 = vld [vmem:[%s11990_s5 + $0x180] ss:$8 sps:$4 sm:$0xff]   ;;  %v9665_v48 = vld [vmem:[%s11990_s5 + $0x1a4] ss:$8 sps:$4 sm:$0xff]  }
 0x3f8   : > { %v9543_v30 = vunpack.i.h.bf16 %v9541_v28  ;;  %v9542_v58 = vunpack.i.l.bf16 %v9541_v28 }
 0x3f9   : > { %v5871_v2 = vpack.c.bf16 %v5863_v27, %v5863_v27  ;;  %v5870_v39 = vpack.c.bf16 %v5862_v37, %v5862_v37 }
 0x3fa   : > { %v5795_v38 = vsel %vm333_vm0, %v9532_v63, %v9542_v58  ;;  %v5796_v25 = vsel %vm333_vm0, %v9542_v58, %v9543_v30  ;;  %v9656_v63 = vld [vmem:[%s11990_s5 + $0x174] ss:$8 sps:$4 sm:$0xff]  }
 0x3fb   : > { %v11266_v8 = vmax.f32 %v5759_v21, %v5795_v38  ;;  %v11268_v14 = vmax.f32 %v5760_v11, %v5796_v25  ;;  %v9551_v9 = vpop.permute.xlu0 %9550  ;;  %6678 = vmatprep.mubr.bf16.mxu0 %v5871_v2  ;;  %v9641_v21 = vld [vmem:[%s11990_s5 + $0x124] ss:$8 sps:$4 sm:$0xff]   ;;  %v9663_v11 = vld [vmem:[%s11990_s5 + $0x1a0] ss:$8 sps:$4 sm:$0xff]   ;;  %v9686_v38 = vld [vmem:[%s11990_s5 + $0x214] ss:$8 sps:$4 sm:$0xff]  }
 0x3fc   : > { %v9553_v54 = vunpack.i.h.bf16 %v9551_v9  ;;  %v9552_v46 = vunpack.i.l.bf16 %v9551_v9  ;;  %6679 = vmatmul.mubr.bf16.vlgmr.msra.gmra.mrb[200].mxu0 %v5870_v39  ;;  %v9684_v9 = vld [vmem:[%s11990_s5 + $0x210] ss:$8 sps:$4 sm:$0xff]  }
 0x3fd   : > { %v9544_v17 = vpack.i.bf16 %v11268_v14, %v11266_v8  ;;  %6688 = vmatpush1.bf16.msra.mxu0 %v9633_v57 }
 0x3fe   : > { %v5797_v20 = vsel %vm333_vm0, %v9543_v30, %v9552_v46  ;;  %v5798_v42 = vsel %vm333_vm0, %v9552_v46, %v9553_v54  ;;  %6689 = vmatprep.subr.bf16.mxu0 %v9638_v36 }
 0x3ff   : > { %v11280_v33 = vmax.f32 %v5761_v32, %v5797_v20  ;;  %v11282_v24 = vmax.f32 %v5762_v52, %v5798_v42  ;;  %v5790_v35 = vpop.permute.xlu0 %5789  ;;  %9545 = vrot.lane.b32.xlu1 %v9544_v17, %s9829_s11  ;;  %v9668_v32 = vld [vmem:[%s11990_s5 + $0x1b4] ss:$8 sps:$4 sm:$0xff]   ;;  %v9672_v52 = vld [vmem:[%s11990_s5 + $0x1d0] ss:$8 sps:$4 sm:$0xff]   ;;  %v9689_v17 = vld [vmem:[%s11990_s5 + $0x224] ss:$8 sps:$4 sm:$0xff]  }
 0x400   : > { %v5799_v41 = vsel %vm333_vm0, %v9553_v54, %v5790_v35  ;;  %v5817_v26 = vmax.f32 %v5790_v35, 0.0  ;;  %v9692_v20 = vld [vmem:[%s11990_s5 + $0x234] ss:$8 sps:$4 sm:$0xff]   ;;  %v9690_v42 = vld [vmem:[%s11990_s5 + $0x230] ss:$8 sps:$4 sm:$0xff]  }
 0x401   : > { %v11286_v59 = vmax.f32 %v5763_v4, %v5799_v41  ;;  %v9554_v19 = vpack.i.bf16 %v11282_v24, %v11280_v33  ;;  %6690 = vmatpush1.bf16.msra.mxu0 %v9636_v15  ;;  %v9677_v4 = vld [vmem:[%s11990_s5 + $0x1e4] ss:$8 sps:$4 sm:$0xff]   ;;  %v9687_v15 = vld [vmem:[%s11990_s5 + $0x220] ss:$8 sps:$4 sm:$0xff]   ;;  %v9698_v35 = vld [vmem:[%s11990_s5 + $0x254] ss:$8 sps:$4 sm:$0xff]  }
 0x402   : > { %6691 = vmatprep.subr.bf16.mxu0 %v9641_v21  ;;  %v9695_v21 = vld [vmem:[%s11990_s5 + $0x244] ss:$8 sps:$4 sm:$0xff]   ;;  %v9696_v41 = vld [vmem:[%s11990_s5 + $0x250] ss:$8 sps:$4 sm:$0xff]  }
 0x403   : > { %9555 = vrot.lane.b32.xlu1 %v9554_v19, %s9829_s11  ;;  %v9559_v40 = vpack.i.bf16 %v5817_v26, %v11286_v59  ;;  %v9701_v26 = vld [vmem:[%s11990_s5 + $0x264] ss:$8 sps:$4 sm:$0xff]   ;;  %v9699_v19 = vld [vmem:[%s11990_s5 + $0x260] ss:$8 sps:$4 sm:$0xff]  }
 0x405   : > { %6692 = vmatpush1.bf16.msra.mxu0 %v9639_v13  ;;  %v9704_v13 = vld [vmem:[%s11990_s5 + $0x274] ss:$8 sps:$4 sm:$0xff]  }
 0x406   : > { %6693 = vmatprep.subr.bf16.mxu0 %v9644_v61  ;;  %v9702_v61 = vld [vmem:[%s11990_s5 + $0x270] ss:$8 sps:$4 sm:$0xff]  }
 0x407   : > { %9560 = vrot.lane.b32.xlu1 %v9559_v40, %s9829_s11  ;;  %v9707_v40 = vld [vmem:[%s11990_s5 + $0x284] ss:$8 sps:$4 sm:$0xff]  }
 0x409   : > { %6694 = vmatpush1.bf16.msra.mxu0 %v9642_v53  ;;  %v9705_v53 = vld [vmem:[%s11990_s5 + $0x280] ss:$8 sps:$4 sm:$0xff]  }
 0x40a   : > { %6695 = vmatprep.subr.bf16.mxu0 %v9647_v31  ;;  %v9710_v31 = vld [vmem:[%s11990_s5 + $0x294] ss:$8 sps:$4 sm:$0xff]  }
 0x40d   : > { %6696 = vmatpush1.bf16.msra.mxu0 %v9645_v43  ;;  %v9708_v43 = vld [vmem:[%s11990_s5 + $0x290] ss:$8 sps:$4 sm:$0xff]  }
 0x40e   : > { %6697 = vmatprep.subr.bf16.mxu0 %v9650_v7  ;;  %v9713_v7 = vld [vmem:[%s11990_s5 + $0x2a4] ss:$8 sps:$4 sm:$0xff]  }
 0x411   : > { %6698 = vmatpush1.bf16.msra.mxu0 %v9648_v18  ;;  %v9711_v18 = vld [vmem:[%s11990_s5 + $0x2a0] ss:$8 sps:$4 sm:$0xff]  }
 0x412   : > { %6699 = vmatprep.subr.bf16.mxu0 %v9653_v44  ;;  %v9716_v44 = vld [vmem:[%s11990_s5 + $0x2b4] ss:$8 sps:$4 sm:$0xff]  }
 0x415   : > { %6700 = vmatpush1.bf16.msra.mxu0 %v9651_v5  ;;  %v9714_v5 = vld [vmem:[%s11990_s5 + $0x2b0] ss:$8 sps:$4 sm:$0xff]  }
 0x416   : > { %6701 = vmatprep.subr.bf16.mxu0 %v9656_v63  ;;  %v9719_v63 = vld [vmem:[%s11990_s5 + $0x2c4] ss:$8 sps:$4 sm:$0xff]  }
 0x419   : > { %6702 = vmatpush1.bf16.msra.mxu0 %v9654_v50  ;;  %v9717_v50 = vld [vmem:[%s11990_s5 + $0x2c0] ss:$8 sps:$4 sm:$0xff]  }
 0x41a   : > { %6703 = vmatprep.subr.bf16.mxu0 %v9659_v29  ;;  %v9722_v29 = vld [vmem:[%s11990_s5 + $0x2d4] ss:$8 sps:$4 sm:$0xff]  }
 0x41d   : > { %6704 = vmatpush1.bf16.msra.mxu0 %v9657_v12  ;;  %v9720_v12 = vld [vmem:[%s11990_s5 + $0x2d0] ss:$8 sps:$4 sm:$0xff]  }
 0x41e   : > { %6705 = vmatprep.subr.bf16.mxu0 %v9662_v55  ;;  %v9725_v55 = vld [vmem:[%s11990_s5 + $0x2e4] ss:$8 sps:$4 sm:$0xff]  }
 0x421   : > { %6706 = vmatpush1.bf16.msra.mxu0 %v9660_v56 }
 0x422   : > { %6707 = vmatprep.subr.bf16.mxu0 %v9665_v48  ;;  %v9723_v48 = vld [vmem:[%s11990_s5 + $0x2e0] ss:$8 sps:$4 sm:$0xff]  }
 0x425   : > { %6708 = vmatpush1.bf16.msra.mxu0 %v9663_v11  ;;  %v9728_v11 = vld [vmem:[%s11990_s5 + $0x2f4] ss:$8 sps:$4 sm:$0xff]  }
 0x426   : > { %6709 = vmatprep.subr.bf16.mxu0 %v9668_v32 }
 0x429   : > { %6710 = vmatpush1.bf16.msra.mxu0 %v9666_v45 }
 0x42a   : > { %6711 = vmatprep.subr.bf16.mxu0 %v9671_v1  ;;  %v9726_v1 = vld [vmem:[%s11990_s5 + $0x2f0] ss:$8 sps:$4 sm:$0xff]  }
 0x42d   : > { %6712 = vmatpush1.bf16.msra.mxu0 %v9669_v49 }
 0x42e   : > { %6713 = vmatprep.subr.bf16.mxu0 %v9674_v47  ;;  %v9731_v47 = vld [vmem:[%s11990_s5 + $0x304] ss:$8 sps:$4 sm:$0xff]  }
 0x431   : > { %6714 = vmatpush1.bf16.msra.mxu0 %v9672_v52 }
 0x432   : > { %6715 = vmatprep.subr.bf16.mxu0 %v9677_v4  ;;  %v9729_v4 = vld [vmem:[%s11990_s5 + $0x300] ss:$8 sps:$4 sm:$0xff]  }
 0x435   : > { %6716 = vmatpush1.bf16.msra.mxu0 %v9675_v22 }
 0x436   : > { %6717 = vmatprep.subr.bf16.mxu0 %v9680_v62  ;;  %v9734_v62 = vld [vmem:[%s11990_s5 + $0x314] ss:$8 sps:$4 sm:$0xff]  }
 0x439   : > { %6718 = vmatpush1.bf16.msra.mxu0 %v9678_v34 }
 0x43a   : > { %6728 = vmatprep.subr.bf16.mxu0 %v9683_v6  ;;  %v9735_v6 = vld [vmem:[%s11990_s5 + $0x320] ss:$8 sps:$4 sm:$0xff]  }
 0x471   : > { %v11377_v10 = vpop.permute.xlu1 %9545 }
 0x472   : > { %v9548_v60 = vunpack.i.h.bf16 %v11377_v10  ;;  %v9547_v3 = vunpack.i.l.bf16 %v11377_v10  ;;  %v9740_v10 = vld [vmem:[%s11990_s5 + $0x334] ss:$8 sps:$4 sm:$0xff]  }
 0x474   : > { %v5848_v37 = vsel %vm1430_vm6, %v9538_v23, %v9547_v3  ;;  %v5849_v28 = vsel %vm1430_vm6, %v9547_v3, %v9548_v60  ;;  %v9743_v3 = vld [vmem:[%s11990_s5 + $0x344] ss:$8 sps:$4 sm:$0xff]  }
 0x475   : > { %v5864_v27 = vmax.f32 %v11233_v16, %v5848_v37  ;;  %v11388_v30 = vpop.permute.xlu1 %9555  ;;  %v5865_v58 = vmax.f32 %v11266_v8, %v5849_v28  ;;  %v9741_v37 = vld [vmem:[%s11990_s5 + $0x340] ss:$8 sps:$4 sm:$0xff]   ;;  %v9746_v28 = vld [vmem:[%s11990_s5 + $0x354] ss:$8 sps:$4 sm:$0xff]  }
 0x476   : > { %v9558_v2 = vunpack.i.h.bf16 %v11388_v30  ;;  %v9557_v39 = vunpack.i.l.bf16 %v11388_v30  ;;  %v9749_v30 = vld [vmem:[%s11990_s5 + $0x364] ss:$8 sps:$4 sm:$0xff]  }
 0x477   : > { %v5873_v57 = vpack.c.bf16 %v5865_v58, %v5865_v58  ;;  %v5872_v23 = vpack.c.bf16 %v5864_v27, %v5864_v27  ;;  %v9744_v27 = vld [vmem:[%s11990_s5 + $0x350] ss:$8 sps:$4 sm:$0xff]   ;;  %v9747_v58 = vld [vmem:[%s11990_s5 + $0x360] ss:$8 sps:$4 sm:$0xff]  }
 0x478   : > { %v5851_v16 = vsel %vm1430_vm6, %v9557_v39, %v9558_v2  ;;  %v5850_v32 = vsel %vm1430_vm6, %v9548_v60, %v9557_v39  ;;  %v9738_v60 = vld [vmem:[%s11990_s5 + $0x330] ss:$8 sps:$4 sm:$0xff]  }
 0x479   : > { %v11402_v25 = vpop.permute.xlu1 %9560  ;;  %6719 = vmatprep.mubr.bf16.mxu0 %v5873_v57  ;;  %v5867_v36 = vmax.f32 %v11280_v33, %v5851_v16  ;;  %v9693_v33 = vld [vmem:[%s11990_s5 + $0x240] ss:$8 sps:$4 sm:$0xff]   ;;  %v5866_v49 = vmax.f32 %v11268_v14, %v5850_v32  ;;  %v9732_v14 = vld [vmem:[%s11990_s5 + $0x310] ss:$8 sps:$4 sm:$0xff]   ;;  %v9755_v57 = vld [vmem:[%s11990_s5 + $0x384] ss:$8 sps:$4 sm:$0xff]  }
 0x47a   : > { %v9562_v8 = vunpack.i.l.bf16 %v11402_v25  ;;  %6720 = vmatmul.mubr.bf16.vlgmr.msra.gmra.mrb[200].mxu0 %v5872_v23  ;;  %v9563_v56 = vunpack.i.h.bf16 %v11402_v25  ;;  %v9750_v39 = vld [vmem:[%s11990_s5 + $0x370] ss:$8 sps:$4 sm:$0xff]   ;;  %v9758_v23 = vld [vmem:[%s11990_s5 + $0x394] ss:$8 sps:$4 sm:$0xff]   ;;  %v9761_v16 = vld [vmem:[%s11990_s5 + $0x3a4] ss:$8 sps:$4 sm:$0xff]  }
 0x47b   : > { %6729 = vmatpush1.bf16.msra.mxu0 %v9681_v51  ;;  %v5875_v54 = vpack.c.bf16 %v5867_v36, %v5867_v36  ;;  %v5874_v22 = vpack.c.bf16 %v5866_v49, %v5866_v49  ;;  %v9753_v51 = vld [vmem:[%s11990_s5 + $0x380] ss:$8 sps:$4 sm:$0xff]   ;;  %v9764_v36 = vld [vmem:[%s11990_s5 + $0x3b4] ss:$8 sps:$4 sm:$0xff]  }
 0x47c   : > { %v11412_v46 = vsel %vm1430_vm6, %v9558_v2, %v9562_v8  ;;  %6730 = vmatprep.subr.bf16.mxu0 %v9686_v38  ;;  %v5853_v45 = vsel %vm1430_vm6, %v9562_v8, %v9563_v56  ;;  %v9752_v2 = vld [vmem:[%s11990_s5 + $0x374] ss:$8 sps:$4 sm:$0xff]   ;;  %v9756_v38 = vld [vmem:[%s11990_s5 + $0x390] ss:$8 sps:$4 sm:$0xff]   ;;  %v9759_v25 = vld [vmem:[%s11990_s5 + $0x3a0] ss:$8 sps:$4 sm:$0xff]  }
 0x47d   : > { %6760 = vmatprep.mubr.bf16.mxu0 %v5875_v54  ;;  %v5869_v52 = vmax.f32 %v11286_v59, %v5853_v45  ;;  %v9737_v59 = vld [vmem:[%s11990_s5 + $0x324] ss:$8 sps:$4 sm:$0xff]   ;;  %v9762_v8 = vld [vmem:[%s11990_s5 + $0x3b0] ss:$8 sps:$4 sm:$0xff]   ;;  %v9765_v54 = vld [vmem:[%s11990_s5 + $0x3c0] ss:$8 sps:$4 sm:$0xff]  }
 0x47e   : > { %v9779_v32 = vld [vmem:[%s11988_s3 + $0x10] sm:$0xff]  }
 0x47f   : > { %6731 = vmatpush1.bf16.msra.mxu0 %v9684_v9  ;;  %v5877_v34 = vpack.c.bf16 %v5869_v52, %v5869_v52  ;;  %v9767_v9 = vld [vmem:[%s11990_s5 + $0x3c4] ss:$8 sps:$4 sm:$0xff]   ;;  %v9780_v52 = vld [vmem:[%s11988_s3 + $0x18] sm:$0xff]  }
 0x480   : > { %6732 = vmatprep.subr.bf16.mxu0 %v9689_v17  ;;  %v9770_v17 = vld [vmem:[%s11990_s5 + $0x3d4] ss:$8 sps:$4 sm:$0xff]  }
 0x483   : > { %6733 = vmatpush1.bf16.msra.mxu0 %v9687_v15  ;;  %v9768_v15 = vld [vmem:[%s11990_s5 + $0x3d0] ss:$8 sps:$4 sm:$0xff]  }
 0x484   : > { %6734 = vmatprep.subr.bf16.mxu0 %v9692_v20  ;;  %v9773_v20 = vld [vmem:[%s11990_s5 + $0x3e4] ss:$8 sps:$4 sm:$0xff]  }
 0x487   : > { %6735 = vmatpush1.bf16.msra.mxu0 %v9690_v42  ;;  %v9771_v42 = vld [vmem:[%s11990_s5 + $0x3e0] ss:$8 sps:$4 sm:$0xff]  }
 0x488   : > { %6736 = vmatprep.subr.bf16.mxu0 %v9695_v21  ;;  %v9776_v21 = vld [vmem:[%s11990_s5 + $0x3f4] ss:$8 sps:$4 sm:$0xff]  }
 0x48b   : > { %6737 = vmatpush1.bf16.msra.mxu0 %v9693_v33  ;;  %v9774_v33 = vld [vmem:[%s11990_s5 + $0x3f0] ss:$8 sps:$4 sm:$0xff]  }
 0x48c   : > { %6738 = vmatprep.subr.bf16.mxu0 %v9698_v35  ;;  %v5868_v35 = vmax.f32 %v11282_v24, %v11412_v46  ;;  %v9850_v24 = vmov 0.0|0.0  }
 0x48f   : > { %6739 = vmatpush1.bf16.msra.mxu0 %v9696_v41  ;;  %v5876_v41 = vpack.c.bf16 %v5868_v35, %v5868_v35 }
 0x490   : > { %6740 = vmatprep.subr.bf16.mxu0 %v9701_v26 }
 0x493   : > { %6741 = vmatpush1.bf16.msra.mxu0 %v9699_v19 }
 0x494   : > { %6742 = vmatprep.subr.bf16.mxu0 %v9704_v13 }
 0x497   : > { %6743 = vmatpush1.bf16.msra.mxu0 %v9702_v61 }
 0x498   : > { %6744 = vmatprep.subr.bf16.mxu0 %v9707_v40 }
 0x49b   : > { %6745 = vmatpush1.bf16.msra.mxu0 %v9705_v53 }
 0x49c   : > { %6746 = vmatprep.subr.bf16.mxu0 %v9710_v31 }
 0x49f   : > { %6747 = vmatpush1.bf16.msra.mxu0 %v9708_v43 }
 0x4a0   : > { %6748 = vmatprep.subr.bf16.mxu0 %v9713_v7 }
 0x4a3   : > { %6749 = vmatpush1.bf16.msra.mxu0 %v9711_v18 }
 0x4a4   : > { %6750 = vmatprep.subr.bf16.mxu0 %v9716_v44  ;;  %v9777_v44 = vld [vmem:[%s11988_s3 + $0x8] sm:$0xff]  }
 0x4a7   : > { %6751 = vmatpush1.bf16.msra.mxu0 %v9714_v5 }
 0x4a8   : > { %6752 = vmatprep.subr.bf16.mxu0 %v9719_v63 }
 0x4ab   : > { %6753 = vmatpush1.bf16.msra.mxu0 %v9717_v50  ;;  %v282_v50 = vld [vmem:[%s11989_s4 + $0x8] sm:$0xff] }
 0x4ac   : > { %6754 = vmatprep.subr.bf16.mxu0 %v9722_v29 }
 0x4af   : > { %6755 = vmatpush1.bf16.msra.mxu0 %v9720_v12  ;;  %v9778_v12 = vld [vmem:[%s11988_s3] sm:$0xff]  }
 0x4b0   : > { %6756 = vmatprep.subr.bf16.mxu0 %v9725_v55 }
 0x4b3   : > { %6757 = vmatpush1.bf16.msra.mxu0 %v9723_v48 }
 0x4b4   : > { %6758 = vmatprep.subr.bf16.mxu0 %v9728_v11 }
 0x4b7   : > { %6759 = vmatpush1.bf16.msra.mxu0 %v9726_v1 }
 0x4b8   : > { %6769 = vmatprep.subr.bf16.mxu0 %v9731_v47 }
 0x4ba   : > { %6761 = vmatmul.mubr.bf16.vlgmr.msra.gmra.mrb[200].mxu0 %v5874_v22 }
 0x4bb   : > { %6770 = vmatpush1.bf16.msra.mxu0 %v9729_v4  ;;  %6801 = vmatprep.mubr.bf16.mxu0 %v5877_v34 }
 0x4bc   : > { %6771 = vmatprep.subr.bf16.mxu0 %v9734_v62 }
 0x4bf   : > { %6772 = vmatpush1.bf16.msra.mxu0 %v9732_v14  ;;  %v9781_v14 = vld [vmem:[%s11988_s3 + $0x20] sm:$0xff]  }
 0x4c0   : > { %6773 = vmatprep.subr.bf16.mxu0 %v9737_v59 }
 0x4c3   : > { %6774 = vmatpush1.bf16.msra.mxu0 %v9735_v6 }
 0x4c4   : > { %6775 = vmatprep.subr.bf16.mxu0 %v9740_v10 }
 0x4c7   : > { %6776 = vmatpush1.bf16.msra.mxu0 %v9738_v60 }
 0x4c8   : > { %6777 = vmatprep.subr.bf16.mxu0 %v9743_v3  ;;  %v9782_v3 = vld [vmem:[%s11988_s3 + $0x28] sm:$0xff]  }
 0x4cb   : > { %6778 = vmatpush1.bf16.msra.mxu0 %v9741_v37 }
 0x4cc   : > { %6779 = vmatprep.subr.bf16.mxu0 %v9746_v28 }
 0x4cf   : > { %6780 = vmatpush1.bf16.msra.mxu0 %v9744_v27 }
 0x4d0   : > { %6781 = vmatprep.subr.bf16.mxu0 %v9749_v30 }
 0x4d3   : > { %6782 = vmatpush1.bf16.msra.mxu0 %v9747_v58  ;;  %v9783_v58 = vld [vmem:[%s11988_s3 + $0x30] sm:$0xff]  }
 0x4d4   : > { %6783 = vmatprep.subr.bf16.mxu0 %v9752_v2 }
 0x4d7   : > { %6784 = vmatpush1.bf16.msra.mxu0 %v9750_v39 }
 0x4d8   : > { %6785 = vmatprep.subr.bf16.mxu0 %v9755_v57 }
 0x4db   : > { %6786 = vmatpush1.bf16.msra.mxu0 %v9753_v51 }
 0x4dc   : > { %6787 = vmatprep.subr.bf16.mxu0 %v9758_v23  ;;  %v9784_v23 = vld [vmem:[%s11988_s3 + $0x38] sm:$0xff]  }
 0x4df   : > { %6788 = vmatpush1.bf16.msra.mxu0 %v9756_v38 }
 0x4e0   : > { %6789 = vmatprep.subr.bf16.mxu0 %v9761_v16 }
 0x4e3   : > { %6790 = vmatpush1.bf16.msra.mxu0 %v9759_v25 }
 0x4e4   : > { %6791 = vmatprep.subr.bf16.mxu0 %v9764_v36 }
 0x4e7   : > { %6792 = vmatpush1.bf16.msra.mxu0 %v9762_v8  ;;  %v9785_v8 = vld [vmem:[%s11988_s3 + $0x40] sm:$0xff]  }
 0x4e8   : > { %6793 = vmatprep.subr.bf16.mxu0 %v9767_v9 }
 0x4eb   : > { %6794 = vmatpush1.bf16.msra.mxu0 %v9765_v54 }
 0x4ec   : > { %6795 = vmatprep.subr.bf16.mxu0 %v9770_v17 }
 0x4ef   : > { %6796 = vmatpush1.bf16.msra.mxu0 %v9768_v15 }
 0x4f0   : > { %6797 = vmatprep.subr.bf16.mxu0 %v9773_v20 }
 0x4f3   : > { %6798 = vmatpush1.bf16.msra.mxu0 %v9771_v42  ;;  %v9786_v42 = vld [vmem:[%s11988_s3 + $0x48] sm:$0xff]  }
 0x4f4   : > { %6799 = vmatprep.subr.bf16.mxu0 %v9776_v21 }
 0x4f7   : > { %6800 = vmatpush1.bf16.msra.mxu0 %v9774_v33 }
 0x4fa   : > { %6802 = vmatmul.mubr.bf16.vlgmr.msra.gmra.mrb[200].mxu0 %v5876_v41 }
 0x5cd   : > { %v6803_v26 = vpop.f32.mrb[200].mxu0 }
 0x5ce   : > { %v11607_v19 = vpack.c.bf16 %v6803_v26, %v6803_v26  ;;  %v6805_v13 = vpop.f32.mrb[201].mxu0 }
 0x5cf   : > { %v6810_v61 = vsel %vm1430_vm6, %v6805_v13, 0.0  ;;  %v6807_v40 = vpop.f32.mrb[202].mxu0  ;;  %v9787_v13 = vld [vmem:[%s11988_s3 + $0x50] sm:$0xff]  }
 0x5d0   : > { %v11610_v53 = vpack.c.bf16 %v6810_v61, %v6810_v61  ;;  %6826 = vrot.lane.b32.xlu0 %v11607_v19, %s9825_s30  ;;  %v6808_v31 = vpop.f32.mrb[203].mxu0  ;;  %v6892_v5 = vsel %vm346_vm1, %v11607_v19, 0 }
 0x5d2   : > { %6828 = vrot.lane.b32.xlu1 %v11610_v53, %s9825_s30 }
 0x5d4   : > { %6948 = vrot.lane.b32.xlu0 %v11607_v19, %s9826_s8 }
 0x5d6   : > { %6950 = vrot.lane.b32.xlu1 %v11610_v53, %s9826_s8  ;;  %s9846_s8 = smov 111  }
 0x5d8   : > { %7017 = vrot.lane.b32.xlu0 %v11607_v19, %s9827_s9 }
 0x5da   : > { %7019 = vrot.lane.b32.xlu1 %v11610_v53, %s9827_s9  ;;  %s9848_s9 = smov 109  }
 0x5dc   : > { %7086 = vrot.lane.b32.xlu0 %v11607_v19, %s9828_s10 }
 0x5de   : > { %7088 = vrot.lane.b32.xlu1 %v11610_v53, %s9828_s10  ;;  %s9849_s10 = smov 108  }
 0x5e0   : > { %7155 = vrot.lane.b32.xlu0 %v11607_v19, %s9845_s26 }
 0x5e2   : > { %7157 = vrot.lane.b32.xlu1 %v11610_v53, %s9845_s26 }
 0x5e4   : > { %7225 = vrot.lane.b32.xlu0 %v11607_v19, %s9846_s8 }
 0x5e6   : > { %7227 = vrot.lane.b32.xlu1 %v11610_v53, %s9846_s8 }
 0x5e8   : > { %7295 = vrot.lane.b32.xlu0 %v11607_v19, %s9847_s17 }
 0x5ea   : > { %7297 = vrot.lane.b32.xlu1 %v11610_v53, %s9847_s17 }
 0x5ec   : > { %7365 = vrot.lane.b32.xlu0 %v11607_v19, %s9848_s9 }
 0x5ee   : > { %7367 = vrot.lane.b32.xlu1 %v11610_v53, %s9848_s9 }
 0x5f0   : > { %7435 = vrot.lane.b32.xlu0 %v11607_v19, %s9849_s10 }
 0x5f2   : > { %7437 = vrot.lane.b32.xlu1 %v11610_v53, %s9849_s10 }
 0x5f4   : > { %7505 = vrot.lane.b32.xlu0 %v11607_v19, %s9829_s11 }
 0x5f6   : > { %7507 = vrot.lane.b32.xlu1 %v11610_v53, %s9829_s11  ;;  %s9851_s11 = smov 80  }
 0x5f8   : > { %7575 = vrot.lane.b32.xlu0 %v11607_v19, %s9830_s12 }
 0x5fa   : > { %7577 = vrot.lane.b32.xlu1 %v11610_v53, %s9830_s12 }
 0x5fc   : > { %7579 = vrot.lane.b32.xlu0 %v9850_v24, %s9830_s12  ;;  %s9852_s12 = smov 79  }
 0x5fe   : > { %7647 = vrot.lane.b32.xlu1 %v11607_v19, %s9831_s13 }
 0x600   : > { %7649 = vrot.lane.b32.xlu0 %v11610_v53, %s9831_s13 }
 0x602   : > { %7651 = vrot.lane.b32.xlu1 %v9850_v24, %s9831_s13  ;;  %s9853_s13 = smov 78  }
 0x604   : > { %7719 = vrot.lane.b32.xlu0 %v11607_v19, %s9832_s16 }
 0x606   : > { %7721 = vrot.lane.b32.xlu1 %v11610_v53, %s9832_s16 }
 0x608   : > { %7723 = vrot.lane.b32.xlu0 %v9850_v24, %s9832_s16  ;;  %s9854_s16 = smov 77  }
 0x60a   : > { %7791 = vrot.lane.b32.xlu1 %v11607_v19, %s9833_s19 }
 0x60c   : > { %7793 = vrot.lane.b32.xlu0 %v11610_v53, %s9833_s19 }
 0x60e   : > { %7795 = vrot.lane.b32.xlu1 %v9850_v24, %s9833_s19  ;;  %s9855_s19 = smov 76  }
 0x610   : > { %7863 = vrot.lane.b32.xlu0 %v11607_v19, %s9851_s11 }
 0x612   : > { %7865 = vrot.lane.b32.xlu1 %v11610_v53, %s9851_s11 }
 0x614   : > { %7867 = vrot.lane.b32.xlu0 %v9850_v24, %s9851_s11 }
 0x616   : > { %7936 = vrot.lane.b32.xlu1 %v11607_v19, %s9852_s12 }
 0x618   : > { %7938 = vrot.lane.b32.xlu0 %v11610_v53, %s9852_s12 }
 0x61a   : > { %7940 = vrot.lane.b32.xlu1 %v9850_v24, %s9852_s12 }
 0x61c   : > { %8009 = vrot.lane.b32.xlu0 %v11607_v19, %s9853_s13 }
 0x61e   : > { %8011 = vrot.lane.b32.xlu1 %v11610_v53, %s9853_s13 }
 0x620   : > { %8013 = vrot.lane.b32.xlu0 %v9850_v24, %s9853_s13 }
 0x622   : > { %8082 = vrot.lane.b32.xlu1 %v11607_v19, %s9854_s16 }
 0x624   : > { %8084 = vrot.lane.b32.xlu0 %v11610_v53, %s9854_s16 }
 0x626   : > { %8086 = vrot.lane.b32.xlu1 %v9850_v24, %s9854_s16 }
 0x628   : > { %8155 = vrot.lane.b32.xlu0 %v11607_v19, %s9855_s19 }
 0x62a   : > { %8157 = vrot.lane.b32.xlu1 %v11610_v53, %s9855_s19 }
 0x62c   : > { %8159 = vrot.lane.b32.xlu0 %v9850_v24, %s9855_s19 }
 0x62e   : > { %8228 = vrot.lane.b32.xlu1 %v11607_v19, %s9834_s22 }
 0x630   : > { %8230 = vrot.lane.b32.xlu0 %v11610_v53, %s9834_s22 }
 0x632   : > { %8232 = vrot.lane.b32.xlu1 %v9850_v24, %s9834_s22  ;;  %s12009_s22 = smov 60  }
 0x634   : > { %8300 = vrot.lane.b32.xlu0 %v11607_v19, %s9835_s27 }
 0x636   : > { %8302 = vrot.lane.b32.xlu1 %v11610_v53, %s9835_s27 }
 0x638   : > { %8304 = vrot.lane.b32.xlu0 %v9850_v24, %s9835_s27 }
 0x63a   : > { %8372 = vrot.lane.b32.xlu1 %v11607_v19, %s12007_s15 }
 0x63c   : > { %8374 = vrot.lane.b32.xlu0 %v11610_v53, %s12007_s15 }
 0x63e   : > { %8376 = vrot.lane.b32.xlu1 %v9850_v24, %s12007_s15 }
 0x640   : > { %8444 = vrot.lane.b32.xlu0 %v11607_v19, %s12008_s20 }
 0x642   : > { %8446 = vrot.lane.b32.xlu1 %v11610_v53, %s12008_s20  ;;  %v6827_v46 = vpop.permute.xlu0 %6826 }
 0x644   : > { %8448 = vrot.lane.b32.xlu0 %v9850_v24, %s12008_s20  ;;  %v6829_v43 = vpop.permute.xlu1 %6828 }
 0x645   : > { %v6830_v7 = vsel %vm333_vm0, %v6827_v46, %v6829_v43  ;;  %9232 = vmatprep.subr.msk.bf16.mxu1 %vm346_vm1, %v6829_v43  ;;  %v9788_v43 = vld [vmem:[%s11988_s3 + $0x58] sm:$0xff]  }
 0x646   : > { %v6835_v18 = vsel %vm346_vm1, %v6830_v7, 0  ;;  %8516 = vrot.lane.b32.xlu1 %v11607_v19, %s12009_s22  ;;  %v6949_v29 = vpop.permute.xlu0 %6948 }
 0x647   : > { %6841 = vmatpush1.bf16.msra.mxu1 %v6835_v18 }
 0x648   : > { %8518 = vrot.lane.b32.xlu0 %v11610_v53, %s12009_s22  ;;  %9235 = vmatprep.subr.msk.bf16.mxu1 %vm346_vm1, %v11610_v53  ;;  %v6951_v63 = vpop.permute.xlu1 %6950 }
 0x649   : > { %v6952_v55 = vsel %vm746_vm3, %v6949_v29, %v6951_v63  ;;  %vm7159_vm3 = vcmask 916480   ;;  %v9789_v29 = vld [vmem:[%s11988_s3 + $0x60] sm:$0xff]  }
 0x64a   : > { %8520 = vrot.lane.b32.xlu1 %v9850_v24, %s12009_s22  ;;  %9233 = vmatmul.mubr.msk.bf16.vlgmr.msra.gmra.mrb[200].mxu1 %vm342_vm2, %v9777_v44  ;;  %v6957_v56 = vsel %vm346_vm1, %v6952_v55, 0  ;;  %v7018_v11 = vpop.permute.xlu0 %7017 }
 0x64b   : > { %6898 = vmatpush1.bf16.msra.mxu1 %v6892_v5  ;;  %6929 = vmatprep.mubr.bf16.mxu1 %v9824_v0 }
 0x64c   : > { %9240 = vmatprep.subr.msk.bf16.mxu1 %vm346_vm1, %v6951_v63  ;;  %v7020_v48 = vpop.permute.xlu1 %7019 }
 0x64d   : > { %v7021_v45 = vsel %vm974_vm4, %v7018_v11, %v7020_v48  ;;  %vm7229_vm4 = vcmask 908288  }
 0x64e   : > { %8587 = vperm.xlu1 %9523, %v282_v50   ;;  %v7026_v1 = vsel %vm346_vm1, %v7021_v45, 0  ;;  %v7087_v47 = vpop.permute.xlu0 %7086  ;;  %v9790_v45 = vld [vmem:[%s11988_s3 + $0x68] sm:$0xff]  }
 0x650   : > { %v7089_v49 = vpop.permute.xlu1 %7088 }
 0x651   : > { %v7090_v4 = vsel %vm1202_vm5, %v7087_v47, %v7089_v49  ;;  %vm7299_vm5 = vcmask 900096  }
 0x652   : > { %v7095_v22 = vsel %vm346_vm1, %v7090_v4, 0  ;;  %v7156_v34 = vpop.permute.xlu0 %7155 }
 0x654   : > { %v7158_v62 = vpop.permute.xlu1 %7157 }
 0x655   : > { %v7160_v59 = vsel %vm7159_vm3, %v7156_v34, %v7158_v62  ;;  %v9791_v34 = vld [vmem:[%s11988_s3 + $0x70] sm:$0xff]  }
 0x656   : > { %9236 = vmatmul.mubr.msk.bf16.vlgmr.msra.gmra.mrb[200].mxu1 %vm342_vm2, %v9778_v12  ;;  %v7165_v6 = vsel %vm346_vm1, %v7160_v59, 0  ;;  %v7226_v60 = vpop.permute.xlu0 %7225 }
 0x657   : > { %6963 = vmatpush1.bf16.msra.mxu1 %v6957_v56  ;;  %6994 = vmatprep.mubr.bf16.mxu1 %v9824_v0 }
 0x658   : > { %9245 = vmatprep.subr.msk.bf16.mxu1 %vm346_vm1, %v7020_v48  ;;  %v7228_v10 = vpop.permute.xlu1 %7227 }
 0x659   : > { %v7230_v37 = vsel %vm7229_vm4, %v7226_v60, %v7228_v10  ;;  %vm8161_vm4 = vcmask 621568  }
 0x65a   : > { %v7235_v28 = vsel %vm346_vm1, %v7230_v37, 0  ;;  %v7296_v30 = vpop.permute.xlu0 %7295  ;;  %v9792_v37 = vld [vmem:[%s11988_s3 + $0x78] sm:$0xff]  }
 0x65c   : > { %v7298_v27 = vpop.permute.xlu1 %7297 }
 0x65d   : > { %v7300_v2 = vsel %vm7299_vm5, %v7296_v30, %v7298_v27 }
 0x65e   : > { %v7305_v39 = vsel %vm346_vm1, %v7300_v2, 0  ;;  %v7366_v51 = vpop.permute.xlu0 %7365 }
 0x660   : > { %v7368_v57 = vpop.permute.xlu1 %7367 }
 0x661   : > { %v7370_v38 = vsel %vm7369_vm15, %v7366_v51, %v7368_v57 }
 0x662   : > { %9241 = vmatmul.mubr.msk.bf16.vlgmr.msra.gmra.mrb[200].mxu1 %vm342_vm2, %v9779_v32  ;;  %v7375_v16 = vsel %vm346_vm1, %v7370_v38, 0  ;;  %v7436_v36 = vpop.permute.xlu0 %7435 }
 0x663   : > { %7032 = vmatpush1.bf16.msra.mxu1 %v7026_v1  ;;  %7063 = vmatprep.mubr.bf16.mxu1 %v9824_v0 }
 0x664   : > { %9250 = vmatprep.subr.msk.bf16.mxu1 %vm346_vm1, %v7089_v49  ;;  %v7438_v25 = vpop.permute.xlu1 %7437 }
 0x665   : > { %v7440_v9 = vsel %vm7439_vm14, %v7436_v36, %v7438_v25 }
 0x666   : > { %v7506_v54 = vpop.permute.xlu0 %7505  ;;  %v7445_v17 = vsel %vm346_vm1, %v7440_v9, 0 }
 0x668   : > { %v7508_v15 = vpop.permute.xlu1 %7507 }
 0x669   : > { %v7509_v21 = vsel %vm1430_vm6, %v7506_v54, %v7508_v15 }
 0x66a   : > { %v7576_v20 = vpop.permute.xlu0 %7575  ;;  %v7514_v41 = vsel %vm346_vm1, %v7509_v21, 0  ;;  %v9795_v21 = vld [vmem:[%s11988_s3 + $0x90] sm:$0xff]  }
 0x66c   : > { %v7578_v33 = vpop.permute.xlu1 %7577 }
 0x66d   : > { %v7581_v61 = vsel %vm1658_vm7, %v7576_v20, %v7578_v33 }
 0x66e   : > { %9246 = vmatmul.mubr.msk.bf16.vlgmr.msra.gmra.mrb[200].mxu1 %vm342_vm2, %v9780_v52  ;;  %v7580_v35 = vpop.permute.xlu0 %7579  ;;  %v7587_v31 = vsel %vm346_vm1, %v7581_v61, 0  ;;  %v9796_v61 = vld [vmem:[%s11988_s3 + $0x98] sm:$0xff]  }
 0x66f   : > { %7101 = vmatpush1.bf16.msra.mxu1 %v7095_v22  ;;  %7132 = vmatprep.mubr.bf16.mxu1 %v9824_v0  ;;  %v7582_v26 = vsel %vm1658_vm7, %v7578_v33, %v7580_v35  ;;  %vm7869_vm7 = vcmask 654336  }
 0x670   : > { %9255 = vmatprep.subr.msk.bf16.mxu1 %vm346_vm1, %v7158_v62  ;;  %v7648_v19 = vpop.permute.xlu1 %7647  ;;  %v281_v62 = vld [vmem:[%s11989_s4] sm:$0xff] }
 0x671   : > { %8582 = vperm.xlu0 %9564, %v281_v62   ;;  %v9800_v62 = vld [vmem:[%s11988_s3 + $0xb8] sm:$0xff]  }
 0x672   : > { %v7650_v40 = vpop.permute.xlu0 %7649 }
 0x673   : > { %v7653_v7 = vsel %vm1886_vm8, %v7648_v19, %v7650_v40 }
 0x674   : > { %v7652_v53 = vpop.permute.xlu1 %7651  ;;  %v7659_v5 = vsel %vm346_vm1, %v7653_v7, 0  ;;  %v9797_v7 = vld [vmem:[%s11988_s3 + $0xa0] sm:$0xff]  }
 0x675   : > { %v7654_v24 = vsel %vm1886_vm8, %v7650_v40, %v7652_v53  ;;  %vm7942_vm8 = vcmask 646144  }
 0x676   : > { %v7720_v46 = vpop.permute.xlu0 %7719 }
 0x678   : > { %v7722_v18 = vpop.permute.xlu1 %7721 }
 0x679   : > { %v7725_v12 = vsel %vm2114_vm9, %v7720_v46, %v7722_v18 }
 0x67a   : > { %9251 = vmatmul.mubr.msk.bf16.vlgmr.msra.gmra.mrb[200].mxu1 %vm342_vm2, %v9781_v14  ;;  %v7724_v44 = vpop.permute.xlu0 %7723  ;;  %v7731_v48 = vsel %vm346_vm1, %v7725_v12, 0  ;;  %v9798_v12 = vld [vmem:[%s11988_s3 + $0xa8] sm:$0xff]  }
 0x67b   : > { %7171 = vmatpush1.bf16.msra.mxu1 %v7165_v6  ;;  %7202 = vmatprep.mubr.bf16.mxu1 %v9824_v0  ;;  %v7726_v63 = vsel %vm2114_vm9, %v7722_v18, %v7724_v44  ;;  %vm8015_vm9 = vcmask 637952  }
 0x67c   : > { %9260 = vmatprep.subr.msk.bf16.mxu1 %vm346_vm1, %v7228_v10  ;;  %v7792_v50 = vpop.permute.xlu1 %7791 }
 0x67e   : > { %v7794_v55 = vpop.permute.xlu0 %7793 }
 0x67f   : > { %v7797_v1 = vsel %vm2342_vm10, %v7792_v50, %v7794_v55 }
 0x680   : > { %v7796_v56 = vpop.permute.xlu1 %7795  ;;  %v7803_v52 = vsel %vm346_vm1, %v7797_v1, 0  ;;  %v9799_v1 = vld [vmem:[%s11988_s3 + $0xb0] sm:$0xff]  }
 0x681   : > { %v7798_v11 = vsel %vm2342_vm10, %v7794_v55, %v7796_v56  ;;  %vm8088_vm10 = vcmask 629760  }
 0x682   : > { %v7864_v32 = vpop.permute.xlu0 %7863 }
 0x684   : > { %v7866_v49 = vpop.permute.xlu1 %7865 }
 0x685   : > { %v7870_v14 = vsel %vm7869_vm7, %v7864_v32, %v7866_v49 }
 0x686   : > { %9256 = vmatmul.mubr.msk.bf16.vlgmr.msra.gmra.mrb[200].mxu1 %vm342_vm2, %v9782_v3  ;;  %v7868_v47 = vpop.permute.xlu0 %7867  ;;  %v7876_v10 = vsel %vm346_vm1, %v7870_v14, 0 }
 0x687   : > { %7241 = vmatpush1.bf16.msra.mxu1 %v7235_v28  ;;  %7272 = vmatprep.mubr.bf16.mxu1 %v9824_v0  ;;  %v7871_v4 = vsel %vm7869_vm7, %v7866_v49, %v7868_v47 }
 0x688   : > { %9265 = vmatprep.subr.msk.bf16.mxu1 %vm346_vm1, %v7298_v27  ;;  %v7937_v22 = vpop.permute.xlu1 %7936 }
 0x68a   : > { %v7939_v59 = vpop.permute.xlu0 %7938 }
 0x68b   : > { %v7943_v28 = vsel %vm7942_vm8, %v7937_v22, %v7939_v59 }
 0x68c   : > { %v7941_v6 = vpop.permute.xlu1 %7940 }
 0x68d   : > { %v7944_v60 = vsel %vm7942_vm8, %v7939_v59, %v7941_v6  ;;  %v9801_v59 = vld [vmem:[%s11988_s3 + $0xc0] sm:$0xff]  }
 0x68e   : > { %v8010_v3 = vpop.permute.xlu0 %8009 }
 0x690   : > { %v8012_v27 = vpop.permute.xlu1 %8011 }
 0x691   : > { %v8016_v51 = vsel %vm8015_vm9, %v8010_v3, %v8012_v27 }
 0x692   : > { %9261 = vmatmul.mubr.msk.bf16.vlgmr.msra.gmra.mrb[200].mxu1 %vm342_vm2, %v9783_v58  ;;  %v8014_v30 = vpop.permute.xlu0 %8013  ;;  %v7949_v58 = vsel %vm346_vm1, %v7943_v28, 0 }
 0x693   : > { %7311 = vmatpush1.bf16.msra.mxu1 %v7305_v39  ;;  %7342 = vmatprep.mubr.bf16.mxu1 %v9824_v0  ;;  %v8017_v2 = vsel %vm8015_vm9, %v8012_v27, %v8014_v30 }
 0x694   : > { %9270 = vmatprep.subr.msk.bf16.mxu1 %vm346_vm1, %v7368_v57  ;;  %v8083_v39 = vpop.permute.xlu1 %8082  ;;  %v9793_v57 = vld [vmem:[%s11988_s3 + $0x80] sm:$0xff]  }
 0x698   : > { %v8087_v38 = vpop.permute.xlu1 %8086 }
 0x69c   : > { %v8158_v54 = vpop.permute.xlu1 %8157 }
 0x69e   : > { %9266 = vmatmul.mubr.msk.bf16.vlgmr.msra.gmra.mrb[200].mxu1 %vm342_vm2, %v9784_v23  ;;  %v8085_v23 = vpop.permute.xlu0 %8084 }
 0x69f   : > { %7381 = vmatpush1.bf16.msra.mxu1 %v7375_v16  ;;  %7412 = vmatprep.mubr.bf16.mxu1 %v9824_v0  ;;  %v8022_v16 = vsel %vm346_vm1, %v8016_v51, 0  ;;  %v8089_v9 = vsel %vm8088_vm10, %v8083_v39, %v8085_v23  ;;  %v9802_v51 = vld [vmem:[%s11991_s6] sm:$0xff]  }
 0x6a0   : > { %9275 = vmatprep.subr.msk.bf16.mxu1 %vm346_vm1, %v7438_v25  ;;  %v8090_v25 = vsel %vm8088_vm10, %v8085_v23, %v8087_v38 }
 0x6a2   : > { %v8156_v36 = vpop.permute.xlu0 %8155 }
 0x6a3   : > { %v8162_v33 = vsel %vm8161_vm4, %v8156_v36, %v8158_v54  ;;  %v9803_v36 = vld [vmem:[%s11991_s6 + $0x8] sm:$0xff]  }
 0x6aa   : > { %9271 = vmatmul.mubr.msk.bf16.vlgmr.msra.gmra.mrb[200].mxu1 %vm342_vm2, %v9785_v8  ;;  %v9794_v8 = vld [vmem:[%s11988_s3 + $0x88] sm:$0xff]  }
 0x6ab   : > { %7451 = vmatpush1.bf16.msra.mxu1 %v7445_v17  ;;  %7482 = vmatprep.mubr.bf16.mxu1 %v9824_v0  ;;  %v8160_v17 = vpop.permute.xlu0 %8159 }
 0x6ac   : > { %9280 = vmatprep.subr.msk.bf16.mxu1 %vm346_vm1, %v7508_v15  ;;  %v8095_v15 = vsel %vm346_vm1, %v8089_v9, 0  ;;  %v8163_v20 = vsel %vm8161_vm4, %v8158_v54, %v8160_v17  ;;  %v9804_v54 = vld [vmem:[%s11991_s6 + $0x10] sm:$0xff]   ;;  %v9805_v17 = vld [vmem:[%s11991_s6 + $0x18] sm:$0xff]  }
 0x6af   : > { %v8231_v35 = vpop.permute.xlu0 %8230 }
 0x6b6   : > { %9276 = vmatmul.mubr.msk.bf16.vlgmr.msra.gmra.mrb[200].mxu1 %vm342_vm2, %v9786_v42  ;;  %v8229_v42 = vpop.permute.xlu1 %8228 }
 0x6b7   : > { %7520 = vmatpush1.bf16.msra.mxu1 %v7514_v41  ;;  %7551 = vmatprep.mubr.bf16.mxu1 %v9824_v0  ;;  %v8234_v40 = vsel %vm2570_vm11, %v8229_v42, %v8231_v35  ;;  %v9808_v42 = vld [vmem:[%s11991_s6 + $0x30] sm:$0xff]  }
 0x6b8   : > { %9285 = vmatprep.subr.msk.bf16.mxu1 %vm346_vm1, %v7582_v26  ;;  %v8168_v26 = vsel %vm346_vm1, %v8162_v33, 0  ;;  %v9810_v33 = vld [vmem:[%s11991_s6 + $0x40] sm:$0xff]  }
 0x6ba   : > { %v8233_v41 = vpop.permute.xlu1 %8232 }
 0x6bb   : > { %v8235_v19 = vsel %vm2570_vm11, %v8231_v35, %v8233_v41  ;;  %vm12010_vm11 = vcmask 498688   ;;  %v9811_v35 = vld [vmem:[%s11991_s6 + $0x48] sm:$0xff]   ;;  %v9812_v41 = vld [vmem:[%s11991_s6 + $0x50] sm:$0xff]  }
 0x6be   : > { %v8303_v53 = vpop.permute.xlu1 %8302 }
 0x6c2   : > { %9281 = vmatmul.mubr.msk.bf16.vlgmr.msra.gmra.mrb[200].mxu1 %vm342_vm2, %v9787_v13  ;;  %v8301_v13 = vpop.permute.xlu0 %8300 }
 0x6c3   : > { %7593 = vmatpush1.bf16.msra.mxu1 %v7587_v31  ;;  %7624 = vmatprep.mubr.bf16.mxu1 %v9824_v0  ;;  %v8306_v18 = vsel %vm2798_vm12, %v8301_v13, %v8303_v53 }
 0x6c4   : > { %9290 = vmatprep.subr.msk.bf16.mxu1 %vm346_vm1, %v7654_v24  ;;  %v8240_v24 = vsel %vm346_vm1, %v8234_v40, 0 }
 0x6c6   : > { %v8305_v31 = vpop.permute.xlu0 %8304 }
 0x6c7   : > { %v8307_v46 = vsel %vm2798_vm12, %v8303_v53, %v8305_v31  ;;  %vm12011_vm12 = vmmov %vm12010_vm11 }
 0x6ca   : > { %v8375_v44 = vpop.permute.xlu0 %8374 }
 0x6ce   : > { %9286 = vmatmul.mubr.msk.bf16.vlgmr.msra.gmra.mrb[200].mxu1 %vm342_vm2, %v9788_v43  ;;  %v8373_v43 = vpop.permute.xlu1 %8372 }
 0x6cf   : > { %7665 = vmatpush1.bf16.msra.mxu1 %v7659_v5  ;;  %7696 = vmatprep.mubr.bf16.mxu1 %v9824_v0  ;;  %v8378_v55 = vsel %vm3026_vm13, %v8373_v43, %v8375_v44 }
 0x6d0   : > { %9295 = vmatprep.subr.msk.bf16.mxu1 %vm346_vm1, %v7726_v63  ;;  %v8312_v63 = vsel %vm346_vm1, %v8306_v18, 0 }
 0x6d2   : > { %v8377_v5 = vpop.permute.xlu1 %8376 }
 0x6d3   : > { %v8379_v50 = vsel %vm3026_vm13, %v8375_v44, %v8377_v5  ;;  %vm12012_vm13 = vcmask 490496  }
 0x6d4   : > { %vm12013_vm5 = vmmov %vm12012_vm13 }
 0x6d6   : > { %v8447_v56 = vpop.permute.xlu1 %8446 }
 0x6da   : > { %9291 = vmatmul.mubr.msk.bf16.vlgmr.msra.gmra.mrb[200].mxu1 %vm342_vm2, %v9789_v29  ;;  %v8445_v29 = vpop.permute.xlu0 %8444 }
 0x6db   : > { %7737 = vmatpush1.bf16.msra.mxu1 %v7731_v48  ;;  %7768 = vmatprep.mubr.bf16.mxu1 %v9824_v0  ;;  %v8450_v49 = vsel %vm12011_vm12, %v8445_v29, %v8447_v56 }
 0x6dc   : > { %9300 = vmatprep.subr.msk.bf16.mxu1 %vm346_vm1, %v7798_v11  ;;  %v8384_v11 = vsel %vm346_vm1, %v8378_v55, 0 }
 0x6de   : > { %v8449_v48 = vpop.permute.xlu0 %8448 }
 0x6df   : > { %v8451_v32 = vsel %vm12010_vm11, %v8447_v56, %v8449_v48 }
 0x6e6   : > { %9296 = vmatmul.mubr.msk.bf16.vlgmr.msra.gmra.mrb[200].mxu1 %vm342_vm2, %v9790_v45  ;;  %v8517_v45 = vpop.permute.xlu1 %8516 }
 0x6e7   : > { %7809 = vmatpush1.bf16.msra.mxu1 %v7803_v52  ;;  %7840 = vmatprep.mubr.bf16.mxu1 %v9824_v0  ;;  %v8456_v52 = vsel %vm346_vm1, %v8450_v49, 0 }
 0x6e8   : > { %9305 = vmatprep.subr.msk.bf16.mxu1 %vm346_vm1, %v7871_v4  ;;  %v8519_v4 = vpop.permute.xlu0 %8518 }
 0x6ea   : > { %v8521_v47 = vpop.permute.xlu1 %8520 }
 0x6eb   : > { %v8523_v22 = vsel %vm12012_vm13, %v8519_v4, %v8521_v47 }
 0x6f0   : > { %v8583_v6 = vpop.permute.xlu0 %8582 }
 0x6f2   : > { %9301 = vmatmul.mubr.msk.bf16.vlgmr.msra.gmra.mrb[200].mxu1 %vm342_vm2, %v9791_v34  ;;  %v8522_v34 = vsel %vm12013_vm5, %v8517_v45, %v8519_v4 }
 0x6f3   : > { %7882 = vmatpush1.bf16.msra.mxu1 %v7876_v10  ;;  %7913 = vmatprep.mubr.bf16.mxu1 %v9824_v0  ;;  %v8528_v14 = vsel %vm346_vm1, %v8522_v34, 0 }
 0x6f4   : > { %9310 = vmatprep.subr.msk.bf16.mxu1 %vm346_vm1, %v7944_v60 }
 0x6fe   : > { %9306 = vmatmul.mubr.msk.bf16.vlgmr.msra.gmra.mrb[200].mxu1 %vm342_vm2, %v9792_v37  ;;  %v8588_v37 = vpop.permute.xlu1 %8587 }
 0x6ff   : > { %7955 = vmatpush1.bf16.msra.mxu1 %v7949_v58  ;;  %7986 = vmatprep.mubr.bf16.mxu1 %v9824_v0 }
 0x700   : > { %9315 = vmatprep.subr.msk.bf16.mxu1 %vm346_vm1, %v8017_v2 }
 0x70a   : > { %9311 = vmatmul.mubr.msk.bf16.vlgmr.msra.gmra.mrb[200].mxu1 %vm342_vm2, %v9793_v57 }
 0x70b   : > { %8028 = vmatpush1.bf16.msra.mxu1 %v8022_v16  ;;  %8059 = vmatprep.mubr.bf16.mxu1 %v9824_v0 }
 0x70c   : > { %9320 = vmatprep.subr.msk.bf16.mxu1 %vm346_vm1, %v8090_v25 }
 0x716   : > { %9316 = vmatmul.mubr.msk.bf16.vlgmr.msra.gmra.mrb[200].mxu1 %vm342_vm2, %v9794_v8 }
 0x717   : > { %8101 = vmatpush1.bf16.msra.mxu1 %v8095_v15  ;;  %8132 = vmatprep.mubr.bf16.mxu1 %v9824_v0  ;;  %v9806_v15 = vld [vmem:[%s11991_s6 + $0x20] sm:$0xff]  }
 0x718   : > { %9325 = vmatprep.subr.msk.bf16.mxu1 %vm346_vm1, %v8163_v20  ;;  %v9807_v20 = vld [vmem:[%s11991_s6 + $0x28] sm:$0xff]  }
 0x722   : > { %9321 = vmatmul.mubr.msk.bf16.vlgmr.msra.gmra.mrb[200].mxu1 %vm342_vm2, %v9795_v21  ;;  %v9809_v21 = vld [vmem:[%s11991_s6 + $0x38] sm:$0xff]  }
 0x723   : > { %8174 = vmatpush1.bf16.msra.mxu1 %v8168_v26  ;;  %8205 = vmatprep.mubr.bf16.mxu1 %v9824_v0  ;;  %v9813_v26 = vld [vmem:[%s11991_s6 + $0x58] sm:$0xff]  }
 0x724   : > { %9330 = vmatprep.subr.msk.bf16.mxu1 %vm346_vm1, %v8235_v19  ;;  %v9814_v19 = vld [vmem:[%s11991_s6 + $0x60] sm:$0xff]  }
 0x72e   : > { %9326 = vmatmul.mubr.msk.bf16.vlgmr.msra.gmra.mrb[200].mxu1 %vm342_vm2, %v9796_v61  ;;  %v9815_v61 = vld [vmem:[%s11991_s6 + $0x68] sm:$0xff]  }
 0x72f   : > { %8246 = vmatpush1.bf16.msra.mxu1 %v8240_v24  ;;  %8277 = vmatprep.mubr.bf16.mxu1 %v9824_v0 }
 0x730   : > { %9335 = vmatprep.subr.msk.bf16.mxu1 %vm346_vm1, %v8307_v46 }
 0x73a   : > { %9331 = vmatmul.mubr.msk.bf16.vlgmr.msra.gmra.mrb[200].mxu1 %vm342_vm2, %v9797_v7 }
 0x73b   : > { %8318 = vmatpush1.bf16.msra.mxu1 %v8312_v63  ;;  %8349 = vmatprep.mubr.bf16.mxu1 %v9824_v0 }
 0x73c   : > { %9340 = vmatprep.subr.msk.bf16.mxu1 %vm346_vm1, %v8379_v50 }
 0x746   : > { %9336 = vmatmul.mubr.msk.bf16.vlgmr.msra.gmra.mrb[200].mxu1 %vm342_vm2, %v9798_v12 }
 0x747   : > { %8390 = vmatpush1.bf16.msra.mxu1 %v8384_v11  ;;  %8421 = vmatprep.mubr.bf16.mxu1 %v9824_v0 }
 0x748   : > { %9345 = vmatprep.subr.msk.bf16.mxu1 %vm346_vm1, %v8451_v32 }
 0x752   : > { %9341 = vmatmul.mubr.msk.bf16.vlgmr.msra.gmra.mrb[200].mxu1 %vm342_vm2, %v9799_v1 }
 0x753   : > { %8462 = vmatpush1.bf16.msra.mxu1 %v8456_v52  ;;  %8493 = vmatprep.mubr.bf16.mxu1 %v9824_v0 }
 0x754   : > { %9350 = vmatprep.subr.msk.bf16.mxu1 %vm346_vm1, %v8523_v22 }
 0x75e   : > { %9346 = vmatmul.mubr.msk.bf16.vlgmr.msra.gmra.mrb[200].mxu1 %vm342_vm2, %v9800_v62 }
 0x75f   : > { %8534 = vmatpush1.bf16.msra.mxu1 %v8528_v14  ;;  %8565 = vmatprep.mubr.bf16.mxu1 %v9824_v0 }
 0x760   : > { %8762 = vmatprep.subr.bf16.mxu1 %v9824_v0 }
 0x76a   : > { %9351 = vmatmul.mubr.msk.bf16.vlgmr.msra.gmra.mrb[200].mxu1 %vm342_vm2, %v9801_v59 }
 0x76b   : > { %8763 = vmatpush1.bf16.msra.mxu1 %v9802_v51 }
 0x76c   : > { %8764 = vmatprep.subr.bf16.mxu1 %v9824_v0 }
 0x76f   : > { %8765 = vmatpush1.bf16.msra.mxu1 %v9803_v36 }
 0x770   : > { %8766 = vmatprep.subr.bf16.mxu1 %v9824_v0 }
 0x773   : > { %8767 = vmatpush1.bf16.msra.mxu1 %v9804_v54 }
 0x774   : > { %8768 = vmatprep.subr.bf16.mxu1 %v9824_v0 }
 0x777   : > { %8769 = vmatpush1.bf16.msra.mxu1 %v9805_v17 }
 0x778   : > { %8770 = vmatprep.subr.bf16.mxu1 %v9824_v0 }
 0x77b   : > { %8771 = vmatpush1.bf16.msra.mxu1 %v9806_v15 }
 0x77c   : > { %8772 = vmatprep.subr.bf16.mxu1 %v9824_v0 }
 0x77f   : > { %8773 = vmatpush1.bf16.msra.mxu1 %v9807_v20 }
 0x780   : > { %8774 = vmatprep.subr.bf16.mxu1 %v9824_v0 }
 0x783   : > { %8775 = vmatpush1.bf16.msra.mxu1 %v9808_v42 }
 0x784   : > { %8776 = vmatprep.subr.bf16.mxu1 %v9824_v0 }
 0x787   : > { %8777 = vmatpush1.bf16.msra.mxu1 %v9809_v21 }
 0x788   : > { %8778 = vmatprep.subr.bf16.mxu1 %v9824_v0 }
 0x78b   : > { %8779 = vmatpush1.bf16.msra.mxu1 %v9810_v33 }
 0x78c   : > { %8780 = vmatprep.subr.bf16.mxu1 %v9824_v0 }
 0x78f   : > { %8781 = vmatpush1.bf16.msra.mxu1 %v9811_v35 }
 0x790   : > { %8782 = vmatprep.subr.bf16.mxu1 %v9824_v0 }
 0x793   : > { %8783 = vmatpush1.bf16.msra.mxu1 %v9812_v41 }
 0x794   : > { %8784 = vmatprep.subr.bf16.mxu1 %v9824_v0 }
 0x797   : > { %8785 = vmatpush1.bf16.msra.mxu1 %v9813_v26 }
 0x798   : > { %8786 = vmatprep.subr.bf16.mxu1 %v9824_v0 }
 0x79b   : > { %8787 = vmatpush1.bf16.msra.mxu1 %v9814_v19 }
 0x79c   : > { %8788 = vmatprep.subr.bf16.mxu1 %v9824_v0 }
 0x79f   : > { %8789 = vmatpush1.bf16.msra.mxu1 %v9815_v61 }
 0x83d   : > { %v8567_v10 = vpop.f32.mrb[200].mxu1 }
 0x83e   : > { %v11906_v60 = vadd.f32 %v8583_v6, %v8567_v10  ;;  %v8569_v3 = vpop.f32.mrb[201].mxu1 }
 0x83f   : > { %v8591_v28 = vadd.f32 %v8583_v6, %v8569_v3  ;;  %v8571_v27 = vpop.f32.mrb[202].mxu1 }
 0x840   : > { %v11908_v30 = vadd.f32 %v8588_v37, %v8571_v27  ;;  %v8573_v58 = vpop.f32.mrb[203].mxu1  ;;  %v8594_v57 = vmax.f32 %v11906_v60, 0.0 }
 0x841   : > { %v8595_v2 = vmax.f32 %v8591_v28, 0.0  ;;  %v8593_v39 = vadd.f32 %v8588_v37, %v8573_v58 }
 0x842   : > { %v8596_v25 = vmax.f32 %v11908_v30, 0.0 }
 0x843   : > { %v8598_v23 = vsel %vm1430_vm6, %v8595_v2, 0.0  ;;  %v8597_v38 = vmax.f32 %v8593_v39, 0.0 }
 0x844   : > { %v9565_v16 = vpack.i.bf16 %v8598_v23, %v8594_v57 }
 0x845   : > { %v8599_v8 = vsel %vm1430_vm6, %v8597_v38, 0.0 }
 0x846   : > { %v9570_v9 = vpack.i.bf16 %v8599_v8, %v8596_v25  ;;  %9566 = vrot.lane.b32.xlu1 %v9565_v16, %s9825_s30 }
 0x848   : > { %9571 = vrot.lane.b32.xlu0 %v9570_v9, %s9825_s30 }
 0x8b8   : > { %v9567_v13 = vpop.permute.xlu1 %9566 }
 0x8b9   : > { %v9569_v40 = vunpack.i.h.bf16 %v9567_v13  ;;  %v9568_v53 = vunpack.i.l.bf16 %v9567_v13 }
 0x8ba   : > { %v9572_v31 = vpop.permute.xlu0 %9571 }
 0x8bb   : > { %v8619_v24 = vmax.f32 %v8598_v23, %v9569_v40  ;;  %v8612_v46 = vsel %vm333_vm0, %v9568_v53, %v9569_v40  ;;  %v9574_v43 = vunpack.i.h.bf16 %v9572_v31  ;;  %v9573_v7 = vunpack.i.l.bf16 %v9572_v31 }
 0x8bc   : > { %v8618_v18 = vmax.f32 %v8594_v57, %v8612_v46 }
 0x8bd   : > { %v8621_v44 = vmax.f32 %v8599_v8, %v9574_v43  ;;  %v8613_v5 = vsel %vm333_vm0, %v9573_v7, %v9574_v43  ;;  %vm8811_vm0 = vcmask 257024  }
 0x8be   : > { %v9575_v63 = vpack.i.bf16 %v8619_v24, %v8618_v18  ;;  %v8620_v0 = vmax.f32 %v8596_v25, %v8613_v5 }
 0x8c0   : > { %v9580_v50 = vpack.i.bf16 %v8621_v44, %v8620_v0  ;;  %9576 = vrot.lane.b32.xlu1 %v9575_v63, %s9845_s26 }
 0x8c2   : > { %9581 = vrot.lane.b32.xlu0 %v9580_v50, %s9845_s26  ;;  %s9371_s26 = sshll.u32 %s12015_s25, 3 }
 0x8c3   : > { %s278_s30 = scalar_lea.vmem %s11992_s7, %s9371_s26 }
 0x932   : > { %v9577_v29 = vpop.permute.xlu1 %9576 }
 0x933   : > { %v9579_v12 = vunpack.i.h.bf16 %v9577_v29  ;;  %v9578_v55 = vunpack.i.l.bf16 %v9577_v29 }
 0x934   : > { %v9582_v56 = vpop.permute.xlu0 %9581 }
 0x935   : > { %v8635_v48 = vsel %vm7159_vm3, %v9578_v55, %v9579_v12  ;;  %v9584_v11 = vunpack.i.h.bf16 %v9582_v56  ;;  %v9583_v32 = vunpack.i.l.bf16 %v9582_v56  ;;  %v8642_v45 = vmax.f32 %v8619_v24, %v9579_v12 }
 0x936   : > { %v8641_v47 = vmax.f32 %v8618_v18, %v8635_v48 }
 0x937   : > { %v8644_v1 = vmax.f32 %v8621_v44, %v9584_v11  ;;  %v8636_v49 = vsel %vm7159_vm3, %v9583_v32, %v9584_v11 }
 0x938   : > { %v8643_v52 = vmax.f32 %v8620_v0, %v8636_v49 }
 0x939   : > { %v8646_v4 = vpack.c.bf16 %v8644_v1, %v8642_v45 }
 0x93a   : > { %v8645_v22 = vpack.c.bf16 %v8643_v52, %v8641_v47 }
 0x93b   : > { %9366 = vmatprep.mubr.msk.bf16.mxu1 %vm1430_vm6, %v8646_v4 }
 0x93c   : > { %8795 = vmatmul.mubr.bf16.vlgmr.msra.gmra.mrb[204].mxu1 %v8645_v22 }
 0xa0f   : > { %v8796_v62 = vpop.f32.mrb[204].mxu1 }
 0xa10   : > { %v9372_v34 = vpack.c.bf16 %v8796_v62, %v8796_v62  ;;  %v8798_v14 = vpop.f32.mrb[205].mxu1 }
 0xa11   : > { %v8799_v59 = vpop.f32.mrb[206].mxu1 }
 0xa12   : > { %8812 = vst.msk [vmem:[%s278_s30] sm:$0xf] %vm8811_vm0, %v9372_v34  ;;  %v9373_v6 = vpack.c.bf16 %v8799_v59, %v8799_v59  ;;  %v8801_v10 = vpop.f32.mrb[207].mxu1 }
 0xa14   : > { %8813 = vst.msk [vmem:[%s278_s30 + $0x4] sm:$0xf] %vm8811_vm0, %v9373_v6 }
 0xa15 PF: > { %s17_s24 = sadd.s32 1, %s9822_s24  }
 0xa16   : > { %p14_p4 = scmp.ge.s32.totalorder %s17_s24, 4  }
 0xa18   :  { %16 = sbr.rel (!%p14_p4) target bundleno = 1 (0x1), region = 126 }

</bundles_post_ra>
